<compile_context>
chip_gen: v6e
topology: v6e:2x2x1
jax: 0.10.0
libtpu: 0.0.40
codegen_flags: <defaults>
</compile_context>

<pallas_src>
import functools

import jax
import jax.numpy as jnp
from jax.experimental import pallas as pl
from jax.experimental.pallas import tpu as pltpu


# ----------------------------------------------------------------------------
# In-kernel helpers (operate on values, not refs)
# ----------------------------------------------------------------------------
def _conv3x3_cm(x_cm, w_mat, H, W):
    """3x3 conv, padding=1, channel-major in/out.

    x_cm  : (Cin, H*W)     channel-major flat-spatial activation
    w_mat : (Cout, 9*Cin)  weights, column order (kh, kw, cin)
    returns (Cout, H*W) f32
    """
    c = x_cm.shape[0]
    # (Cin, HW) -> (HW, Cin) -> (H, W, Cin): 2-D transpose + major-dim split.
    x_hwc = x_cm.T.reshape(H, W, c)
    # Zero-pad in VMEM via concatenation (no HBM round trip).
    zr = jnp.zeros((1, W, c), jnp.float32)
    zc = jnp.zeros((H + 2, 1, c), jnp.float32)
    xp = jnp.concatenate([zr, x_hwc, zr], axis=0)          # (H+2, W,   C)
    xp = jnp.concatenate([zc, xp, zc], axis=1)             # (H+2, W+2, C)
    # im2col built once: 9 taps concatenated along the contraction axis.
    taps = [
        xp[kh:kh + H, kw:kw + W, :].reshape(H * W, c)
        for kh in range(3) for kw in range(3)
    ]
    patches = jnp.concatenate(taps, axis=1)                # (H*W, 9*Cin)
    # Single K=9*Cin contraction; contraction on the last dim of both operands
    # yields a lane-dense (Cout, H*W) accumulator.
    return jax.lax.dot_general(
        w_mat, patches, (((1,), (1,)), ((), ())),
        preferred_element_type=jnp.float32)                # (Cout, H*W)


def _moments(y):
    """Per-channel partial stats of y (C, HW): (sum, centered M2), each (C, 1)."""
    hw = y.shape[1]
    s = jnp.sum(y, axis=1, keepdims=True)                  # (C, 1)
    mu = s * (1.0 / hw)
    d = y - mu
    m2 = jnp.sum(d * d, axis=1, keepdims=True)             # (C, 1)
    return s, m2


# ----------------------------------------------------------------------------
# Kernels (grid = (N,), one batch element per step, marked "parallel")
# ----------------------------------------------------------------------------
def conv1_kernel(x_ref, w_ref, y_ref, sum_ref, m2_ref, *, H, W):
    """conv1 + BN1 partial stats.

    x_ref : (1, Cin, H*W)   w_ref : (Cmid, 9*Cin)
    y_ref : (1, Cmid, H*W)  sum_ref/m2_ref : (1, Cmid, 1)
    """
    x = x_ref[0].astype(jnp.float32)                       # (Cin, H*W)
    y = _conv3x3_cm(x, w_ref[...], H, W)                   # (Cmid, H*W)
    y_ref[...] = y[None]
    s, m2 = _moments(y)
    sum_ref[...] = s[None]
    m2_ref[...] = m2[None]


def conv2_kernel(y1_ref, scale_ref, shift_ref, w_ref, y_ref, sum_ref, m2_ref,
                 *, H, W):
    """BN1 (folded scale/shift) + ReLU fused into conv2 + BN2 partial stats.

    y1_ref : (1, Cmid, H*W)   scale_ref/shift_ref : (Cmid, 1)
    w_ref  : (Cout, 9*Cmid)   y_ref : (1, Cout, H*W)
    """
    y1 = y1_ref[0]                                         # (Cmid, H*W)
    h = jnp.maximum(y1 * scale_ref[...] + shift_ref[...], 0.0)
    y = _conv3x3_cm(h, w_ref[...], H, W)                   # (Cout, H*W)
    y_ref[...] = y[None]
    s, m2 = _moments(y)
    sum_ref[...] = s[None]
    m2_ref[...] = m2[None]


def bn_relu_out_kernel(y_ref, scale_ref, shift_ref, o_ref):
    """BN2 (folded scale/shift) + ReLU writeback; lane-dense (C, H*W) tiles."""
    y = y_ref[0]
    o_ref[...] = jnp.maximum(y * scale_ref[...] + shift_ref[...], 0.0)[None]


# ----------------------------------------------------------------------------
# Host-side folding of BN stats (tiny (N, C, 1) arrays)
# ----------------------------------------------------------------------------
def _fold_bn(sums, m2s, gamma, beta, hw, eps=1e-5):
    """Welford-style combine of per-block partials -> folded affine (scale, shift).

    BN(y) = y * scale + shift, training-mode batch stats, biased variance.
    """
    n = sums.shape[0]
    total = n * hw
    mean = jnp.sum(sums, axis=0) / total                   # (C, 1)
    mu_b = sums / hw                                       # (N, C, 1)
    var = (jnp.sum(m2s, axis=0)
           + hw * jnp.sum((mu_b - mean) ** 2, axis=0)) / total
    scale = gamma.reshape(-1, 1) * jax.lax.rsqrt(var + eps)
    shift = beta.reshape(-1, 1) - mean * scale
    return scale, shift


# ----------------------------------------------------------------------------
# Pallas wrappers
# ----------------------------------------------------------------------------
_CPARAMS = pltpu.CompilerParams(
    dimension_semantics=("parallel",),
    vmem_limit_bytes=32 * 1024 * 1024,
)


def double_conv_forward(x_nchw, w1_mat, g1, b1, w2_mat, g2, b2):
    n, cin, H, W = x_nchw.shape
    hw = H * W
    cmid = w1_mat.shape[0]
    cout = w2_mat.shape[0]

    x_cm = x_nchw.reshape(n, cin, hw)          # free contiguous reshape (NCHW-flat)

    # --- stage 1: conv1 + BN1 partial stats --------------------------------
    y1, s1, m21 = pl.pallas_call(
        functools.partial(conv1_kernel, H=H, W=W),
        out_shape=(
            jax.ShapeDtypeStruct((n, cmid, hw), jnp.float32),
            jax.ShapeDtypeStruct((n, cmid, 1), jnp.float32),
            jax.ShapeDtypeStruct((n, cmid, 1), jnp.float32),
        ),
        grid=(n,),
        in_specs=[
            pl.BlockSpec((1, cin, hw), lambda b: (b, 0, 0)),
            pl.BlockSpec((cmid, 9 * cin), lambda b: (0, 0)),
        ],
        out_specs=(
            pl.BlockSpec((1, cmid, hw), lambda b: (b, 0, 0)),
            pl.BlockSpec((1, cmid, 1), lambda b: (b, 0, 0)),
            pl.BlockSpec((1, cmid, 1), lambda b: (b, 0, 0)),
        ),
        compiler_params=_CPARAMS,
    )(x_cm, w1_mat)

    scale1, shift1 = _fold_bn(s1, m21, g1, b1, hw)

    # --- stage 2: BN1+ReLU fused into conv2 + BN2 partial stats ------------
    y2, s2, m22 = pl.pallas_call(
        functools.partial(conv2_kernel, H=H, W=W),
        out_shape=(
            jax.ShapeDtypeStruct((n, cout, hw), jnp.float32),
            jax.ShapeDtypeStruct((n, cout, 1), jnp.float32),
            jax.ShapeDtypeStruct((n, cout, 1), jnp.float32),
        ),
        grid=(n,),
        in_specs=[
            pl.BlockSpec((1, cmid, hw), lambda b: (b, 0, 0)),
            pl.BlockSpec((cmid, 1), lambda b: (0, 0)),
            pl.BlockSpec((cmid, 1), lambda b: (0, 0)),
            pl.BlockSpec((cout, 9 * cmid), lambda b: (0, 0)),
        ],
        out_specs=(
            pl.BlockSpec((1, cout, hw), lambda b: (b, 0, 0)),
            pl.BlockSpec((1, cout, 1), lambda b: (b, 0, 0)),
            pl.BlockSpec((1, cout, 1), lambda b: (b, 0, 0)),
        ),
        compiler_params=_CPARAMS,
    )(y1, scale1, shift1, w2_mat)

    scale2, shift2 = _fold_bn(s2, m22, g2, b2, hw)

    # --- BN2+ReLU folded into the output writeback -------------------------
    out_flat = pl.pallas_call(
        bn_relu_out_kernel,
        out_shape=jax.ShapeDtypeStruct((n, cout, hw), jnp.float32),
        grid=(n,),
        in_specs=[
            pl.BlockSpec((1, cout, hw), lambda b: (b, 0, 0)),
            pl.BlockSpec((cout, 1), lambda b: (0, 0)),
            pl.BlockSpec((cout, 1), lambda b: (0, 0)),
        ],
        out_specs=pl.BlockSpec((1, cout, hw), lambda b: (b, 0, 0)),
        compiler_params=_CPARAMS,
    )(y2, scale2, shift2)

    # (N, Cout, H*W) is already NCHW-flat: reshape is a free metadata op.
    return out_flat.reshape(n, cout, H, W)


double_conv_pallas = jax.jit(double_conv_forward)


# ----------------------------------------------------------------------------
# Pure-JAX reference (mirrors the PyTorch module)
# ----------------------------------------------------------------------------
def ref_double_conv(x_nchw, w1_oihw, g1, b1, w2_oihw, g2, b2, eps=1e-5):
    def conv(x, w):
        return jax.lax.conv_general_dilated(
            x, w, window_strides=(1, 1), padding="SAME",
            dimension_numbers=("NCHW", "OIHW", "NCHW"))

    def bn_relu(y, g, b):
        mean = jnp.mean(y, axis=(0, 2, 3), keepdims=True)
        var = jnp.var(y, axis=(0, 2, 3), keepdims=True)    # biased
        z = (y - mean) / jnp.sqrt(var + eps)
        z = z * g.reshape(1, -1, 1, 1) + b.reshape(1, -1, 1, 1)
        return jnp.maximum(z, 0.0)

    h = bn_relu(conv(x_nchw, w1_oihw), g1, b1)
    return bn_relu(conv(h, w2_oihw), g2, b2)


# ----------------------------------------------------------------------------
# Main
# ----------------------------------------------------------------------------
if __name__ == "__main__":
    in_ch, out_ch, mid_ch = 4, 8, 8        # mid_channels defaults to out_channels
    N, H, W = 2, 16, 16
    K = 3

    key = jax.random.PRNGKey(0)
    kx, kw1, kw2 = jax.random.split(key, 3)

    x = jax.random.normal(kx, (N, in_ch, H, W), dtype=jnp.float32)

    # Conv2d default-ish init: U(-1/sqrt(fan_in), 1/sqrt(fan_in)), bias=False.
    def conv_init(k, cout, cin):
        bound = 1.0 / jnp.sqrt(cin * K * K)
        return jax.random.uniform(k, (cout, cin, K, K), jnp.float32, -bound, bound)

    w1_oihw = conv_init(kw1, mid_ch, in_ch)
    w2_oihw = conv_init(kw2, out_ch, mid_ch)

    # OIHW -> (Cout, 9*Cin) with column order (kh, kw, cin), matching the
    # in-kernel im2col tap ordering.
    def to_mat(w):
        co, ci, kh, kw = w.shape
        return jnp.transpose(w, (0, 2, 3, 1)).reshape(co, kh * kw * ci)

    w1_mat = to_mat(w1_oihw)
    w2_mat = to_mat(w2_oihw)

    # BatchNorm2d default init: weight=1, bias=0.
    g1 = jnp.ones((mid_ch,), jnp.float32)
    b1 = jnp.zeros((mid_ch,), jnp.float32)
    g2 = jnp.ones((out_ch,), jnp.float32)
    b2 = jnp.zeros((out_ch,), jnp.float32)

    out = double_conv_pallas(x, w1_mat, g1, b1, w2_mat, g2, b2)
    out = jax.block_until_ready(out)

    ref = ref_double_conv(x, w1_oihw, g1, b1, w2_oihw, g2, b2)
    assert out.shape == (N, out_ch, H, W), out.shape
    assert jnp.allclose(out, ref, rtol=1e-3, atol=1e-3), (
        float(jnp.max(jnp.abs(out - ref))))

    print("KERNEL_OK")
</pallas_src>

<mosaic_0001>
module attributes {stable_mosaic.version = 11 : i64} {
  func.func @conv1_kernel(%arg0: i32, %arg1: memref<1x4x256xf32, #tpu.memory_space<vmem>>, %arg2: memref<8x36xf32, #tpu.memory_space<vmem>>, %arg3: memref<1x8x256xf32, #tpu.memory_space<vmem>>, %arg4: memref<1x8x1xf32, #tpu.memory_space<vmem>>, %arg5: memref<1x8x1xf32, #tpu.memory_space<vmem>>) attributes {dimension_semantics = [#tpu.dimension_semantics<parallel>], iteration_bounds = array<i64: 2>, scalar_prefetch = 0 : i64, scratch_operands = 0 : i64, tpu.core_type = #tpu.core_type<tc>, window_params = [{transform_indices = @transform_0, window_bounds = array<i64: 1, 4, 256>}, {pipeline_mode = #tpu.pipeline_mode<synchronous>, transform_indices = @transform_1, window_bounds = array<i64: 8, 36>}, {transform_indices = @transform_2, window_bounds = array<i64: 1, 8, 256>}, {transform_indices = @transform_3, window_bounds = array<i64: 1, 8, 1>}, {transform_indices = @transform_4, window_bounds = array<i64: 1, 8, 1>}]} {
    %c0 = arith.constant 0 : index
    %c0_0 = arith.constant 0 : index
    %c0_1 = arith.constant 0 : index
    %0 = vector.load %arg1[%c0, %c0_0, %c0_1] : memref<1x4x256xf32, #tpu.memory_space<vmem>>, vector<1x4x256xf32>
    %1 = vector.shape_cast %0 : vector<1x4x256xf32> to vector<4x256xf32>
    %c0_2 = arith.constant 0 : index
    %c0_3 = arith.constant 0 : index
    %2 = vector.load %arg2[%c0_2, %c0_3] : memref<8x36xf32, #tpu.memory_space<vmem>>, vector<8x36xf32>
    %3 = tpu.transpose %1, [1, 0] : vector<4x256xf32> -> vector<256x4xf32>
    %4 = vector.shape_cast %3 : vector<256x4xf32> to vector<16x16x4xf32>
    %cst = arith.constant 0.000000e+00 : f32
    %5 = vector.broadcast %cst : f32 to vector<1x16x4xf32>
    %cst_4 = arith.constant 0.000000e+00 : f32
    %6 = vector.broadcast %cst_4 : f32 to vector<18x1x4xf32>
    %7 = tpu.concatenate %5, %4, %5 in 0 : vector<1x16x4xf32>, vector<16x16x4xf32>, vector<1x16x4xf32> -> vector<18x16x4xf32>
    %8 = tpu.concatenate %6, %7, %6 in 1 : vector<18x1x4xf32>, vector<18x16x4xf32>, vector<18x1x4xf32> -> vector<18x18x4xf32>
    %9 = vector.extract_strided_slice %8 {offsets = [0, 0, 0], sizes = [16, 16, 4], strides = [1, 1, 1]} : vector<18x18x4xf32> to vector<16x16x4xf32>
    %10 = vector.shape_cast %9 : vector<16x16x4xf32> to vector<256x4xf32>
    %11 = vector.extract_strided_slice %8 {offsets = [0, 1, 0], sizes = [16, 16, 4], strides = [1, 1, 1]} : vector<18x18x4xf32> to vector<16x16x4xf32>
    %12 = vector.shape_cast %11 : vector<16x16x4xf32> to vector<256x4xf32>
    %13 = vector.extract_strided_slice %8 {offsets = [0, 2, 0], sizes = [16, 16, 4], strides = [1, 1, 1]} : vector<18x18x4xf32> to vector<16x16x4xf32>
    %14 = vector.shape_cast %13 : vector<16x16x4xf32> to vector<256x4xf32>
    %15 = vector.extract_strided_slice %8 {offsets = [1, 0, 0], sizes = [16, 16, 4], strides = [1, 1, 1]} : vector<18x18x4xf32> to vector<16x16x4xf32>
    %16 = vector.shape_cast %15 : vector<16x16x4xf32> to vector<256x4xf32>
    %17 = vector.extract_strided_slice %8 {offsets = [1, 1, 0], sizes = [16, 16, 4], strides = [1, 1, 1]} : vector<18x18x4xf32> to vector<16x16x4xf32>
    %18 = vector.shape_cast %17 : vector<16x16x4xf32> to vector<256x4xf32>
    %19 = vector.extract_strided_slice %8 {offsets = [1, 2, 0], sizes = [16, 16, 4], strides = [1, 1, 1]} : vector<18x18x4xf32> to vector<16x16x4xf32>
    %20 = vector.shape_cast %19 : vector<16x16x4xf32> to vector<256x4xf32>
    %21 = vector.extract_strided_slice %8 {offsets = [2, 0, 0], sizes = [16, 16, 4], strides = [1, 1, 1]} : vector<18x18x4xf32> to vector<16x16x4xf32>
    %22 = vector.shape_cast %21 : vector<16x16x4xf32> to vector<256x4xf32>
    %23 = vector.extract_strided_slice %8 {offsets = [2, 1, 0], sizes = [16, 16, 4], strides = [1, 1, 1]} : vector<18x18x4xf32> to vector<16x16x4xf32>
    %24 = vector.shape_cast %23 : vector<16x16x4xf32> to vector<256x4xf32>
    %25 = vector.extract_strided_slice %8 {offsets = [2, 2, 0], sizes = [16, 16, 4], strides = [1, 1, 1]} : vector<18x18x4xf32> to vector<16x16x4xf32>
    %26 = vector.shape_cast %25 : vector<16x16x4xf32> to vector<256x4xf32>
    %27 = tpu.concatenate %10, %12, %14, %16, %18, %20, %22, %24, %26 in 1 : vector<256x4xf32>, vector<256x4xf32>, vector<256x4xf32>, vector<256x4xf32>, vector<256x4xf32>, vector<256x4xf32>, vector<256x4xf32>, vector<256x4xf32>, vector<256x4xf32> -> vector<256x36xf32>
    %cst_5 = arith.constant dense<0.000000e+00> : vector<8x256xf32>
    %28 = tpu.matmul %2, %27, %cst_5 {dimension_numbers = #tpu.dot_dimension_numbers<[1], [1], [0], [0], [0, 0, 1, 0], [], []>} : vector<8x36xf32>, vector<256x36xf32>, vector<8x256xf32> -> vector<8x256xf32>
    %29 = vector.shape_cast %28 : vector<8x256xf32> to vector<1x8x256xf32>
    %c0_6 = arith.constant 0 : index
    %c0_7 = arith.constant 0 : index
    %c0_8 = arith.constant 0 : index
    %30 = vector.load %arg3[%c0_6, %c0_7, %c0_8] : memref<1x8x256xf32, #tpu.memory_space<vmem>>, vector<1x8x256xf32>
    tpu.vector_store %arg3[%c0_6, %c0_7, %c0_8], %29 {strides = array<i32>} : memref<1x8x256xf32, #tpu.memory_space<vmem>>, vector<1x8x256xf32>,
    %cst_9 = arith.constant dense<0.000000e+00> : vector<8xf32>
    %31 = vector.multi_reduction <add>, %28, %cst_9 [1] : vector<8x256xf32> to vector<8xf32>
    %32 = vector.shape_cast %31 : vector<8xf32> to vector<8x1xf32>
    %cst_10 = arith.constant 3.906250e-03 : f32
    %33 = vector.broadcast %cst_10 : f32 to vector<8x1xf32>
    %34 = arith.mulf %32, %33 : vector<8x1xf32>
    %35 = vector.broadcast %34 : vector<8x1xf32> to vector<8x256xf32>
    %36 = arith.subf %28, %35 : vector<8x256xf32>
    %37 = arith.mulf %36, %36 : vector<8x256xf32>
    %cst_11 = arith.constant dense<0.000000e+00> : vector<8xf32>
    %38 = vector.multi_reduction <add>, %37, %cst_11 [1] : vector<8x256xf32> to vector<8xf32>
    %39 = vector.shape_cast %38 : vector<8xf32> to vector<8x1xf32>
    %40 = vector.shape_cast %32 : vector<8x1xf32> to vector<1x8x1xf32>
    %c0_12 = arith.constant 0 : index
    %c0_13 = arith.constant 0 : index
    %c0_14 = arith.constant 0 : index
    %41 = vector.load %arg4[%c0_12, %c0_13, %c0_14] : memref<1x8x1xf32, #tpu.memory_space<vmem>>, vector<1x8x1xf32>
    tpu.vector_store %arg4[%c0_12, %c0_13, %c0_14], %40 {strides = array<i32>} : memref<1x8x1xf32, #tpu.memory_space<vmem>>, vector<1x8x1xf32>,
    %42 = vector.shape_cast %39 : vector<8x1xf32> to vector<1x8x1xf32>
    %c0_15 = arith.constant 0 : index
    %c0_16 = arith.constant 0 : index
    %c0_17 = arith.constant 0 : index
    %43 = vector.load %arg5[%c0_15, %c0_16, %c0_17] : memref<1x8x1xf32, #tpu.memory_space<vmem>>, vector<1x8x1xf32>
    tpu.vector_store %arg5[%c0_15, %c0_16, %c0_17], %42 {strides = array<i32>} : memref<1x8x1xf32, #tpu.memory_space<vmem>>, vector<1x8x1xf32>,
    return
  }
  func.func @transform_0(%arg0: i32) -> (i32, i32, i32) {
    %c0_i32 = arith.constant 0 : i32
    %c0_i32_0 = arith.constant 0 : i32
    %c0_i32_1 = arith.constant 0 : i32
    return %arg0, %c0_i32, %c0_i32_0 : i32, i32, i32
  }
  func.func @transform_1(%arg0: i32) -> (i32, i32) {
    %c0_i32 = arith.constant 0 : i32
    %c0_i32_0 = arith.constant 0 : i32
    %c0_i32_1 = arith.constant 0 : i32
    return %c0_i32, %c0_i32_0 : i32, i32
  }
  func.func @transform_2(%arg0: i32) -> (i32, i32, i32) {
    %c0_i32 = arith.constant 0 : i32
    %c0_i32_0 = arith.constant 0 : i32
    %c0_i32_1 = arith.constant 0 : i32
    return %arg0, %c0_i32, %c0_i32_0 : i32, i32, i32
  }
  func.func @transform_3(%arg0: i32) -> (i32, i32, i32) {
    %c0_i32 = arith.constant 0 : i32
    %c0_i32_0 = arith.constant 0 : i32
    %c0_i32_1 = arith.constant 0 : i32
    return %arg0, %c0_i32, %c0_i32_0 : i32, i32, i32
  }
  func.func @transform_4(%arg0: i32) -> (i32, i32, i32) {
    %c0_i32 = arith.constant 0 : i32
    %c0_i32_0 = arith.constant 0 : i32
    %c0_i32_1 = arith.constant 0 : i32
    return %arg0, %c0_i32, %c0_i32_0 : i32, i32, i32
  }
}

module attributes {stable_mosaic.version = 11 : i64} {
  func.func @bn_relu_out_kernel(%arg0: i32, %arg1: memref<1x8x256xf32, #tpu.memory_space<vmem>>, %arg2: memref<8x1xf32, #tpu.memory_space<vmem>>, %arg3: memref<8x1xf32, #tpu.memory_space<vmem>>, %arg4: memref<1x8x256xf32, #tpu.memory_space<vmem>>) attributes {dimension_semantics = [#tpu.dimension_semantics<parallel>], iteration_bounds = array<i64: 2>, scalar_prefetch = 0 : i64, scratch_operands = 0 : i64, tpu.core_type = #tpu.core_type<tc>, window_params = [{transform_indices = @transform_0, window_bounds = array<i64: 1, 8, 256>}, {pipeline_mode = #tpu.pipeline_mode<synchronous>, transform_indices = @transform_1, window_bounds = array<i64: 8, 1>}, {pipeline_mode = #tpu.pipeline_mode<synchronous>, transform_indices = @transform_2, window_bounds = array<i64: 8, 1>}, {transform_indices = @transform_3, window_bounds = array<i64: 1, 8, 256>}]} {
    %c0 = arith.constant 0 : index
    %c0_0 = arith.constant 0 : index
    %c0_1 = arith.constant 0 : index
    %0 = vector.load %arg1[%c0, %c0_0, %c0_1] : memref<1x8x256xf32, #tpu.memory_space<vmem>>, vector<1x8x256xf32>
    %1 = vector.shape_cast %0 : vector<1x8x256xf32> to vector<8x256xf32>
    %c0_2 = arith.constant 0 : index
    %c0_3 = arith.constant 0 : index
    %2 = vector.load %arg2[%c0_2, %c0_3] : memref<8x1xf32, #tpu.memory_space<vmem>>, vector<8x1xf32>
    %3 = vector.broadcast %2 : vector<8x1xf32> to vector<8x256xf32>
    %4 = arith.mulf %1, %3 : vector<8x256xf32>
    %c0_4 = arith.constant 0 : index
    %c0_5 = arith.constant 0 : index
    %5 = vector.load %arg3[%c0_4, %c0_5] : memref<8x1xf32, #tpu.memory_space<vmem>>, vector<8x1xf32>
    %6 = vector.broadcast %5 : vector<8x1xf32> to vector<8x256xf32>
    %7 = arith.addf %4, %6 : vector<8x256xf32>
    %cst = arith.constant 0.000000e+00 : f32
    %8 = vector.broadcast %cst : f32 to vector<8x256xf32>
    %9 = arith.maximumf %7, %8 : vector<8x256xf32>
    %10 = vector.shape_cast %9 : vector<8x256xf32> to vector<1x8x256xf32>
    %c0_6 = arith.constant 0 : index
    %c0_7 = arith.constant 0 : index
    %c0_8 = arith.constant 0 : index
    %11 = vector.load %arg4[%c0_6, %c0_7, %c0_8] : memref<1x8x256xf32, #tpu.memory_space<vmem>>, vector<1x8x256xf32>
    tpu.vector_store %arg4[%c0_6, %c0_7, %c0_8], %10 {strides = array<i32>} : memref<1x8x256xf32, #tpu.memory_space<vmem>>, vector<1x8x256xf32>,
    return
  }
  func.func @transform_0(%arg0: i32) -> (i32, i32, i32) {
    %c0_i32 = arith.constant 0 : i32
    %c0_i32_0 = arith.constant 0 : i32
    %c0_i32_1 = arith.constant 0 : i32
    return %arg0, %c0_i32, %c0_i32_0 : i32, i32, i32
  }
  func.func @transform_1(%arg0: i32) -> (i32, i32) {
    %c0_i32 = arith.constant 0 : i32
    %c0_i32_0 = arith.constant 0 : i32
    %c0_i32_1 = arith.constant 0 : i32
    return %c0_i32, %c0_i32_0 : i32, i32
  }
  func.func @transform_2(%arg0: i32) -> (i32, i32) {
    %c0_i32 = arith.constant 0 : i32
    %c0_i32_0 = arith.constant 0 : i32
    %c0_i32_1 = arith.constant 0 : i32
    return %c0_i32, %c0_i32_0 : i32, i32
  }
  func.func @transform_3(%arg0: i32) -> (i32, i32, i32) {
    %c0_i32 = arith.constant 0 : i32
    %c0_i32_0 = arith.constant 0 : i32
    %c0_i32_1 = arith.constant 0 : i32
    return %arg0, %c0_i32, %c0_i32_0 : i32, i32, i32
  }
}

module attributes {stable_mosaic.version = 11 : i64} {
  func.func @conv2_kernel(%arg0: i32, %arg1: memref<1x8x256xf32, #tpu.memory_space<vmem>>, %arg2: memref<8x1xf32, #tpu.memory_space<vmem>>, %arg3: memref<8x1xf32, #tpu.memory_space<vmem>>, %arg4: memref<8x72xf32, #tpu.memory_space<vmem>>, %arg5: memref<1x8x256xf32, #tpu.memory_space<vmem>>, %arg6: memref<1x8x1xf32, #tpu.memory_space<vmem>>, %arg7: memref<1x8x1xf32, #tpu.memory_space<vmem>>) attributes {dimension_semantics = [#tpu.dimension_semantics<parallel>], iteration_bounds = array<i64: 2>, scalar_prefetch = 0 : i64, scratch_operands = 0 : i64, tpu.core_type = #tpu.core_type<tc>, window_params = [{transform_indices = @transform_0, window_bounds = array<i64: 1, 8, 256>}, {pipeline_mode = #tpu.pipeline_mode<synchronous>, transform_indices = @transform_1, window_bounds = array<i64: 8, 1>}, {pipeline_mode = #tpu.pipeline_mode<synchronous>, transform_indices = @transform_2, window_bounds = array<i64: 8, 1>}, {pipeline_mode = #tpu.pipeline_mode<synchronous>, transform_indices = @transform_3, window_bounds = array<i64: 8, 72>}, {transform_indices = @transform_4, window_bounds = array<i64: 1, 8, 256>}, {transform_indices = @transform_5, window_bounds = array<i64: 1, 8, 1>}, {transform_indices = @transform_6, window_bounds = array<i64: 1, 8, 1>}]} {
    %c0 = arith.constant 0 : index
    %c0_0 = arith.constant 0 : index
    %c0_1 = arith.constant 0 : index
    %0 = vector.load %arg1[%c0, %c0_0, %c0_1] : memref<1x8x256xf32, #tpu.memory_space<vmem>>, vector<1x8x256xf32>
    %1 = vector.shape_cast %0 : vector<1x8x256xf32> to vector<8x256xf32>
    %c0_2 = arith.constant 0 : index
    %c0_3 = arith.constant 0 : index
    %2 = vector.load %arg2[%c0_2, %c0_3] : memref<8x1xf32, #tpu.memory_space<vmem>>, vector<8x1xf32>
    %3 = vector.broadcast %2 : vector<8x1xf32> to vector<8x256xf32>
    %4 = arith.mulf %1, %3 : vector<8x256xf32>
    %c0_4 = arith.constant 0 : index
    %c0_5 = arith.constant 0 : index
    %5 = vector.load %arg3[%c0_4, %c0_5] : memref<8x1xf32, #tpu.memory_space<vmem>>, vector<8x1xf32>
    %6 = vector.broadcast %5 : vector<8x1xf32> to vector<8x256xf32>
    %7 = arith.addf %4, %6 : vector<8x256xf32>
    %cst = arith.constant 0.000000e+00 : f32
    %8 = vector.broadcast %cst : f32 to vector<8x256xf32>
    %9 = arith.maximumf %7, %8 : vector<8x256xf32>
    %c0_6 = arith.constant 0 : index
    %c0_7 = arith.constant 0 : index
    %10 = vector.load %arg4[%c0_6, %c0_7] : memref<8x72xf32, #tpu.memory_space<vmem>>, vector<8x72xf32>
    %11 = tpu.transpose %9, [1, 0] : vector<8x256xf32> -> vector<256x8xf32>
    %12 = vector.shape_cast %11 : vector<256x8xf32> to vector<16x16x8xf32>
    %cst_8 = arith.constant 0.000000e+00 : f32
    %13 = vector.broadcast %cst_8 : f32 to vector<1x16x8xf32>
    %cst_9 = arith.constant 0.000000e+00 : f32
    %14 = vector.broadcast %cst_9 : f32 to vector<18x1x8xf32>
    %15 = tpu.concatenate %13, %12, %13 in 0 : vector<1x16x8xf32>, vector<16x16x8xf32>, vector<1x16x8xf32> -> vector<18x16x8xf32>
    %16 = tpu.concatenate %14, %15, %14 in 1 : vector<18x1x8xf32>, vector<18x16x8xf32>, vector<18x1x8xf32> -> vector<18x18x8xf32>
    %17 = vector.extract_strided_slice %16 {offsets = [0, 0, 0], sizes = [16, 16, 8], strides = [1, 1, 1]} : vector<18x18x8xf32> to vector<16x16x8xf32>
    %18 = vector.shape_cast %17 : vector<16x16x8xf32> to vector<256x8xf32>
    %19 = vector.extract_strided_slice %16 {offsets = [0, 1, 0], sizes = [16, 16, 8], strides = [1, 1, 1]} : vector<18x18x8xf32> to vector<16x16x8xf32>
    %20 = vector.shape_cast %19 : vector<16x16x8xf32> to vector<256x8xf32>
    %21 = vector.extract_strided_slice %16 {offsets = [0, 2, 0], sizes = [16, 16, 8], strides = [1, 1, 1]} : vector<18x18x8xf32> to vector<16x16x8xf32>
    %22 = vector.shape_cast %21 : vector<16x16x8xf32> to vector<256x8xf32>
    %23 = vector.extract_strided_slice %16 {offsets = [1, 0, 0], sizes = [16, 16, 8], strides = [1, 1, 1]} : vector<18x18x8xf32> to vector<16x16x8xf32>
    %24 = vector.shape_cast %23 : vector<16x16x8xf32> to vector<256x8xf32>
    %25 = vector.extract_strided_slice %16 {offsets = [1, 1, 0], sizes = [16, 16, 8], strides = [1, 1, 1]} : vector<18x18x8xf32> to vector<16x16x8xf32>
    %26 = vector.shape_cast %25 : vector<16x16x8xf32> to vector<256x8xf32>
    %27 = vector.extract_strided_slice %16 {offsets = [1, 2, 0], sizes = [16, 16, 8], strides = [1, 1, 1]} : vector<18x18x8xf32> to vector<16x16x8xf32>
    %28 = vector.shape_cast %27 : vector<16x16x8xf32> to vector<256x8xf32>
    %29 = vector.extract_strided_slice %16 {offsets = [2, 0, 0], sizes = [16, 16, 8], strides = [1, 1, 1]} : vector<18x18x8xf32> to vector<16x16x8xf32>
    %30 = vector.shape_cast %29 : vector<16x16x8xf32> to vector<256x8xf32>
    %31 = vector.extract_strided_slice %16 {offsets = [2, 1, 0], sizes = [16, 16, 8], strides = [1, 1, 1]} : vector<18x18x8xf32> to vector<16x16x8xf32>
    %32 = vector.shape_cast %31 : vector<16x16x8xf32> to vector<256x8xf32>
    %33 = vector.extract_strided_slice %16 {offsets = [2, 2, 0], sizes = [16, 16, 8], strides = [1, 1, 1]} : vector<18x18x8xf32> to vector<16x16x8xf32>
    %34 = vector.shape_cast %33 : vector<16x16x8xf32> to vector<256x8xf32>
    %35 = tpu.concatenate %18, %20, %22, %24, %26, %28, %30, %32, %34 in 1 : vector<256x8xf32>, vector<256x8xf32>, vector<256x8xf32>, vector<256x8xf32>, vector<256x8xf32>, vector<256x8xf32>, vector<256x8xf32>, vector<256x8xf32>, vector<256x8xf32> -> vector<256x72xf32>
    %cst_10 = arith.constant dense<0.000000e+00> : vector<8x256xf32>
    %36 = tpu.matmul %10, %35, %cst_10 {dimension_numbers = #tpu.dot_dimension_numbers<[1], [1], [0], [0], [0, 0, 1, 0], [], []>} : vector<8x72xf32>, vector<256x72xf32>, vector<8x256xf32> -> vector<8x256xf32>
    %37 = vector.shape_cast %36 : vector<8x256xf32> to vector<1x8x256xf32>
    %c0_11 = arith.constant 0 : index
    %c0_12 = arith.constant 0 : index
    %c0_13 = arith.constant 0 : index
    %38 = vector.load %arg5[%c0_11, %c0_12, %c0_13] : memref<1x8x256xf32, #tpu.memory_space<vmem>>, vector<1x8x256xf32>
    tpu.vector_store %arg5[%c0_11, %c0_12, %c0_13], %37 {strides = array<i32>} : memref<1x8x256xf32, #tpu.memory_space<vmem>>, vector<1x8x256xf32>,
    %cst_14 = arith.constant dense<0.000000e+00> : vector<8xf32>
    %39 = vector.multi_reduction <add>, %36, %cst_14 [1] : vector<8x256xf32> to vector<8xf32>
    %40 = vector.shape_cast %39 : vector<8xf32> to vector<8x1xf32>
    %cst_15 = arith.constant 3.906250e-03 : f32
    %41 = vector.broadcast %cst_15 : f32 to vector<8x1xf32>
    %42 = arith.mulf %40, %41 : vector<8x1xf32>
    %43 = vector.broadcast %42 : vector<8x1xf32> to vector<8x256xf32>
    %44 = arith.subf %36, %43 : vector<8x256xf32>
    %45 = arith.mulf %44, %44 : vector<8x256xf32>
    %cst_16 = arith.constant dense<0.000000e+00> : vector<8xf32>
    %46 = vector.multi_reduction <add>, %45, %cst_16 [1] : vector<8x256xf32> to vector<8xf32>
    %47 = vector.shape_cast %46 : vector<8xf32> to vector<8x1xf32>
    %48 = vector.shape_cast %40 : vector<8x1xf32> to vector<1x8x1xf32>
    %c0_17 = arith.constant 0 : index
    %c0_18 = arith.constant 0 : index
    %c0_19 = arith.constant 0 : index
    %49 = vector.load %arg6[%c0_17, %c0_18, %c0_19] : memref<1x8x1xf32, #tpu.memory_space<vmem>>, vector<1x8x1xf32>
    tpu.vector_store %arg6[%c0_17, %c0_18, %c0_19], %48 {strides = array<i32>} : memref<1x8x1xf32, #tpu.memory_space<vmem>>, vector<1x8x1xf32>,
    %50 = vector.shape_cast %47 : vector<8x1xf32> to vector<1x8x1xf32>
    %c0_20 = arith.constant 0 : index
    %c0_21 = arith.constant 0 : index
    %c0_22 = arith.constant 0 : index
    %51 = vector.load %arg7[%c0_20, %c0_21, %c0_22] : memref<1x8x1xf32, #tpu.memory_space<vmem>>, vector<1x8x1xf32>
    tpu.vector_store %arg7[%c0_20, %c0_21, %c0_22], %50 {strides = array<i32>} : memref<1x8x1xf32, #tpu.memory_space<vmem>>, vector<1x8x1xf32>,
    return
  }
  func.func @transform_0(%arg0: i32) -> (i32, i32, i32) {
    %c0_i32 = arith.constant 0 : i32
    %c0_i32_0 = arith.constant 0 : i32
    %c0_i32_1 = arith.constant 0 : i32
    return %arg0, %c0_i32, %c0_i32_0 : i32, i32, i32
  }
  func.func @transform_1(%arg0: i32) -> (i32, i32) {
    %c0_i32 = arith.constant 0 : i32
    %c0_i32_0 = arith.constant 0 : i32
    %c0_i32_1 = arith.constant 0 : i32
    return %c0_i32, %c0_i32_0 : i32, i32
  }
  func.func @transform_2(%arg0: i32) -> (i32, i32) {
    %c0_i32 = arith.constant 0 : i32
    %c0_i32_0 = arith.constant 0 : i32
    %c0_i32_1 = arith.constant 0 : i32
    return %c0_i32, %c0_i32_0 : i32, i32
  }
  func.func @transform_3(%arg0: i32) -> (i32, i32) {
    %c0_i32 = arith.constant 0 : i32
    %c0_i32_0 = arith.constant 0 : i32
    %c0_i32_1 = arith.constant 0 : i32
    return %c0_i32, %c0_i32_0 : i32, i32
  }
  func.func @transform_4(%arg0: i32) -> (i32, i32, i32) {
    %c0_i32 = arith.constant 0 : i32
    %c0_i32_0 = arith.constant 0 : i32
    %c0_i32_1 = arith.constant 0 : i32
    return %arg0, %c0_i32, %c0_i32_0 : i32, i32, i32
  }
  func.func @transform_5(%arg0: i32) -> (i32, i32, i32) {
    %c0_i32 = arith.constant 0 : i32
    %c0_i32_0 = arith.constant 0 : i32
    %c0_i32_1 = arith.constant 0 : i32
    return %arg0, %c0_i32, %c0_i32_0 : i32, i32, i32
  }
  func.func @transform_6(%arg0: i32) -> (i32, i32, i32) {
    %c0_i32 = arith.constant 0 : i32
    %c0_i32_0 = arith.constant 0 : i32
    %c0_i32_1 = arith.constant 0 : i32
    return %arg0, %c0_i32, %c0_i32_0 : i32, i32, i32
  }
}

</mosaic_0001>

<bundles_post_ra>
// kernel: double_conv_forward.5
= control target key start
LH: loop header
LB: loop body
LE: loop exit
PB: predicated region body
PF: predicated region fallthrough
CT: control target
= control target key end

     0   :  { %s300_s12 = smov 0   ;;  %s323_s0 = inlined_call_operand.vmem [shape: f32[2,8,256], index: 0, kind: input, shape index: {}]   ;;  %s324_s1 = inlined_call_operand.vmem [shape: f32[8,1], index: 1, kind: input, shape index: {}]   ;;  %s325_s2 = inlined_call_operand.vmem [shape: f32[8,1], index: 2, kind: input, shape index: {}]   ;;  %s326_s3 = inlined_call_operand.vmem [shape: f32[2,8,256], index: 3, kind: output, shape index: {}]  }
   0x1 LB: > { %s248_s13 = sadd.s32 4294967295, %s277_s12   ;;  %p252_p0 = scmp.ge.s32.totalorder %s277_s12, 1  ;;  %s277_s12 = sphi %s300_s12, %s13_s12  }
   0x2   : > { %p137_p1 = scmp.lt.s32.totalorder %s277_s12, 3 }
   0x4   : > { %p138_p2 = pnand %p252_p0, %p137_p1 }
   0x5   : > { %p161_p3 = scmp.lt.s32.totalorder (!%p138_p2), %s248_s13, 1 }
   0x6   : > { %141 = sbr.rel (%p138_p2) target bundleno = 146 (0x92), region = 32 }
   0xb   : > { %v173_v0 = vld [vmem:[%s324_s1] sm:$0xff]  ;;  %v279_v1 = vmov 0   ;;  %s328_s13 = smov (!%p161_p3, %s248_s13), 1 }
   0xc   : > { %270 = vset.pattern.permute.xlu0 %v279_v1  ;;  %v181_v2 = vld [vmem:[%s325_s2] sm:$0xff]  ;;  %s259_s18 = sshll.u32 %s328_s13, 4 }
   0xd   : > { %176 = vperm.xlu0 %270, %v173_v0   ;;  %s165_s21 = scalar_lea.vmem %s323_s0, %s259_s18  ;;  %s170_s24 = scalar_lea.vmem %s326_s3, %s259_s18 }
   0xe   : > { %v171_v4 = vld [vmem:[%s165_s21] sm:$0xff]  ;;  %v172_v5 = vld [vmem:[%s165_s21 + $0x8] sm:$0xff] }
  0x11   : > { %184 = vperm.xlu0 %270, %v181_v2  }
  0x88   : > { %v177_v3 = vpop.permute.xlu0 %176 }
  0x89   : > { %v179_v6 = vmul.f32 %v177_v3, %v171_v4  ;;  %v180_v7 = vmul.f32 %v177_v3, %v172_v5 }
  0x8c   : > { %v185_v8 = vpop.permute.xlu0 %184 }
  0x8d   : > { %v187_v9 = vadd.f32 %v185_v8, %v179_v6  ;;  %v188_v10 = vadd.f32 %v185_v8, %v180_v7 }
  0x8f   : > { %v189_v11 = vmax.f32 %v187_v9, 0.0  ;;  %v190_v12 = vmax.f32 %v188_v10, 0.0 }
  0x91   : > { %191 = vst [vmem:[%s170_s24] sm:$0xff] %v189_v11  ;;  %192 = vst [vmem:[%s170_s24 + $0x8] sm:$0xff] %v190_v12 }
  0x92 PF: > { %s13_s12 = sadd.s32 1, %s277_s12  }
  0x93   : > { %p10_p4 = scmp.ge.s32.totalorder %s13_s12, 4  }
  0x95   :  { %12 = sbr.rel (!%p10_p4) target bundleno = 1 (0x1), region = 62 }

// kernel: double_conv_forward.3
= control target key start
LH: loop header
LB: loop body
LE: loop exit
PB: predicated region body
PF: predicated region fallthrough
CT: control target
= control target key end

     0   :  { %s2164_s15 = smov 0   ;;  %s3937_s0 = inlined_call_operand.vmem [shape: f32[2,4,256], index: 0, kind: input, shape index: {}]   ;;  %s3938_s1 = inlined_call_operand.vmem [shape: f32[8,36], index: 1, kind: input, shape index: {}]   ;;  %s3939_s2 = inlined_call_operand.vmem [shape: f32[2,8,256], index: 2, kind: output, shape index: {0}]   ;;  %s3940_s3 = inlined_call_operand.vmem [shape: f32[2,8,1], index: 3, kind: output, shape index: {1}]   ;;  %s3941_s4 = inlined_call_operand.vmem [shape: f32[2,8,1], index: 4, kind: output, shape index: {2}]  }
   0x1 LB: > { %s1997_s16 = sadd.s32 4294967295, %s2128_s15   ;;  %p2001_p0 = scmp.ge.s32.totalorder %s2128_s15, 1  ;;  %s2128_s15 = sphi %s2164_s15, %s15_s15  }
   0x2   : > { %p167_p1 = scmp.lt.s32.totalorder %s2128_s15, 3 }
   0x4   : > { %p168_p2 = pnand %p2001_p0, %p167_p1 }
   0x6   : > { %171 = sbr.rel (%p168_p2) target bundleno = 1385 (0x569), region = 28 }
   0xb   : > { %p201_p3 = scmp.lt.s32.totalorder %s1997_s16, 1  ;;  %vm321_vm0 = vcmask 1040384   ;;  %v2130_v0 = vmov 0.0   ;;  %vm487_vm1 = vcmask 1046528   ;;  %s2131_s21 = smov 4   ;;  %vm568_vm2 = vcmask 1045504  }
   0xc   : > { %v2174_v1 = vrot.slane %v2130_v0, 7  ;;  %s2132_s22 = smov 12   ;;  %s2133_s23 = smov 28   ;;  %vm1429_vm3 = vcmask 31744   ;;  %vm1462_vm4 = vcmask 64512   ;;  %vm1495_vm5 = vcmask 97280  }
   0xd   : > { %s4253_s16 = smov (!%p201_p3, %s1997_s16), 1  ;;  %s2134_s24 = smov 20   ;;  %vm1528_vm6 = vcmask 130048   ;;  %vm1561_vm7 = vcmask 162816   ;;  %vm1594_vm8 = vcmask 195584   ;;  %vm1627_vm9 = vcmask 228352  }
   0xe   : > { %4030 = vst [vmem:[#allocation2_spill] sm:$0xff] %v2174_v1  ;;  %s2177_s17 = sshll.u32 %s4253_s16, 3  ;;  %v2181_v2 = vsel %vm321_vm0, 0.0, %v2174_v1  ;;  %v2185_v3 = vsel %vm321_vm0, %v2174_v1, 0.0  ;;  %v489_v5 = vrot.slane %v2174_v1, 1  ;;  %s2135_s25 = smov 8  }
   0xf   : > { %4031 = vst [vmem:[#allocation3_spill] sm:$0xff] %v2181_v2  ;;  %s205_s20 = scalar_lea.vmem %s3937_s0, %s2177_s17  ;;  %v488_v4 = vrot.slane %v2181_v2, 1  ;;  %v491_v6 = vrot.slane %v2185_v3, 1  ;;  %s2136_s26 = smov 24   ;;  %vm1693_vm10 = vcmask 293888   ;;  %vm1660_vm11 = vcmask 261120  }
  0x10   : > { %v219_v7 = vld [vmem:[%s205_s20] sm:$0xff]  ;;  %s2137_s27 = smov 16   ;;  %s2138_s28 = smov 32   ;;  %vm1877_vm12 = vcmask 7168  }
  0x11   : > { %224 = vxpose.xlu0.b32.start.end [1/1] (short) %v219_v7, 128  ;;  %v2195_v8 = vsel %vm487_vm1, %v488_v4, %v489_v5  ;;  %v2198_v9 = vsel %vm487_vm1, %v489_v5, %v491_v6  ;;  %v222_v12 = vcombine.high %v219_v7, %v219_v7  ;;  %s2044_s5 = sshll.u32 %s4253_s16, 4  ;;  %s214_s11 = scalar_lea.vmem %s3940_s3, %s2177_s17 }
  0x12   : > { %v2096_v10 = vpack.i.bf16 %v2198_v9, %v2195_v8  ;;  %s210_s8 = scalar_lea.vmem %s3939_s2, %s2044_s5  ;;  %s218_s14 = scalar_lea.vmem %s3941_s4, %s2177_s17 }
  0x14   : > { %2097 = vrot.lane.b32.xlu1 %v2096_v10, %s2131_s21 }
  0x4e   : > { %256 = vxpose.xlu0.b32.start.end [1/1] (short) %v222_v12, 128 }
  0x8d   : > { %v240_v13 = vpop.trf.xlu0 }
  0x8e   : > { %v324_v14 = vrot.slane %v240_v13, 7 }
  0x90   : > { %v2206_v16 = vsel %vm321_vm0, 0.0, %v324_v14 }
  0x91   : > { %v241_v15 = vpop.trf.xlu0  ;;  %4032 = vst [vmem:[#allocation4_spill] sm:$0xff] %v2206_v16  ;;  %v493_v21 = vrot.slane %v2206_v16, 1 }
  0x92   : > { %v325_v17 = vrot.slane %v241_v15, 7 }
  0x94   : > { %v2209_v18 = vsel %vm321_vm0, %v324_v14, %v325_v17  ;;  %v2212_v19 = vsel %vm321_vm0, %v325_v17, 0.0 }
  0x95   : > { %4033 = vst [vmem:[#allocation5_spill] sm:$0xff] %v2209_v18  ;;  %4034 = vst [vmem:[#allocation6_spill] sm:$0xff] %v2212_v19  ;;  %v242_v20 = vpop.trf.xlu0  ;;  %v494_v22 = vrot.slane %v2209_v18, 1  ;;  %v496_v23 = vrot.slane %v2212_v19, 1 }
  0x96   : > { %v327_v43 = vrot.slane %v242_v20, 7 }
  0x97   : > { %v2218_v24 = vsel %vm487_vm1, %v493_v21, %v494_v22  ;;  %v2223_v26 = vsel %vm487_vm1, %v494_v22, %v496_v23 }
  0x98   : > { %4035 = vst [vmem:[#allocation7_spill] sm:$0xff] %v2218_v24  ;;  %665 = vrot.lane.b32.xlu1 %v2218_v24, %s2131_s21  ;;  %4036 = vst [vmem:[#allocation8_spill] sm:$0xff] %v2223_v26  ;;  %v2267_v53 = vsel %vm321_vm0, 0.0, %v327_v43 }
  0x99   : > { %v243_v25 = vpop.trf.xlu0  ;;  %4040 = vst [vmem:[#allocation12_spill] sm:$0xff] %v2267_v53  ;;  %v498_v61 = vrot.slane %v2267_v53, 1 }
  0x9a   : > { %v328_v41 = vrot.slane %v243_v25, 7 }
  0x9c   : > { %667 = vrot.lane.b32.xlu1 %v2223_v26, %s2131_s21  ;;  %v2255_v46 = vsel %vm321_vm0, %v327_v43, %v328_v41  ;;  %v2278_v58 = vsel %vm321_vm0, %v328_v41, 0.0 }
  0x9d   : > { %v2227_v27 = vpop.trf.xlu0  ;;  %4038 = vst [vmem:[#allocation10_spill] sm:$0xff] %v2255_v46  ;;  %v499_v57 = vrot.slane %v2255_v46, 1  ;;  %4043 = vst [vmem:[#allocation15_spill] sm:$0xff] %v2278_v58  ;;  %v501_v63 = vrot.slane %v2278_v58, 1 }
  0x9e   : > { %v330_v20 = vrot.slane %v2227_v27, 7 }
  0x9f   : > { %v2292_v4 = vsel %vm487_vm1, %v498_v61, %v499_v57  ;;  %v2305_v10 = vsel %vm487_vm1, %v499_v57, %v501_v63 }
  0xa0   : > { %4045 = vst [vmem:[#allocation17_spill] sm:$0xff] %v2292_v4  ;;  %4048 = vst [vmem:[#allocation20_spill] sm:$0xff] %v2305_v10 }
  0xa1   : > { %v2229_v28 = vpop.trf.xlu0 }
  0xa2   : > { %v331_v14 = vrot.slane %v2229_v28, 7  ;;  %v2328_v28 = vsel %vm321_vm0, 0.0, %v330_v20 }
  0xa3   : > { %4052 = vst [vmem:[#allocation24_spill] sm:$0xff] %v2328_v28 }
  0xa4   : > { %v2323_v23 = vsel %vm321_vm0, %v330_v20, %v331_v14  ;;  %v569_v20 = vrot.slane %v2181_v2, 2 }
  0xa5   : > { %v2231_v29 = vpop.trf.xlu0  ;;  %4051 = vst [vmem:[#allocation23_spill] sm:$0xff] %v2323_v23  ;;  %v504_v27 = vrot.slane %v2323_v23, 1 }
  0xa9   : > { %v2233_v30 = vpop.trf.xlu0 }
  0xad   : > { %v2235_v31 = vpop.trf.xlu0 }
  0xb1   : > { %v2237_v32 = vpop.trf.xlu0 }
  0xb5   : > { %v2239_v33 = vpop.trf.xlu0 }
  0xb9   : > { %v2241_v34 = vpop.trf.xlu0 }
  0xbd   : > { %v2243_v35 = vpop.trf.xlu0 }
  0xc1   : > { %v2245_v36 = vpop.trf.xlu0 }
  0xc2   : > { %v343_v23 = vrot.slane %v2245_v36, 7 }
  0xc5   : > { %v2247_v37 = vpop.trf.xlu0 }
  0xc6   : > { %v3942_v54 = vrot.slane %v2247_v37, 7 }
  0xc8   : > { %v2289_v0 = vsel %vm321_vm0, 0.0, %v3942_v54 }
  0xc9   : > { %v2249_v38 = vpop.trf.xlu0  ;;  %4044 = vst [vmem:[#allocation16_spill] sm:$0xff] %v2289_v0 }
  0xcd   : > { %v272_v39 = vpop.trf.xlu0 }
  0xce   : > { %v348_v40 = vrot.slane %v272_v39, 7 }
  0xd0   : > { %v2252_v44 = vsel %vm321_vm0, 0.0, %v348_v40 }
  0xd1   : > { %v273_v42 = vpop.trf.xlu0  ;;  %4037 = vst [vmem:[#allocation9_spill] sm:$0xff] %v2252_v44  ;;  %v533_v52 = vrot.slane %v2252_v44, 1 }
  0xd2   : > { %v349_v45 = vrot.slane %v273_v42, 7 }
  0xd4   : > { %v2258_v47 = vsel %vm321_vm0, %v348_v40, %v349_v45  ;;  %v2261_v48 = vsel %vm321_vm0, %v349_v45, 0.0  ;;  %v2335_v40 = vsel %vm321_vm0, %v331_v14, 0.0  ;;  %v503_v45 = vrot.slane %v2328_v28, 1 }
  0xd5   : > { %4039 = vst [vmem:[#allocation11_spill] sm:$0xff] %v2258_v47  ;;  %v536_v49 = vrot.slane %v2261_v48, 1  ;;  %v274_v50 = vpop.trf.xlu0  ;;  %v534_v51 = vrot.slane %v2258_v47, 1  ;;  %4054 = vst [vmem:[#allocation26_spill] sm:$0xff] %v2335_v40 }
  0xd6   : > { %v351_v59 = vrot.slane %v274_v50, 7  ;;  %v2342_v50 = vsel %vm487_vm1, %v503_v45, %v504_v27 }
  0xd7   : > { %v2271_v55 = vsel %vm487_vm1, %v534_v51, %v536_v49  ;;  %v2274_v56 = vsel %vm487_vm1, %v533_v52, %v534_v51  ;;  %v506_v49 = vrot.slane %v2335_v40, 1  ;;  %4055 = vst [vmem:[#allocation27_spill] sm:$0xff] %v2342_v50 }
  0xd8   : > { %4041 = vst [vmem:[#allocation13_spill] sm:$0xff] %v2271_v55  ;;  %4042 = vst [vmem:[#allocation14_spill] sm:$0xff] %v2274_v56  ;;  %699 = vrot.lane.b32.xlu1 %v2271_v55, %s2131_s21  ;;  %697 = vrot.lane.b32.xlu0 %v2274_v56, %s2131_s21  ;;  %v2295_v5 = vsel %vm321_vm0, 0.0, %v351_v59 }
  0xd9   : > { %v275_v60 = vpop.trf.xlu0  ;;  %4046 = vst [vmem:[#allocation18_spill] sm:$0xff] %v2295_v5  ;;  %v538_v12 = vrot.slane %v2295_v5, 1 }
  0xda   : > { %v352_v62 = vrot.slane %v275_v60, 7 }
  0xdc   : > { %v2298_v6 = vsel %vm321_vm0, %v351_v59, %v352_v62  ;;  %669 = vrot.lane.b32.xlu1 %v2292_v4, %s2131_s21  ;;  %881 = vrot.lane.b32.xlu0 %v2289_v0, %s2132_s22  ;;  %v2311_v15 = vsel %vm321_vm0, %v352_v62, 0.0  ;;  %v2355_v59 = vsel %vm487_vm1, %v504_v27, %v506_v49  ;;  %v334_v62 = vrot.slane %v2233_v30, 7 }
  0xdd   : > { %4047 = vst [vmem:[#allocation19_spill] sm:$0xff] %v2298_v6  ;;  %v276_v7 = vpop.trf.xlu0  ;;  %v539_v13 = vrot.slane %v2298_v6, 1  ;;  %4049 = vst [vmem:[#allocation21_spill] sm:$0xff] %v2311_v15  ;;  %v541_v21 = vrot.slane %v2311_v15, 1  ;;  %v570_v30 = vrot.slane %v2174_v1, 2 }
  0xde   : > { %v354_v41 = vrot.slane %v276_v7, 7  ;;  %4056 = vst [vmem:[#allocation28_spill] sm:$0xff] %v2355_v59 }
  0xdf   : > { %v2320_v22 = vsel %vm487_vm1, %v538_v12, %v539_v13  ;;  %v2331_v39 = vsel %vm487_vm1, %v539_v13, %v541_v21  ;;  %v572_v12 = vrot.slane %v2185_v3, 2  ;;  %v333_v13 = vrot.slane %v2231_v29, 7 }
  0xe0   : > { %671 = vrot.lane.b32.xlu1 %v2305_v10, %s2131_s21  ;;  %1267 = vrot.lane.b32.xlu0 %v2271_v55, %s2133_s23  ;;  %4050 = vst [vmem:[#allocation22_spill] sm:$0xff] %v2320_v22  ;;  %4053 = vst [vmem:[#allocation25_spill] sm:$0xff] %v2331_v39  ;;  %v2345_v51 = vsel %vm321_vm0, 0.0, %v354_v41  ;;  %v2386_v29 = vsel %vm321_vm0, %v334_v62, 0.0  ;;  %v571_v45 = vsel %vm568_vm2, %v569_v20, %v570_v30 }
  0xe1   : > { %v277_v17 = vpop.trf.xlu0  ;;  %v543_v60 = vrot.slane %v2345_v51, 1  ;;  %v2376_v21 = vsel %vm321_vm0, %v333_v13, %v334_v62  ;;  %v2383_v3 = vsel %vm321_vm0, 0.0, %v333_v13  ;;  %4060 = vst [vmem:[#allocation32_spill] sm:$0xff] %v2386_v29  ;;  %v573_v49 = vsel %vm568_vm2, %v570_v30, %v572_v12 }
  0xe2   : > { %v355_v42 = vrot.slane %v277_v17, 7  ;;  %4058 = vst [vmem:[#allocation30_spill] sm:$0xff] %v2376_v21  ;;  %4059 = vst [vmem:[#allocation31_spill] sm:$0xff] %v2383_v3  ;;  %v2397_v13 = vpack.i.bf16 %v571_v45, %v573_v49  ;;  %v508_v26 = vrot.slane %v2383_v3, 1 }
  0xe4   : > { %701 = vrot.lane.b32.xlu1 %v2320_v22, %s2131_s21  ;;  %v2348_v52 = vsel %vm321_vm0, %v354_v41, %v355_v42  ;;  %v2361_v63 = vsel %vm321_vm0, %v355_v42, 0.0  ;;  %v509_v42 = vrot.slane %v2376_v21, 1  ;;  %4062 = vst [vmem:[#allocation34_spill] sm:$0xff] %v2397_v13 }
  0xe5   : > { %v278_v25 = vpop.trf.xlu0  ;;  %v544_v61 = vrot.slane %v2348_v52, 1  ;;  %v546_v14 = vrot.slane %v2361_v63, 1 }
  0xe6   : > { %v2402_v4 = vsel %vm487_vm1, %v508_v26, %v509_v42 }
  0xe7   : > { %v2371_v17 = vsel %vm487_vm1, %v543_v60, %v544_v61  ;;  %v2389_v41 = vsel %vm487_vm1, %v544_v61, %v546_v14  ;;  %v357_v60 = vrot.slane %v278_v25, 7  ;;  %v511_v14 = vrot.slane %v2386_v29, 1  ;;  %4063 = vst [vmem:[#allocation35_spill] sm:$0xff] %v2402_v4  ;;  %v2647_v29 = vpop.permute.xlu1 %2097 }
  0xe8   : > { %703 = vrot.lane.b32.xlu1 %v2331_v39, %s2131_s21  ;;  %4057 = vst [vmem:[#allocation29_spill] sm:$0xff] %v2371_v17  ;;  %4061 = vst [vmem:[#allocation33_spill] sm:$0xff] %v2389_v41 }
  0xe9   : > { %v279_v43 = vpop.trf.xlu0  ;;  %v2405_v12 = vsel %vm321_vm0, 0.0, %v357_v60  ;;  %v2422_v49 = vsel %vm487_vm1, %v509_v42, %v511_v14  ;;  %v336_v14 = vrot.slane %v2235_v31, 7  ;;  %4077 = vst [vmem:[#allocation44_spill] sm:$0xff] %v2647_v29 }
  0xea   : > { %v358_v11 = vrot.slane %v279_v43, 7  ;;  %4064 = vst [vmem:[#allocation36_spill] sm:$0xff] %v2405_v12  ;;  %4065 = vst [vmem:[#allocation37_spill] sm:$0xff] %v2422_v49 }
  0xec   : > { %673 = vrot.lane.b32.xlu1 %v2342_v50, %s2131_s21  ;;  %v2408_v25 = vsel %vm321_vm0, %v357_v60, %v358_v11  ;;  %v2433_v18 = vsel %vm321_vm0, %v358_v11, 0.0 }
  0xed   : > { %v2352_v57 = vpop.trf.xlu0 }
  0xf0   : > { %675 = vrot.lane.b32.xlu1 %v2355_v59, %s2131_s21 }
  0xf1   : > { %v2365_v7 = vpop.trf.xlu0 }
  0xf2   : > { %v361_v16 = vrot.slane %v2365_v7, 7  ;;  %v340_v7 = vrot.slane %v2241_v34, 7  ;;  %v339_v34 = vrot.slane %v2239_v33, 7 }
  0xf4   : > { %705 = vrot.lane.b32.xlu1 %v2371_v17, %s2131_s21  ;;  %v444_v28 = vsel %vm321_vm0, %v340_v7, 0.0  ;;  %v445_v17 = vsel %vm321_vm0, %v343_v23, 0.0 }
  0xf5   : > { %v2380_v27 = vpop.trf.xlu0  ;;  %v521_v40 = vrot.slane %v444_v28, 1 }
  0xf6   : > { %v3946_v54 = vrot.slane %v2380_v27, 7 }
  0xf8   : > { %707 = vrot.lane.b32.xlu1 %v2389_v41, %s2131_s21 }
  0xf9   : > { %v283_v62 = vpop.trf.xlu0 }
  0xfa   : > { %v364_v61 = vrot.slane %v283_v62, 7  ;;  %v548_v62 = vrot.slane %v2405_v12, 1 }
  0xfc   : > { %v2413_v43 = vsel %vm321_vm0, %v3946_v54, %v364_v61  ;;  %v452_v20 = vsel %vm321_vm0, %v364_v61, 0.0  ;;  %677 = vrot.lane.b32.xlu1 %v2402_v4, %s2131_s21  ;;  %v549_v61 = vrot.slane %v2408_v25, 1  ;;  %v337_v54 = vrot.slane %v2237_v32, 7 }
  0xfd   : > { %v561_v30 = vrot.slane %v452_v20, 1  ;;  %v2418_v45 = vpop.trf.xlu0  ;;  %v3949_v26 = vrot.slane %v2413_v43, 1  ;;  %v2450_v32 = vsel %vm321_vm0, 0.0, %v336_v14  ;;  %v2507_v4 = vsel %vm321_vm0, %v361_v16, 0.0 }
  0xfe   : > { %v2445_v19 = vsel %vm321_vm0, %v336_v14, %v337_v54  ;;  %v2457_v10 = vsel %vm321_vm0, %v337_v54, 0.0  ;;  %v4070_v33 = vrot.slane %v2413_v43, 2 }
  0xff   : > { %v2427_v60 = vsel %vm487_vm1, %v3949_v26, %v561_v30  ;;  %v551_v30 = vrot.slane %v2433_v18, 1  ;;  %v2442_v26 = vsel %vm487_vm1, %v548_v62, %v549_v61  ;;  %v514_v31 = vrot.slane %v2445_v19, 1 }
 0x100   : > { %679 = vrot.lane.b32.xlu1 %v2422_v49, %s2131_s21  ;;  %719 = vrot.lane.b32.xlu0 %v2427_v60, %s2131_s21  ;;  %4066 = vst [vmem:[#allocation38_spill] sm:$0xff] %v2442_v26  ;;  %v360_v62 = vrot.slane %v2352_v57, 7 }
 0x101   : > { %v285_v42 = vpop.trf.xlu0  ;;  %v2453_v50 = vsel %vm487_vm1, %v549_v61, %v551_v30  ;;  %v513_v61 = vrot.slane %v2450_v32, 1 }
 0x102   : > { %v2477_v59 = vsel %vm321_vm0, 0.0, %v360_v62  ;;  %v2480_v55 = vsel %vm321_vm0, %v360_v62, %v361_v16 }
 0x103   : > { %v2472_v54 = vsel %vm487_vm1, %v513_v61, %v514_v31  ;;  %4068 = vst [vmem:[#allocation40_spill] sm:$0xff] %v2480_v55  ;;  %v642_v61 = vrot.slane %v452_v20, 2  ;;  %v2503_v20 = vsel %vm321_vm0, %v339_v34, %v340_v7  ;;  %v556_v7 = vrot.slane %v2507_v4, 1 }
 0x104   : > { %709 = vrot.lane.b32.xlu1 %v2442_v26, %s2131_s21  ;;  %4067 = vst [vmem:[#allocation39_spill] sm:$0xff] %v2472_v54  ;;  %v3980_v49 = vrot.slane %v2503_v20, 2  ;;  %v519_v39 = vrot.slane %v2503_v20, 1 }
 0x105   : > { %v286_v11 = vpop.trf.xlu0 }
 0x106   : > { %v369_v24 = vrot.slane %v286_v11, 7  ;;  %v516_v11 = vrot.slane %v2457_v10, 1 }
 0x108   : > { %v2462_v53 = vsel %vm321_vm0, 0.0, %v369_v24  ;;  %711 = vrot.lane.b32.xlu1 %v2453_v50, %s2131_s21  ;;  %v2493_v22 = vsel %vm487_vm1, %v514_v31, %v516_v11  ;;  %v2516_v31 = vsel %vm568_vm2, %v4070_v33, %v642_v61  ;;  %v366_v11 = vrot.slane %v2418_v45, 7 }
 0x109   : > { %v2466_v14 = vpop.trf.xlu0  ;;  %v656_v57 = vrot.slane %v2462_v53, 2  ;;  %4069 = vst [vmem:[#allocation41_spill] sm:$0xff] %v2493_v22  ;;  %v2529_v61 = vsel %vm321_vm0, 0.0, %v339_v34 }
 0x10a   : > { %v3970_v30 = vrot.slane %v2466_v14, 7  ;;  %4071 = vst [vmem:[#allocation42_spill] sm:$0xff] %v2529_v61  ;;  %v2627_v21 = vsel %vm321_vm0, 0.0, %v366_v11  ;;  %v2665_v29 = vpop.permute.xlu1 %665 }
 0x10b   : > { %4081 = vst [vmem:[#allocation46_spill] sm:$0xff] %v2665_v29 }
 0x10c   : > { %v2485_v46 = vsel %vm321_vm0, %v369_v24, %v3970_v30  ;;  %681 = vrot.lane.b32.xlu1 %v2472_v54, %s2131_s21  ;;  %v553_v24 = vrot.slane %v2477_v59, 1  ;;  %v554_v30 = vrot.slane %v2480_v55, 1 }
 0x10d   : > { %v3973_v58 = vrot.slane %v2485_v46, 2 }
 0x10e   : > { %v2521_v16 = vsel %vm487_vm1, %v553_v24, %v554_v30  ;;  %v2536_v24 = vsel %vm487_vm1, %v554_v30, %v556_v7  ;;  %v342_v7 = vrot.slane %v2243_v35, 7 }
 0x10f   : > { %v2498_v62 = vsel %vm568_vm2, %v656_v57, %v3973_v58  ;;  %v367_v57 = vrot.slane %v285_v42, 7  ;;  %v602_v58 = vrot.slane %v444_v28, 2 }
 0x110   : > { %683 = vrot.lane.b32.xlu1 %v2493_v22, %s2131_s21  ;;  %1105 = vrot.lane.b32.xlu0 %v2498_v62, %s2134_s24  ;;  %v2561_v54 = vsel %vm321_vm0, %v342_v7, %v343_v23  ;;  %v2572_v28 = vsel %vm321_vm0, 0.0, %v342_v7  ;;  %v4074_v7 = vrot.slane %v2413_v43, 1  ;;  %v607_v22 = vrot.slane %v445_v17, 2 }
 0x111   : > { %v2532_v45 = vsel %vm321_vm0, %v366_v11, %v367_v57  ;;  %v453_v42 = vsel %vm321_vm0, %v367_v57, 0.0  ;;  %v2541_v33 = vsel %vm568_vm2, %v3980_v49, %v602_v58  ;;  %v518_v57 = vrot.slane %v2529_v61, 1 }
 0x112   : > { %v566_v34 = vrot.slane %v453_v42, 1  ;;  %v564_v30 = vrot.slane %v2532_v45, 1  ;;  %v4072_v58 = vrot.slane %v2380_v27, 7  ;;  %v523_v3 = vrot.slane %v2572_v28, 1 }
 0x113   : > { %v2558_v36 = vsel %vm487_vm1, %v518_v57, %v519_v39  ;;  %v2575_v57 = vsel %vm487_vm1, %v519_v39, %v521_v40  ;;  %v645_v39 = vrot.slane %v2532_v45, 2  ;;  %v526_v40 = vrot.slane %v445_v17, 1 }
 0x114   : > { %713 = vrot.lane.b32.xlu1 %v2521_v16, %s2131_s21  ;;  %815 = vrot.lane.b32.xlu0 %v2516_v31, %s2135_s25  ;;  %v2555_v49 = vsel %vm321_vm0, 0.0, %v4072_v58  ;;  %4073 = vst [vmem:[#allocation43_spill] sm:$0xff] %v2558_v36  ;;  %v2568_v35 = vsel %vm487_vm1, %v564_v30, %v566_v34  ;;  %v524_v58 = vrot.slane %v2561_v54, 1  ;;  %v647_v34 = vrot.slane %v453_v42, 2 }
 0x115   : > { %v558_v27 = vrot.slane %v2555_v49, 1  ;;  %v4075_v17 = vrot.slane %v2413_v43, 2 }
 0x116   : > { %v2591_v23 = vsel %vm487_vm1, %v523_v3, %v524_v58  ;;  %v2598_v42 = vsel %vm568_vm2, %v645_v39, %v647_v34  ;;  %v2601_v41 = vsel %vm487_vm1, %v524_v58, %v526_v40  ;;  %v4076_v34 = vrot.slane %v2466_v14, 7 }
 0x117   : > { %v2587_v5 = vsel %vm487_vm1, %v558_v27, %v4074_v7  ;;  %v3996_v27 = vrot.slane %v2561_v54, 2  ;;  %v639_v7 = vrot.slane %v2555_v49, 2 }
 0x118   : > { %715 = vrot.lane.b32.xlu1 %v2536_v24, %s2131_s21  ;;  %783 = vrot.lane.b32.xlu0 %v2541_v33, %s2135_s25  ;;  %v454_v40 = vsel %vm321_vm0, %v4076_v34, 0.0  ;;  %v644_v34 = vrot.slane %v2627_v21, 2 }
 0x119   : > { %v2612_v3 = vsel %vm568_vm2, %v3996_v27, %v607_v22  ;;  %v2617_v58 = vsel %vm568_vm2, %v639_v7, %v4075_v17  ;;  %v654_v22 = vrot.slane %v454_v40, 1  ;;  %v652_v7 = vrot.slane %v2485_v46, 1 }
 0x11a   : > { %v563_v17 = vrot.slane %v2627_v21, 1  ;;  %v659_v27 = vrot.slane %v454_v40, 2  ;;  %v2651_v6 = vsel %vm568_vm2, %v644_v34, %v645_v39  ;;  %v635_v34 = vrot.slane %v2480_v55, 2 }
 0x11b   : > { %v655_v14 = vsel %vm487_vm1, %v652_v7, %v654_v22 }
 0x11c   : > { %685 = vrot.lane.b32.xlu1 %v2558_v36, %s2131_s21  ;;  %1169 = vrot.lane.b32.xlu0 %v2252_v44, %s2136_s26  ;;  %v2641_v11 = vsel %vm487_vm1, %v563_v17, %v564_v30  ;;  %v346_v36 = vrot.slane %v2249_v38, 7  ;;  %v4078_v30 = vrot.slane %v2485_v46, 2  ;;  %v4079_v17 = vrot.slane %v2247_v37, 7 }
 0x11d   : > { %v637_v38 = vrot.slane %v2507_v4, 2  ;;  %v528_v37 = vrot.slane %v2289_v0, 1 }
 0x11e   : > { %v660_v22 = vsel %vm568_vm2, %v4078_v30, %v659_v27  ;;  %v2663_v40 = vsel %vm321_vm0, %v4079_v17, %v346_v36  ;;  %v446_v27 = vsel %vm321_vm0, %v346_v36, 0.0  ;;  %v2679_v30 = vpop.permute.xlu1 %667 }
 0x11f   : > { %4080 = vst [vmem:[#allocation45_spill] sm:$0xff] %v2663_v40  ;;  %v529_v39 = vrot.slane %v2663_v40, 1  ;;  %4082 = vst [vmem:[#allocation47_spill] sm:$0xff] %v2679_v30  ;;  %v531_v17 = vrot.slane %v446_v27, 1  ;;  %v2685_v4 = vsel %vm568_vm2, %v635_v34, %v637_v38  ;;  %v651_v38 = vrot.slane %v2462_v53, 1 }
 0x120   : > { %687 = vrot.lane.b32.xlu1 %v2575_v57, %s2131_s21  ;;  %1007 = vrot.lane.b32.xlu0 %v2568_v35, %s2137_s27 }
 0x121   : > { %v2682_v29 = vsel %vm487_vm1, %v528_v37, %v529_v39  ;;  %v2694_v36 = vsel %vm487_vm1, %v529_v39, %v531_v17  ;;  %v653_v39 = vsel %vm487_vm1, %v651_v38, %v652_v7  ;;  %v2101_v7 = vpack.i.bf16 %v2181_v2, %v2174_v1 }
 0x122   : > { %v4091_v38 = vrot.slane %v2561_v54, 2 }
 0x124   : > { %689 = vrot.lane.b32.xlu1 %v2591_v23, %s2131_s21  ;;  %717 = vrot.lane.b32.xlu0 %v2587_v5, %s2131_s21 }
 0x128   : > { %691 = vrot.lane.b32.xlu1 %v2601_v41, %s2131_s21  ;;  %1103 = vrot.lane.b32.xlu0 %v2598_v42, %s2134_s24 }
 0x12c   : > { %787 = vrot.lane.b32.xlu1 %v2612_v3, %s2135_s25  ;;  %813 = vrot.lane.b32.xlu0 %v2617_v58, %s2135_s25 }
 0x130   : > { %723 = vrot.lane.b32.xlu1 %v2568_v35, %s2131_s21  ;;  %1199 = vrot.lane.b32.xlu0 %v2485_v46, %s2136_s26 }
 0x134   : > { %819 = vrot.lane.b32.xlu1 %v2598_v42, %s2135_s25  ;;  %909 = vrot.lane.b32.xlu0 %v2627_v21, %s2132_s22 }
 0x138   : > { %721 = vrot.lane.b32.xlu1 %v2641_v11, %s2131_s21  ;;  %1295 = vrot.lane.b32.xlu0 %v655_v14, %s2133_s23 }
 0x13c   : > { %817 = vrot.lane.b32.xlu1 %v2651_v6, %s2135_s25  ;;  %1005 = vrot.lane.b32.xlu0 %v2641_v11, %s2137_s27 }
 0x140   : > { %883 = vrot.lane.b32.xlu1 %v2663_v40, %s2132_s22  ;;  %1391 = vrot.lane.b32.xlu0 %v660_v22, %s2138_s28 }
 0x144   : > { %915 = vrot.lane.b32.xlu1 %v2485_v46, %s2132_s22  ;;  %1101 = vrot.lane.b32.xlu0 %v2651_v6, %s2134_s24 }
 0x148   : > { %693 = vrot.lane.b32.xlu1 %v2682_v29, %s2131_s21  ;;  %811 = vrot.lane.b32.xlu0 %v2685_v4, %s2135_s25 }
 0x14a   : > { %v2691_v46 = vpop.permute.xlu1 %699 }
 0x14b   : > { %4083 = vst [vmem:[#allocation48_spill] sm:$0xff] %v2691_v46  ;;  %v612_v46 = vrot.slane %v446_v27, 2  ;;  %v604_v27 = vrot.slane %v2572_v28, 2 }
 0x14c   : > { %695 = vrot.lane.b32.xlu1 %v2694_v36, %s2131_s21  ;;  %1197 = vrot.lane.b32.xlu0 %v2462_v53, %s2136_s26 }
 0x14e   : > { %v2700_v37 = vpop.permute.xlu1 %669 }
 0x14f   : > { %4084 = vst [vmem:[#allocation49_spill] sm:$0xff] %v2700_v37  ;;  %v610_v37 = vrot.slane %v2663_v40, 2 }
 0x150   : > { %979 = vrot.lane.b32.xlu1 %v2694_v36, %s2137_s27  ;;  %907 = vrot.lane.b32.xlu0 %v2413_v43, %s2132_s22 }
 0x152   : > { %v2707_v30 = vpop.permute.xlu1 %671 }
 0x153   : > { %4085 = vst [vmem:[#allocation50_spill] sm:$0xff] %v2707_v30  ;;  %v2721_v30 = vsel %vm568_vm2, %v610_v37, %v612_v46 }
 0x154   : > { %1011 = vrot.lane.b32.xlu1 %v655_v14, %s2137_s27  ;;  %1293 = vrot.lane.b32.xlu0 %v653_v39, %s2133_s23  ;;  %4088 = vst [vmem:[#allocation53_spill] sm:$0xff] %v2721_v30 }
 0x156   : > { %v2712_v17 = vpop.permute.xlu1 %701 }
 0x157   : > { %4086 = vst [vmem:[#allocation51_spill] sm:$0xff] %v2712_v17  ;;  %v630_v17 = vrot.slane %v2408_v25, 2 }
 0x158   : > { %1107 = vrot.lane.b32.xlu1 %v660_v22, %s2134_s24  ;;  %1003 = vrot.lane.b32.xlu0 %v2427_v60, %s2137_s27  ;;  %v634_v22 = vrot.slane %v2477_v59, 2 }
 0x15a   : > { %v2718_v15 = vpop.permute.xlu1 %703  ;;  %v2744_v2 = vsel %vm568_vm2, %v634_v22, %v635_v34  ;;  %v2762_v34 = vpop.permute.xlu0 %697 }
 0x15b   : > { %4087 = vst [vmem:[#allocation52_spill] sm:$0xff] %v2718_v15  ;;  %4094 = vst [vmem:[#allocation58_spill] sm:$0xff] %v2762_v34 }
 0x15c   : > { %1075 = vrot.lane.b32.xlu1 %v2721_v30, %s2134_s24  ;;  %1389 = vrot.lane.b32.xlu0 %v2498_v62, %s2138_s28  ;;  %v2741_v62 = vsel %vm568_vm2, %v604_v27, %v4091_v38  ;;  %v4096_v27 = vpack.i.bf16 %v2195_v8, %v2198_v9 }
 0x15e   : > { %v2729_v14 = vpop.permute.xlu1 %673  ;;  %v2774_v38 = vpop.permute.xlu0 %881 }
 0x15f   : > { %4089 = vst [vmem:[#allocation54_spill] sm:$0xff] %v2729_v14 }
 0x160   : > { %2102 = vrot.lane.b32.xlu1 %v2101_v7, %s2136_s26  ;;  %1099 = vrot.lane.b32.xlu0 %v2516_v31, %s2134_s24 }
 0x162   : > { %v2736_v46 = vpop.permute.xlu1 %675  ;;  %v2785_v8 = vpop.permute.xlu0 %1267 }
 0x163   : > { %4090 = vst [vmem:[#allocation55_spill] sm:$0xff] %v2736_v46 }
 0x164   : > { %785 = vrot.lane.b32.xlu1 %v2741_v62, %s2135_s25  ;;  %809 = vrot.lane.b32.xlu0 %v2744_v2, %s2135_s25 }
 0x166   : > { %v2750_v7 = vpop.permute.xlu1 %705 }
 0x167   : > { %4092 = vst [vmem:[#allocation56_spill] sm:$0xff] %v2750_v7 }
 0x168   : > { %913 = vrot.lane.b32.xlu1 %v2462_v53, %s2132_s22  ;;  %1195 = vrot.lane.b32.xlu0 %v2532_v45, %s2136_s26 }
 0x16a   : > { %v2756_v1 = vpop.permute.xlu1 %707 }
 0x16b   : > { %4093 = vst [vmem:[#allocation57_spill] sm:$0xff] %v2756_v1 }
 0x16c   : > { %1171 = vrot.lane.b32.xlu1 %v2258_v47, %s2136_s26  ;;  %905 = vrot.lane.b32.xlu0 %v2555_v49, %s2132_s22 }
 0x16e   : > { %v2764_v22 = vpop.permute.xlu1 %677 }
 0x16f   : > { %4095 = vst [vmem:[#allocation59_spill] sm:$0xff] %v2764_v22 }
 0x170   : > { %2107 = vrot.lane.b32.xlu1 %v4096_v27, %s2133_s23  ;;  %1291 = vrot.lane.b32.xlu0 %v2568_v35, %s2133_s23  ;;  %v617_v35 = vrot.slane %v2261_v48, 2  ;;  %v632_v27 = vrot.slane %v2433_v18, 2  ;;  %v609_v18 = vrot.slane %v2289_v0, 2 }
 0x172   : > { %v2772_v53 = vpop.permute.xlu1 %679  ;;  %v2802_v14 = vsel %vm568_vm2, %v630_v17, %v632_v27  ;;  %v2817_v46 = vsel %vm568_vm2, %v609_v18, %v610_v37 }
 0x173   : > { %4097 = vst [vmem:[#allocation60_spill] sm:$0xff] %v2772_v53  ;;  %4101 = vst [vmem:[#allocation64_spill] sm:$0xff] %v2802_v14 }
 0x174   : > { %1001 = vrot.lane.b32.xlu0 %v2587_v5, %s2137_s27  ;;  %1009 = vrot.lane.b32.xlu1 %v653_v39, %s2137_s27  ;;  %v615_v39 = vrot.slane %v2258_v47, 2  ;;  %4104 = vst [vmem:[#allocation67_spill] sm:$0xff] %v2817_v46 }
 0x176   : > { %v2779_v34 = vpop.permute.xlu1 %709  ;;  %v2805_v48 = vsel %vm568_vm2, %v615_v39, %v617_v35 }
 0x177   : > { %4098 = vst [vmem:[#allocation61_spill] sm:$0xff] %v2779_v34  ;;  %4102 = vst [vmem:[#allocation65_spill] sm:$0xff] %v2805_v48 }
 0x178   : > { %1387 = vrot.lane.b32.xlu0 %v2598_v42, %s2138_s28  ;;  %2112 = vrot.lane.b32.xlu1 %v2397_v13, %s2138_s28  ;;  %v2797_v42 = vpop.permute.xlu0 %719 }
 0x17a   : > { %v2787_v9 = vpop.permute.xlu1 %711 }
 0x17b   : > { %4099 = vst [vmem:[#allocation62_spill] sm:$0xff] %v2787_v9 }
 0x17c   : > { %1097 = vrot.lane.b32.xlu0 %v2617_v58, %s2134_s24  ;;  %977 = vrot.lane.b32.xlu1 %v2682_v29, %s2137_s27 }
 0x17e   : > { %v2799_v15 = vpop.permute.xlu1 %681 }
 0x17f   : > { %4100 = vst [vmem:[#allocation63_spill] sm:$0xff] %v2799_v15 }
 0x180   : > { %807 = vrot.lane.b32.xlu0 %v2802_v14, %s2135_s25  ;;  %1363 = vrot.lane.b32.xlu1 %v2805_v48, %s2138_s28 }
 0x182   : > { %v2812_v13 = vpop.permute.xlu1 %683  ;;  %v2814_v7 = vpop.permute.xlu0 %1105 }
 0x183   : > { %4103 = vst [vmem:[#allocation66_spill] sm:$0xff] %v2812_v13 }
 0x184   : > { %1193 = vrot.lane.b32.xlu0 %v2627_v21, %s2136_s26  ;;  %1073 = vrot.lane.b32.xlu1 %v2817_v46, %s2134_s24 }
 0x186   : > { %v2823_v35 = vpop.permute.xlu1 %713  ;;  %v2825_v27 = vpop.permute.xlu0 %815 }
 0x187   : > { %4105 = vst [vmem:[#allocation68_spill] sm:$0xff] %v2823_v35 }
 0x188   : > { %903 = vrot.lane.b32.xlu0 %v2480_v55, %s2132_s22  ;;  %911 = vrot.lane.b32.xlu1 %v2532_v45, %s2132_s22 }
 0x18a   : > { %v2831_v1 = vpop.permute.xlu1 %715  ;;  %v2833_v37 = vpop.permute.xlu0 %783 }
 0x18b   : > { %4106 = vst [vmem:[#allocation69_spill] sm:$0xff] %v2831_v1  ;;  %4107 = vst [vmem:[#allocation70_spill] sm:$0xff] %v2833_v37  ;;  %v627_v37 = vrot.slane %v2361_v63, 2 }
 0x18c   : > { %1289 = vrot.lane.b32.xlu0 %v2641_v11, %s2133_s23  ;;  %879 = vrot.lane.b32.xlu1 %v2561_v54, %s2132_s22  ;;  %v614_v11 = vrot.slane %v2252_v44, 2 }
 0x18e   : > { %v2839_v18 = vpop.permute.xlu1 %685  ;;  %v2841_v22 = vpop.permute.xlu0 %1169  ;;  %v2861_v47 = vsel %vm568_vm2, %v614_v11, %v615_v39  ;;  %v599_v39 = vrot.slane %v2529_v61, 2 }
 0x18f   : > { %4108 = vst [vmem:[#allocation71_spill] sm:$0xff] %v2839_v18  ;;  %4111 = vst [vmem:[#allocation74_spill] sm:$0xff] %v2861_v47 }
 0x190   : > { %999 = vrot.lane.b32.xlu0 %v2536_v24, %s2137_s27  ;;  %1265 = vrot.lane.b32.xlu1 %v2274_v56, %s2133_s23  ;;  %v629_v56 = vrot.slane %v2405_v12, 2 }
 0x192   : > { %v2847_v34 = vpop.permute.xlu1 %687  ;;  %v2849_v53 = vpop.permute.xlu0 %1007  ;;  %v2873_v44 = vsel %vm568_vm2, %v629_v56, %v630_v17 }
 0x193   : > { %4109 = vst [vmem:[#allocation72_spill] sm:$0xff] %v2847_v34 }
 0x194   : > { %1385 = vrot.lane.b32.xlu0 %v2651_v6, %s2138_s28  ;;  %975 = vrot.lane.b32.xlu1 %v2601_v41, %s2137_s27 }
 0x196   : > { %v2856_v9 = vpop.permute.xlu1 %689  ;;  %v2858_v15 = vpop.permute.xlu0 %717 }
 0x197   : > { %4110 = vst [vmem:[#allocation73_spill] sm:$0xff] %v2858_v15  ;;  %v625_v15 = vrot.slane %v2348_v52, 2 }
 0x198   : > { %1095 = vrot.lane.b32.xlu0 %v2685_v4, %s2134_s24  ;;  %1361 = vrot.lane.b32.xlu1 %v2861_v47, %s2138_s28  ;;  %v4113_v47 = vrot.slane %v2503_v20, 2 }
 0x199   : > { %v2941_v34 = vsel %vm568_vm2, %v625_v15, %v627_v37 }
 0x19a   : > { %v2868_v6 = vpop.permute.xlu1 %691  ;;  %v2870_v35 = vpop.permute.xlu0 %1103  ;;  %v2887_v1 = vsel %vm568_vm2, %v599_v39, %v4113_v47 }
 0x19c   : > { %805 = vrot.lane.b32.xlu0 %v2873_v44, %s2135_s25  ;;  %1071 = vrot.lane.b32.xlu1 %v2612_v3, %s2134_s24 }
 0x19e   : > { %v2880_v11 = vpop.permute.xlu1 %787  ;;  %v2882_v13 = vpop.permute.xlu0 %813 }
 0x19f   : > { %4112 = vst [vmem:[#allocation75_spill] sm:$0xff] %v2882_v13 }
 0x1a0   : > { %1191 = vrot.lane.b32.xlu0 %v2413_v43, %s2136_s26  ;;  %781 = vrot.lane.b32.xlu1 %v2887_v1, %s2135_s25 }
 0x1a2   : > { %v2893_v56 = vpop.permute.xlu1 %723  ;;  %v2895_v17 = vpop.permute.xlu0 %1199 }
 0x1a4   : > { %901 = vrot.lane.b32.xlu0 %v2477_v59, %s2132_s22  ;;  %1167 = vrot.lane.b32.xlu1 %v2663_v40, %s2136_s26 }
 0x1a6   : > { %v2901_v18 = vpop.permute.xlu1 %819  ;;  %v2903_v47 = vpop.permute.xlu0 %909 }
 0x1a7   : > { %4114 = vst [vmem:[#allocation76_spill] sm:$0xff] %v2903_v47 }
 0x1a8   : > { %1287 = vrot.lane.b32.xlu0 %v2427_v60, %s2133_s23  ;;  %877 = vrot.lane.b32.xlu1 %v2572_v28, %s2132_s22 }
 0x1aa   : > { %v2909_v39 = vpop.permute.xlu1 %721  ;;  %v2911_v48 = vpop.permute.xlu0 %1295 }
 0x1ab   : > { %4115 = vst [vmem:[#allocation77_spill] sm:$0xff] %v2911_v48 }
 0x1ac   : > { %997 = vrot.lane.b32.xlu0 %v2521_v16, %s2137_s27  ;;  %1263 = vrot.lane.b32.xlu1 %v2694_v36, %s2133_s23 }
 0x1ae   : > { %v2917_v40 = vpop.permute.xlu1 %817  ;;  %v2919_v13 = vpop.permute.xlu0 %1005 }
 0x1af   : > { %4116 = vst [vmem:[#allocation78_spill] sm:$0xff] %v2919_v13  ;;  %v597_v13 = vrot.slane %v2457_v10, 2 }
 0x1b0   : > { %1383 = vrot.lane.b32.xlu0 %v2516_v31, %s2138_s28  ;;  %973 = vrot.lane.b32.xlu1 %v2591_v23, %s2137_s27 }
 0x1b2   : > { %v2925_v60 = vpop.permute.xlu1 %883  ;;  %v2927_v47 = vpop.permute.xlu0 %1391 }
 0x1b3   : > { %4117 = vst [vmem:[#allocation79_spill] sm:$0xff] %v2927_v47  ;;  %v595_v47 = vrot.slane %v2445_v19, 2 }
 0x1b4   : > { %1093 = vrot.lane.b32.xlu0 %v2744_v2, %s2134_s24  ;;  %1359 = vrot.lane.b32.xlu1 %v2721_v30, %s2138_s28 }
 0x1b5   : > { %v2953_v48 = vsel %vm568_vm2, %v595_v47, %v597_v13 }
 0x1b6   : > { %v2935_v36 = vpop.permute.xlu1 %915  ;;  %v2937_v31 = vpop.permute.xlu0 %1101 }
 0x1b7   : > { %4118 = vst [vmem:[#allocation80_spill] sm:$0xff] %v2937_v31 }
 0x1b8   : > { %803 = vrot.lane.b32.xlu0 %v2941_v34, %s2135_s25  ;;  %1069 = vrot.lane.b32.xlu1 %v2741_v62, %s2134_s24 }
 0x1ba   : > { %v2948_v63 = vpop.permute.xlu1 %693  ;;  %v2950_v30 = vpop.permute.xlu0 %811 }
 0x1bb   : > { %4119 = vst [vmem:[#allocation81_spill] sm:$0xff] %v2948_v63  ;;  %4120 = vst [vmem:[#allocation82_spill] sm:$0xff] %v2950_v30 }
 0x1bc   : > { %1189 = vrot.lane.b32.xlu0 %v2555_v49, %s2136_s26  ;;  %779 = vrot.lane.b32.xlu1 %v2953_v48, %s2135_s25 }
 0x1be   : > { %v2959_v10 = vpop.permute.xlu1 %695  ;;  %v2961_v37 = vpop.permute.xlu0 %1197 }
 0x1bf   : > { %4121 = vst [vmem:[#allocation83_spill] sm:$0xff] %v2959_v10  ;;  %4122 = vst [vmem:[#allocation84_spill] sm:$0xff] %v2961_v37 }
 0x1c0   : > { %899 = vrot.lane.b32.xlu0 %v2408_v25, %s2132_s22  ;;  %1165 = vrot.lane.b32.xlu1 %v2289_v0, %s2136_s26 }
 0x1c2   : > { %v2967_v63 = vpop.permute.xlu1 %979  ;;  %v2969_v13 = vpop.permute.xlu0 %907 }
 0x1c3   : > { %4123 = vst [vmem:[#allocation85_spill] sm:$0xff] %v2969_v13 }
 0x1c4   : > { %875 = vrot.lane.b32.xlu1 %v2503_v20, %s2132_s22  ;;  %1285 = vrot.lane.b32.xlu0 %v2587_v5, %s2133_s23 }
 0x1c6   : > { %v1012_v30 = vpop.permute.xlu1 %1011  ;;  %v2975_v10 = vpop.permute.xlu0 %1293 }
 0x1c7   : > { %4124 = vst [vmem:[#allocation86_spill] sm:$0xff] %v2975_v10  ;;  %v624_v10 = vrot.slane %v2345_v51, 2 }
 0x1c8   : > { %1261 = vrot.lane.b32.xlu1 %v2682_v29, %s2133_s23  ;;  %995 = vrot.lane.b32.xlu0 %v2453_v50, %s2137_s27 }
 0x1c9   : > { %v3001_v31 = vsel %vm568_vm2, %v624_v10, %v625_v15 }
 0x1ca   : > { %v1108_v0 = vpop.permute.xlu1 %1107  ;;  %v2981_v37 = vpop.permute.xlu0 %1003 }
 0x1cb   : > { %4125 = vst [vmem:[#allocation87_spill] sm:$0xff] %v2981_v37 }
 0x1cc   : > { %971 = vrot.lane.b32.xlu1 %v2575_v57, %s2137_s27  ;;  %1381 = vrot.lane.b32.xlu0 %v2617_v58, %s2138_s28  ;;  %v594_v58 = vrot.slane %v2450_v32, 2 }
 0x1ce   : > { %v2987_v13 = vpop.permute.xlu1 %1075  ;;  %v2989_v5 = vpop.permute.xlu0 %1389 }
 0x1cf   : > { %4126 = vst [vmem:[#allocation88_spill] sm:$0xff] %v2989_v5 }
 0x1d0   : > { %1357 = vrot.lane.b32.xlu1 %v2817_v46, %s2138_s28  ;;  %1091 = vrot.lane.b32.xlu0 %v2802_v14, %s2134_s24  ;;  %v3013_v14 = vsel %vm568_vm2, %v594_v58, %v595_v47 }
 0x1d1   : > { %4129 = vst [vmem:[#allocation91_spill] sm:$0xff] %v3013_v14 }
 0x1d2   : > { %v2996_v29 = vpop.permute.xlu1 %2102  ;;  %v2998_v37 = vpop.permute.xlu0 %1099 }
 0x1d3   : > { %4127 = vst [vmem:[#allocation89_spill] sm:$0xff] %v2998_v37 }
 0x1d4   : > { %1067 = vrot.lane.b32.xlu1 %v2541_v33, %s2134_s24  ;;  %801 = vrot.lane.b32.xlu0 %v3001_v31, %s2135_s25 }
 0x1d6   : > { %v3008_v5 = vpop.permute.xlu1 %785  ;;  %v3010_v46 = vpop.permute.xlu0 %809 }
 0x1d7   : > { %4128 = vst [vmem:[#allocation90_spill] sm:$0xff] %v3010_v46 }
 0x1d8   : > { %777 = vrot.lane.b32.xlu1 %v3013_v14, %s2135_s25  ;;  %1187 = vrot.lane.b32.xlu0 %v2480_v55, %s2136_s26  ;;  %v4135_v14 = vld [vmem:[#allocation43_spill] sm:$0xff] }
 0x1da   : > { %v914_v15 = vpop.permute.xlu1 %913  ;;  %v3019_v10 = vpop.permute.xlu0 %1195 }
 0x1db   : > { %4130 = vst [vmem:[#allocation92_spill] sm:$0xff] %v3019_v10  ;;  %v4133_v10 = vld [vmem:[#allocation21_spill] sm:$0xff] }
 0x1dc   : > { %1163 = vrot.lane.b32.xlu1 %v2561_v54, %s2136_s26  ;;  %897 = vrot.lane.b32.xlu0 %v2405_v12, %s2132_s22  ;;  %v622_v55 = vrot.slane %v4133_v10, 2  ;;  %v4134_v12 = vld [vmem:[#allocation19_spill] sm:$0xff]  ;;  %v2104_v10 = vunpack.i.l.bf16 %v2996_v29 }
 0x1de   : > { %v1172_v37 = vpop.permute.xlu1 %1171  ;;  %v3025_v46 = vpop.permute.xlu0 %905 }
 0x1df   : > { %4131 = vst [vmem:[#allocation93_spill] sm:$0xff] %v3025_v46  ;;  %v1461_v46 = vsel %vm1429_vm3, %v2532_v45, %v2893_v56 }
 0x1e0   : > { %873 = vrot.lane.b32.xlu1 %v2529_v61, %s2132_s22  ;;  %1283 = vrot.lane.b32.xlu0 %v2536_v24, %s2133_s23 }
 0x1e2   : > { %v3031_v47 = vpop.permute.xlu1 %2107  ;;  %v3033_v58 = vpop.permute.xlu0 %1291 }
 0x1e3   : > { %4132 = vst [vmem:[#allocation94_spill] sm:$0xff] %v3033_v58  ;;  %v1494_v58 = vsel %vm1462_vm4, %v1461_v46, %v2901_v18  ;;  %v2109_v56 = vunpack.i.l.bf16 %v3031_v47 }
 0x1e4   : > { %1259 = vrot.lane.b32.xlu1 %v2601_v41, %s2133_s23  ;;  %993 = vrot.lane.b32.xlu0 %v2442_v26, %s2137_s27  ;;  %v1460_v41 = vsel %vm1429_vm3, %v2627_v21, %v2909_v39  ;;  %v1527_v45 = vsel %vm1495_vm5, %v1494_v58, %v2935_v36 }
 0x1e5   : > { %v1493_v26 = vsel %vm1462_vm4, %v1460_v41, %v2917_v40  ;;  %v1560_v21 = vsel %vm1528_vm6, %v1527_v45, %v1012_v30  ;;  %v1445_v40 = vsel %vm1429_vm3, %v2561_v54, %v2868_v6 }
 0x1e6   : > { %v1010_v61 = vpop.permute.xlu1 %1009  ;;  %v3043_v24 = vpop.permute.xlu0 %1001  ;;  %v1526_v46 = vsel %vm1495_vm5, %v1493_v26, %v914_v15  ;;  %v1593_v18 = vsel %vm1561_vm7, %v1560_v21, %v1108_v0  ;;  %v4139_v21 = vld [vmem:[#allocation30_spill] sm:$0xff] }
 0x1e7   : > { %v1559_v39 = vsel %vm1528_vm6, %v1526_v46, %v1010_v61  ;;  %v1626_v30 = vsel %vm1594_vm8, %v1593_v18, %v2104_v10  ;;  %v4136_v10 = vld [vmem:[#allocation32_spill] sm:$0xff]  ;;  %v590_v46 = vrot.slane %v4139_v21, 2 }
 0x1e8   : > { %969 = vrot.lane.b32.xlu1 %v4135_v14, %s2137_s27  ;;  %1379 = vrot.lane.b32.xlu0 %v2685_v4, %s2138_s28  ;;  %v1478_v4 = vsel %vm1462_vm4, %v1445_v40, %v2880_v11  ;;  %v1659_v0 = vsel %vm1627_vm9, %v1626_v30, %v2109_v56  ;;  %v1592_v61 = vsel %vm1561_vm7, %v1559_v39, %v2814_v7  ;;  %v592_v45 = vrot.slane %v4136_v10, 2 }
 0x1e9   : > { %v1511_v26 = vsel %vm1495_vm5, %v1478_v4, %v2925_v60  ;;  %v2105_v60 = vunpack.i.h.bf16 %v2996_v29  ;;  %v2110_v29 = vunpack.i.h.bf16 %v3031_v47 }
 0x1ea   : > { %v2113_v36 = vpop.permute.xlu1 %2112  ;;  %v3068_v58 = vpop.permute.xlu0 %1387  ;;  %v1544_v54 = vsel %vm1528_vm6, %v1511_v26, %v2967_v63  ;;  %v4137_v63 = vrot.slane %v4134_v12, 2  ;;  %v3112_v39 = vsel %vm568_vm2, %v590_v46, %v592_v45 }
 0x1eb   : > { %v2114_v41 = vunpack.i.l.bf16 %v2113_v36  ;;  %v1577_v11 = vsel %vm1561_vm7, %v1544_v54, %v2987_v13  ;;  %v1625_v13 = vsel %vm1594_vm8, %v1592_v61, %v2105_v60  ;;  %v2115_v40 = vunpack.i.h.bf16 %v2113_v36 }
 0x1ec   : > { %1355 = vrot.lane.b32.xlu1 %v2612_v3, %s2138_s28  ;;  %1089 = vrot.lane.b32.xlu0 %v2873_v44, %s2134_s24  ;;  %v1610_v56 = vsel %vm1594_vm8, %v1577_v11, %v1172_v37  ;;  %v3096_v7 = vsel %vm568_vm2, %v4137_v63, %v622_v55  ;;  %v1658_v4 = vsel %vm1627_vm9, %v1625_v13, %v2110_v29 }
 0x1ed   : > { %v1692_v6 = vsel %vm1660_vm11, %v1659_v0, %v2114_v41  ;;  %4138 = vst [vmem:[#allocation21_spill] sm:$0xff] %v3096_v7  ;;  %v1643_v55 = vsel %vm1627_vm9, %v1610_v56, %v2785_v8  ;;  %v1691_v47 = vsel %vm1660_vm11, %v1658_v4, %v2115_v40  ;;  %v1459_v0 = vsel %vm1429_vm3, %v2413_v43, %v2797_v42  ;;  %v4146_v4 = vld [vmem:[#allocation31_spill] sm:$0xff] }
 0x1ee   : > { %v978_v15 = vpop.permute.xlu1 %977  ;;  %2045 = vmatprep.subr.msk.mxu0 %vm1693_vm10, %v1692_v6  ;;  %v3089_v3 = vpop.permute.xlu0 %1097  ;;  %v1492_v54 = vsel %vm1462_vm4, %v1459_v0, %v2825_v27  ;;  %v1444_v60 = vsel %vm1429_vm3, %v2572_v28, %v2856_v9  ;;  %v4140_v27 = vld [vmem:[#allocation33_spill] sm:$0xff] }
 0x1ef   : > { %v1477_v42 = vsel %vm1462_vm4, %v1444_v60, %v3008_v5 }
 0x1f0   : > { %1065 = vrot.lane.b32.xlu1 %v2887_v1, %s2134_s24  ;;  %799 = vrot.lane.b32.xlu0 %v3096_v7, %s2135_s25 }
 0x1f2   : > { %v1364_v18 = vpop.permute.xlu1 %1363  ;;  %v3105_v37 = vpop.permute.xlu0 %807 }
 0x1f3   : > { %v1676_v36 = vsel %vm1660_vm11, %v1643_v55, %v1364_v18  ;;  %v4145_v55 = vld [vmem:[#allocation79_spill] sm:$0xff] }
 0x1f4   : > { %775 = vrot.lane.b32.xlu1 %v3112_v39, %s2135_s25  ;;  %2046 = vmatpush3.xpose.msk.msra.mxu0 %vm1693_vm10, %v1676_v36 }
 0x1f5   : > { %1185 = vrot.lane.b32.xlu0 %v2477_v59, %s2136_s26  ;;  %2047 = vmatprep.subr.msk.mxu0 %vm1693_vm10, %v1691_v47  ;;  %v589_v47 = vrot.slane %v4146_v4, 2 }
 0x1f6   : > { %v1074_v8 = vpop.permute.xlu1 %1073  ;;  %v3123_v41 = vpop.permute.xlu0 %1193 }
 0x1f7   : > { %v3202_v0 = vsel %vm568_vm2, %v589_v47, %v590_v46 }
 0x1f8   : > { %1161 = vrot.lane.b32.xlu1 %v2572_v28, %s2136_s26  ;;  %v1510_v28 = vsel %vm1495_vm5, %v1477_v42, %v2774_v38  ;;  %v4142_v38 = vld [vmem:[#allocation18_spill] sm:$0xff] }
 0x1f9   : > { %895 = vrot.lane.b32.xlu0 %v2348_v52, %s2132_s22 }
 0x1fa   : > { %v912_v30 = vpop.permute.xlu1 %911  ;;  %v3129_v26 = vpop.permute.xlu0 %903 }
 0x1fb   : > { %v1525_v61 = vsel %vm1495_vm5, %v1492_v54, %v912_v30 }
 0x1fc   : > { %871 = vrot.lane.b32.xlu1 %v2445_v19, %s2132_s22  ;;  %v1558_v43 = vsel %vm1528_vm6, %v1525_v61, %v2849_v53  ;;  %v4141_v53 = vld [vmem:[#allocation41_spill] sm:$0xff] }
 0x1fd   : > { %1281 = vrot.lane.b32.xlu0 %v2521_v16, %s2133_s23  ;;  %v1591_v45 = vsel %vm1561_vm7, %v1558_v43, %v2870_v35  ;;  %v619_v35 = vrot.slane %v4142_v38, 2 }
 0x1fe   : > { %v880_v6 = vpop.permute.xlu1 %879  ;;  %v3141_v11 = vpop.permute.xlu0 %1289  ;;  %v1624_v63 = vsel %vm1594_vm8, %v1591_v45, %v2895_v17  ;;  %v4150_v45 = vld [vmem:[#allocation72_spill] sm:$0xff] }
 0x200   : > { %1257 = vrot.lane.b32.xlu1 %v2591_v23, %s2133_s23  ;;  %v1543_v23 = vsel %vm1528_vm6, %v1510_v28, %v978_v15  ;;  %v1443_v28 = vsel %vm1429_vm3, %v2503_v20, %v4150_v45 }
 0x201   : > { %991 = vrot.lane.b32.xlu0 %v4140_v27, %s2137_s27  ;;  %v1576_v9 = vsel %vm1561_vm7, %v1543_v23, %v1074_v8 }
 0x202   : > { %v1266_v16 = vpop.permute.xlu1 %1265  ;;  %v3154_v10 = vpop.permute.xlu0 %999  ;;  %v1609_v13 = vsel %vm1594_vm8, %v1576_v9, %v2841_v22 }
 0x203   : > { %v1642_v40 = vsel %vm1627_vm9, %v1609_v13, %v1266_v16  ;;  %v4149_v16 = vld [vmem:[#allocation29_spill] sm:$0xff]  ;;  %v4154_v13 = vld [vmem:[#allocation70_spill] sm:$0xff] }
 0x204   : > { %967 = vrot.lane.b32.xlu1 %v4141_v53, %s2137_s27 }
 0x205   : > { %1377 = vrot.lane.b32.xlu0 %v2744_v2, %s2138_s28  ;;  %v4143_v2 = vld [vmem:[#allocation77_spill] sm:$0xff] }
 0x206   : > { %v976_v5 = vpop.permute.xlu1 %975  ;;  %v3166_v56 = vpop.permute.xlu0 %1385  ;;  %v1657_v15 = vsel %vm1627_vm9, %v1624_v63, %v4143_v2  ;;  %v4152_v63 = vld [vmem:[#allocation39_spill] sm:$0xff]  ;;  %v4155_v2 = vld [vmem:[#allocation64_spill] sm:$0xff] }
 0x207   : > { %v1690_v36 = vsel %vm1660_vm11, %v1657_v15, %v4145_v55  ;;  %v4156_v15 = vld [vmem:[#allocation75_spill] sm:$0xff] }
 0x208   : > { %1353 = vrot.lane.b32.xlu1 %v2741_v62, %s2138_s28  ;;  %v4144_v62 = vrot.slane %v4134_v12, 2 }
 0x209   : > { %1087 = vrot.lane.b32.xlu0 %v2941_v34, %s2134_s24 }
 0x20a   : > { %v1362_v29 = vpop.permute.xlu1 %1361  ;;  %v3180_v18 = vpop.permute.xlu0 %1095  ;;  %v3189_v22 = vsel %vm568_vm2, %v619_v35, %v4144_v62  ;;  %v4157_v62 = vld [vmem:[#allocation76_spill] sm:$0xff] }
 0x20b   : > { %v1675_v17 = vsel %vm1660_vm11, %v1642_v40, %v1362_v29 }
 0x20c   : > { %1063 = vrot.lane.b32.xlu1 %v2953_v48, %s2134_s24  ;;  %2048 = vmatpush3.xpose.msk.msra.mxu0 %vm1693_vm10, %v1675_v17 }
 0x20d   : > { %797 = vrot.lane.b32.xlu0 %v3189_v22, %s2135_s25  ;;  %2049 = vmatprep.subr.msk.mxu0 %vm1693_vm10, %v1690_v36 }
 0x20e   : > { %v1072_v8 = vpop.permute.xlu1 %1071  ;;  %v3197_v30 = vpop.permute.xlu0 %805 }
 0x20f   : > { %4147 = vst [vmem:[#allocation19_spill] sm:$0xff] %v3197_v30 }
 0x210   : > { %773 = vrot.lane.b32.xlu1 %v3202_v0, %s2135_s25 }
 0x211   : > { %1183 = vrot.lane.b32.xlu0 %v2408_v25, %s2136_s26 }
 0x212   : > { %v3208_v54 = vpop.permute.xlu1 %781  ;;  %v3210_v61 = vpop.permute.xlu0 %1191 }
 0x214   : > { %1159 = vrot.lane.b32.xlu1 %v2503_v20, %s2136_s26 }
 0x215   : > { %893 = vrot.lane.b32.xlu0 %v2345_v51, %s2132_s22 }
 0x216   : > { %v1168_v60 = vpop.permute.xlu1 %1167  ;;  %v3216_v43 = vpop.permute.xlu0 %901 }
 0x217   : > { %4148 = vst [vmem:[#allocation43_spill] sm:$0xff] %v3216_v43 }
 0x218   : > { %869 = vrot.lane.b32.xlu1 %v2450_v32, %s2132_s22 }
 0x219   : > { %1279 = vrot.lane.b32.xlu0 %v2453_v50, %s2133_s23  ;;  %v4153_v50 = vld [vmem:[#allocation73_spill] sm:$0xff] }
 0x21a   : > { %v878_v46 = vpop.permute.xlu1 %877  ;;  %v3222_v42 = vpop.permute.xlu0 %1287  ;;  %v1458_v35 = vsel %vm1429_vm3, %v2555_v49, %v4153_v50  ;;  %v4158_v49 = vld [vmem:[#allocation78_spill] sm:$0xff] }
 0x21b   : > { %v1491_v40 = vsel %vm1462_vm4, %v1458_v35, %v4156_v15  ;;  %v4160_v35 = vld [vmem:[#allocation84_spill] sm:$0xff] }
 0x21c   : > { %1255 = vrot.lane.b32.xlu1 %v2575_v57, %s2133_s23  ;;  %v1476_v57 = vsel %vm1462_vm4, %v1443_v28, %v4154_v13  ;;  %v1524_v55 = vsel %vm1495_vm5, %v1491_v40, %v4157_v62  ;;  %v4159_v28 = vld [vmem:[#allocation80_spill] sm:$0xff]  ;;  %v4163_v40 = vld [vmem:[#allocation86_spill] sm:$0xff]  ;;  %v4164_v62 = vld [vmem:[#allocation23_spill] sm:$0xff] }
 0x21d   : > { %989 = vrot.lane.b32.xlu0 %v4149_v16, %s2137_s27  ;;  %v1509_v20 = vsel %vm1495_vm5, %v1476_v57, %v880_v6  ;;  %v1557_v47 = vsel %vm1528_vm6, %v1524_v55, %v4158_v49  ;;  %v4165_v55 = vld [vmem:[#allocation88_spill] sm:$0xff]  ;;  %v4166_v49 = vld [vmem:[#allocation91_spill] sm:$0xff] }
 0x21e   : > { %v1264_v23 = vpop.permute.xlu1 %1263  ;;  %v3231_v9 = vpop.permute.xlu0 %997  ;;  %v1542_v36 = vsel %vm1528_vm6, %v1509_v20, %v976_v5  ;;  %v1590_v50 = vsel %vm1561_vm7, %v1557_v47, %v4159_v28 }
 0x21f   : > { %4151 = vst [vmem:[#allocation32_spill] sm:$0xff] %v3231_v9  ;;  %v1575_v45 = vsel %vm1561_vm7, %v1542_v36, %v1072_v8  ;;  %v1623_v13 = vsel %vm1594_vm8, %v1590_v50, %v4160_v35  ;;  %v4162_v8 = vld [vmem:[#allocation26_spill] sm:$0xff]  ;;  %v4169_v50 = vld [vmem:[#allocation36_spill] sm:$0xff] }
 0x220   : > { %965 = vrot.lane.b32.xlu1 %v4152_v63, %s2137_s27  ;;  %v1608_v6 = vsel %vm1594_vm8, %v1575_v45, %v1168_v60  ;;  %v587_v15 = vrot.slane %v4162_v8, 2  ;;  %v585_v60 = vrot.slane %v4164_v62, 2  ;;  %v4173_v8 = vld [vmem:[#allocation38_spill] sm:$0xff] }
 0x221   : > { %1375 = vrot.lane.b32.xlu0 %v4155_v2, %s2138_s28  ;;  %v1641_v5 = vsel %vm1627_vm9, %v1608_v6, %v1264_v23  ;;  %v4167_v23 = vld [vmem:[#allocation65_spill] sm:$0xff] }
 0x222   : > { %v974_v29 = vpop.permute.xlu1 %973  ;;  %v3245_v17 = vpop.permute.xlu0 %1383  ;;  %v3281_v28 = vsel %vm568_vm2, %v585_v60, %v587_v15 }
 0x224   : > { %1351 = vrot.lane.b32.xlu1 %v2541_v33, %s2138_s28  ;;  %v1656_v33 = vsel %vm1627_vm9, %v1623_v13, %v4163_v40  ;;  %v4171_v13 = vld [vmem:[#allocation42_spill] sm:$0xff] }
 0x225   : > { %1085 = vrot.lane.b32.xlu0 %v3001_v31, %s2134_s24  ;;  %v1689_v36 = vsel %vm1660_vm11, %v1656_v33, %v4165_v55  ;;  %v4175_v33 = vld [vmem:[#allocation25_spill] sm:$0xff] }
 0x226   : > { %v1360_v57 = vpop.permute.xlu1 %1359  ;;  %v3263_v2 = vpop.permute.xlu0 %1093 }
 0x227   : > { %4161 = vst [vmem:[#allocation30_spill] sm:$0xff] %v3263_v2  ;;  %v1674_v20 = vsel %vm1660_vm11, %v1641_v5, %v1360_v57 }
 0x228   : > { %1061 = vrot.lane.b32.xlu1 %v4166_v49, %s2134_s24  ;;  %2050 = vmatpush3.xpose.msk.msra.mxu0 %vm1693_vm10, %v1674_v20 }
 0x229   : > { %795 = vrot.lane.b32.xlu0 %v4167_v23, %s2135_s25  ;;  %2051 = vmatprep.subr.msk.mxu0 %vm1693_vm10, %v1689_v36  ;;  %v4177_v36 = vld [vmem:[#allocation71_spill] sm:$0xff] }
 0x22a   : > { %v1070_v47 = vpop.permute.xlu1 %1069  ;;  %v3278_v45 = vpop.permute.xlu0 %803 }
 0x22b   : > { %4168 = vst [vmem:[#allocation33_spill] sm:$0xff] %v3278_v45  ;;  %v4178_v45 = vld [vmem:[#allocation37_spill] sm:$0xff] }
 0x22c   : > { %771 = vrot.lane.b32.xlu1 %v3281_v28, %s2135_s25 }
 0x22d   : > { %1181 = vrot.lane.b32.xlu0 %v4169_v50, %s2136_s26 }
 0x22e   : > { %v3287_v6 = vpop.permute.xlu1 %779  ;;  %v3289_v35 = vpop.permute.xlu0 %1189 }
 0x22f   : > { %4170 = vst [vmem:[#allocation41_spill] sm:$0xff] %v3289_v35  ;;  %v4180_v35 = vld [vmem:[#allocation40_spill] sm:$0xff] }
 0x230   : > { %1157 = vrot.lane.b32.xlu1 %v4171_v13, %s2136_s26 }
 0x231   : > { %891 = vrot.lane.b32.xlu0 %v4134_v12, %s2132_s22 }
 0x232   : > { %v1166_v5 = vpop.permute.xlu1 %1165  ;;  %v3295_v57 = vpop.permute.xlu0 %899 }
 0x233   : > { %4172 = vst [vmem:[#allocation18_spill] sm:$0xff] %v3295_v57  ;;  %v1442_v57 = vsel %vm1429_vm3, %v4171_v13, %v4177_v36  ;;  %v4182_v36 = vld [vmem:[#allocation85_spill] sm:$0xff] }
 0x234   : > { %867 = vrot.lane.b32.xlu1 %v4139_v21, %s2132_s22 }
 0x235   : > { %1277 = vrot.lane.b32.xlu0 %v4173_v8, %s2133_s23  ;;  %v4179_v8 = vld [vmem:[#allocation69_spill] sm:$0xff] }
 0x236   : > { %v876_v15 = vpop.permute.xlu1 %875  ;;  %v3301_v40 = vpop.permute.xlu0 %1285 }
 0x237   : > { %4174 = vst [vmem:[#allocation77_spill] sm:$0xff] %v3301_v40  ;;  %v1457_v40 = vsel %vm1429_vm3, %v4180_v35, %v4179_v8  ;;  %v4183_v35 = vld [vmem:[#allocation87_spill] sm:$0xff] }
 0x238   : > { %1253 = vrot.lane.b32.xlu1 %v4135_v14, %s2133_s23  ;;  %v1475_v14 = vsel %vm1462_vm4, %v1442_v57, %v3208_v54 }
 0x239   : > { %987 = vrot.lane.b32.xlu0 %v4175_v33, %s2137_s27  ;;  %v4181_v33 = vld [vmem:[#allocation82_spill] sm:$0xff]  ;;  %v1508_v2 = vsel %vm1495_vm5, %v1475_v14, %v878_v46 }
 0x23a   : > { %v1262_v20 = vpop.permute.xlu1 %1261  ;;  %v3307_v55 = vpop.permute.xlu0 %995  ;;  %v1541_v30 = vsel %vm1528_vm6, %v1508_v2, %v974_v29 }
 0x23b   : > { %4176 = vst [vmem:[#allocation79_spill] sm:$0xff] %v3307_v55  ;;  %v1490_v55 = vsel %vm1462_vm4, %v1457_v40, %v4181_v33  ;;  %v1574_v54 = vsel %vm1561_vm7, %v1541_v30, %v1070_v47  ;;  %v4185_v40 = vld [vmem:[#allocation92_spill] sm:$0xff]  ;;  %v4186_v30 = vld [vmem:[#allocation94_spill] sm:$0xff] }
 0x23c   : > { %963 = vrot.lane.b32.xlu1 %v4178_v45, %s2137_s27  ;;  %v1523_v43 = vsel %vm1495_vm5, %v1490_v55, %v4182_v36  ;;  %v1607_v46 = vsel %vm1594_vm8, %v1574_v54, %v1166_v5  ;;  %v4187_v5 = vld [vmem:[#allocation74_spill] sm:$0xff] }
 0x23d   : > { %1373 = vrot.lane.b32.xlu0 %v2873_v44, %s2138_s28  ;;  %v1556_v8 = vsel %vm1528_vm6, %v1523_v43, %v4183_v35  ;;  %v4184_v44 = vld [vmem:[#allocation89_spill] sm:$0xff]  ;;  %v1640_v29 = vsel %vm1627_vm9, %v1607_v46, %v1262_v20  ;;  %v4188_v20 = vld [vmem:[#allocation24_spill] sm:$0xff] }
 0x23e   : > { %v972_v9 = vpop.permute.xlu1 %971  ;;  %v3324_v13 = vpop.permute.xlu0 %1381  ;;  %v1589_v57 = vsel %vm1561_vm7, %v1556_v8, %v4184_v44  ;;  %v584_v14 = vrot.slane %v4188_v20, 2 }
 0x23f   : > { %v1622_v33 = vsel %vm1594_vm8, %v1589_v57, %v4185_v40  ;;  %v4190_v40 = vld [vmem:[#allocation22_spill] sm:$0xff] }
 0x240   : > { %1349 = vrot.lane.b32.xlu1 %v2887_v1, %s2138_s28  ;;  %v1655_v47 = vsel %vm1627_vm9, %v1622_v33, %v4186_v30  ;;  %v3359_v8 = vsel %vm568_vm2, %v584_v14, %v585_v60  ;;  %v4192_v30 = vld [vmem:[#allocation35_spill] sm:$0xff] }
 0x241   : > { %1083 = vrot.lane.b32.xlu0 %v3096_v7, %s2134_s24  ;;  %v1688_v55 = vsel %vm1660_vm11, %v1655_v47, %v3068_v58  ;;  %v4193_v47 = vld [vmem:[#allocation68_spill] sm:$0xff] }
 0x242   : > { %v1358_v2 = vpop.permute.xlu1 %1357  ;;  %v3342_v43 = vpop.permute.xlu0 %1091 }
 0x243   : > { %v1673_v1 = vsel %vm1660_vm11, %v1640_v29, %v1358_v2  ;;  %v4191_v29 = vld [vmem:[#allocation66_spill] sm:$0xff] }
 0x244   : > { %1059 = vrot.lane.b32.xlu1 %v3112_v39, %s2134_s24  ;;  %2052 = vmatpush3.xpose.msk.msra.mxu0 %vm1693_vm10, %v1673_v1  ;;  %v1441_v2 = vsel %vm1429_vm3, %v2445_v19, %v4191_v29  ;;  %v4194_v1 = vld [vmem:[#allocation90_spill] sm:$0xff] }
 0x245   : > { %793 = vrot.lane.b32.xlu0 %v4187_v5, %s2135_s25  ;;  %2053 = vmatprep.subr.msk.mxu0 %vm1693_vm10, %v1688_v55 }
 0x246   : > { %v1068_v36 = vpop.permute.xlu1 %1067  ;;  %v3356_v35 = vpop.permute.xlu0 %801 }
 0x248   : > { %769 = vrot.lane.b32.xlu1 %v3359_v8, %s2135_s25 }
 0x249   : > { %1179 = vrot.lane.b32.xlu0 %v2348_v52, %s2136_s26 }
 0x24a   : > { %v3365_v58 = vpop.permute.xlu1 %777  ;;  %v3367_v54 = vpop.permute.xlu0 %1187 }
 0x24c   : > { %1155 = vrot.lane.b32.xlu1 %v2445_v19, %s2136_s26  ;;  %v4195_v19 = vld [vmem:[#allocation93_spill] sm:$0xff] }
 0x24d   : > { %889 = vrot.lane.b32.xlu0 %v4142_v38, %s2132_s22 }
 0x24e   : > { %v1164_v44 = vpop.permute.xlu1 %1163  ;;  %v3373_v57 = vpop.permute.xlu0 %897 }
 0x24f   : > { %4189 = vst [vmem:[#allocation31_spill] sm:$0xff] %v3373_v57 }
 0x250   : > { %865 = vrot.lane.b32.xlu1 %v4146_v4, %s2132_s22 }
 0x251   : > { %1275 = vrot.lane.b32.xlu0 %v4140_v27, %s2133_s23  ;;  %v1456_v27 = vsel %vm1429_vm3, %v2477_v59, %v4193_v47 }
 0x252   : > { %v874_v60 = vpop.permute.xlu1 %873  ;;  %v3381_v46 = vpop.permute.xlu0 %1283  ;;  %v1489_v55 = vsel %vm1462_vm4, %v1456_v27, %v4194_v1 }
 0x253   : > { %v1522_v29 = vsel %vm1495_vm5, %v1489_v55, %v4195_v19  ;;  %v4199_v55 = vld [vmem:[#allocation11_spill] sm:$0xff] }
 0x254   : > { %1251 = vrot.lane.b32.xlu1 %v4141_v53, %s2133_s23  ;;  %v1474_v53 = vsel %vm1462_vm4, %v1441_v2, %v3287_v6  ;;  %v1555_v59 = vsel %vm1528_vm6, %v1522_v29, %v3043_v24  ;;  %v4196_v24 = vld [vmem:[#allocation15_spill] sm:$0xff] }
 0x255   : > { %985 = vrot.lane.b32.xlu0 %v4190_v40, %s2137_s27  ;;  %v1507_v14 = vsel %vm1495_vm5, %v1474_v53, %v876_v15  ;;  %v582_v27 = vrot.slane %v4196_v24, 2 }
 0x256   : > { %v1260_v33 = vpop.permute.xlu1 %1259  ;;  %v1540_v7 = vsel %vm1528_vm6, %v1507_v14, %v972_v9  ;;  %v3403_v57 = vpop.permute.xlu0 %993 }
 0x257   : > { %v1573_v6 = vsel %vm1561_vm7, %v1540_v7, %v1068_v36  ;;  %v4197_v36 = vld [vmem:[#allocation10_spill] sm:$0xff] }
 0x258   : > { %961 = vrot.lane.b32.xlu1 %v4192_v30, %s2137_s27  ;;  %v1606_v15 = vsel %vm1594_vm8, %v1573_v6, %v1164_v44 }
 0x259   : > { %1371 = vrot.lane.b32.xlu0 %v2941_v34, %s2138_s28  ;;  %v1588_v34 = vsel %vm1561_vm7, %v1555_v59, %v3089_v3  ;;  %v1639_v2 = vsel %vm1627_vm9, %v1606_v15, %v1260_v33  ;;  %v580_v3 = vrot.slane %v4197_v36, 2  ;;  %v4198_v33 = vld [vmem:[#allocation53_spill] sm:$0xff]  ;;  %v4201_v15 = vld [vmem:[#allocation63_spill] sm:$0xff] }
 0x25a   : > { %v970_v5 = vpop.permute.xlu1 %969  ;;  %v1621_v9 = vsel %vm1594_vm8, %v1588_v34, %v3123_v41  ;;  %v3428_v41 = vpop.permute.xlu0 %1379  ;;  %v4200_v59 = vld [vmem:[#allocation13_spill] sm:$0xff] }
 0x25b   : > { %v1654_v7 = vsel %vm1627_vm9, %v1621_v9, %v3141_v11  ;;  %v3434_v53 = vsel %vm568_vm2, %v580_v3, %v582_v27  ;;  %v1440_v9 = vsel %vm1429_vm3, %v2450_v32, %v4201_v15 }
 0x25c   : > { %1347 = vrot.lane.b32.xlu1 %v2953_v48, %s2138_s28  ;;  %v1687_v44 = vsel %vm1660_vm11, %v1654_v7, %v3166_v56 }
 0x25d   : > { %1081 = vrot.lane.b32.xlu0 %v3189_v22, %s2134_s24 }
 0x25e   : > { %v1356_v47 = vpop.permute.xlu1 %1355  ;;  %v3440_v1 = vpop.permute.xlu0 %1089 }
 0x25f   : > { %v1672_v48 = vsel %vm1660_vm11, %v1639_v2, %v1356_v47  ;;  %v4202_v2 = vld [vmem:[#allocation28_spill] sm:$0xff]  ;;  %v4203_v47 = vld [vmem:[#allocation62_spill] sm:$0xff] }
 0x260   : > { %1057 = vrot.lane.b32.xlu1 %v3202_v0, %s2134_s24  ;;  %2054 = vmatpush3.xpose.msk.msra.mxu0 %vm1693_vm10, %v1672_v48 }
 0x261   : > { %791 = vrot.lane.b32.xlu0 %v4198_v33, %s2135_s25  ;;  %2055 = vmatprep.subr.msk.mxu0 %vm1693_vm10, %v1687_v44 }
 0x262   : > { %v1066_v11 = vpop.permute.xlu1 %1065  ;;  %v3448_v19 = vpop.permute.xlu0 %799 }
 0x264   : > { %767 = vrot.lane.b32.xlu1 %v3434_v53, %s2135_s25 }
 0x265   : > { %1177 = vrot.lane.b32.xlu0 %v2345_v51, %s2136_s26 }
 0x266   : > { %v776_v56 = vpop.permute.xlu1 %775 }
 0x267   : > { %v3456_v34 = vpop.permute.xlu0 %1185 }
 0x268   : > { %1153 = vrot.lane.b32.xlu1 %v2450_v32, %s2136_s26 }
 0x269   : > { %887 = vrot.lane.b32.xlu0 %v4199_v55, %s2132_s22 }
 0x26a   : > { %v1162_v14 = vpop.permute.xlu1 %1161 }
 0x26c   : > { %863 = vrot.lane.b32.xlu1 %v4164_v62, %s2132_s22 }
 0x26d   : > { %1273 = vrot.lane.b32.xlu0 %v4149_v16, %s2133_s23  ;;  %v1455_v16 = vsel %vm1429_vm3, %v2408_v25, %v4203_v47  ;;  %v4207_v47 = vld [vmem:[#allocation20_spill] sm:$0xff] }
 0x26e   : > { %v872_v29 = vpop.permute.xlu1 %871  ;;  %v1488_v24 = vsel %vm1462_vm4, %v1455_v16, %v3105_v37 }
 0x26f   : > { %v1521_v32 = vsel %vm1495_vm5, %v1488_v24, %v3129_v26 }
 0x270   : > { %1249 = vrot.lane.b32.xlu1 %v4152_v63, %s2133_s23  ;;  %v1473_v63 = vsel %vm1462_vm4, %v1440_v9, %v3365_v58  ;;  %v1554_v25 = vsel %vm1528_vm6, %v1521_v32, %v3154_v10  ;;  %v3484_v58 = vpop.permute.xlu0 %895  ;;  %v4210_v32 = vld [vmem:[#allocation61_spill] sm:$0xff] }
 0x271   : > { %983 = vrot.lane.b32.xlu0 %v4200_v59, %s2137_s27  ;;  %v1506_v27 = vsel %vm1495_vm5, %v1473_v63, %v874_v60  ;;  %v4208_v63 = vld [vmem:[#allocation60_spill] sm:$0xff] }
 0x272   : > { %v1258_v6 = vpop.permute.xlu1 %1257  ;;  %v1539_v48 = vsel %vm1528_vm6, %v1506_v27, %v970_v5  ;;  %v1439_v24 = vsel %vm1429_vm3, %v4139_v21, %v4208_v63  ;;  %v4209_v27 = vld [vmem:[#allocation27_spill] sm:$0xff] }
 0x273   : > { %v1572_v44 = vsel %vm1561_vm7, %v1539_v48, %v1066_v11  ;;  %v1454_v48 = vsel %vm1429_vm3, %v4169_v50, %v4210_v32  ;;  %v4217_v32 = vld [vmem:[#allocation6_spill] sm:$0xff] }
 0x274   : > { %959 = vrot.lane.b32.xlu1 %v4202_v2, %s2137_s27  ;;  %v1605_v37 = vsel %vm1594_vm8, %v1572_v44, %v1162_v14  ;;  %v3503_v14 = vpop.permute.xlu0 %1281 }
 0x275   : > { %1369 = vrot.lane.b32.xlu0 %v3001_v31, %s2138_s28  ;;  %v1587_v31 = vsel %vm1561_vm7, %v1554_v25, %v3180_v18  ;;  %v1638_v10 = vsel %vm1627_vm9, %v1605_v37, %v1258_v6  ;;  %v1472_v25 = vsel %vm1462_vm4, %v1439_v24, %v776_v56 }
 0x276   : > { %v968_v7 = vpop.permute.xlu1 %967  ;;  %v1620_v26 = vsel %vm1594_vm8, %v1587_v31, %v3210_v61  ;;  %v4205_v61 = vld [vmem:[#allocation12_spill] sm:$0xff]  ;;  %v4212_v31 = vld [vmem:[#allocation19_spill] sm:$0xff] }
 0x277   : > { %v1653_v60 = vsel %vm1627_vm9, %v1620_v26, %v3222_v42  ;;  %v579_v33 = vrot.slane %v4205_v61, 2  ;;  %v1487_v37 = vsel %vm1462_vm4, %v1454_v48, %v4212_v31  ;;  %v1505_v26 = vsel %vm1495_vm5, %v1472_v25, %v872_v29  ;;  %v4216_v29 = vld [vmem:[#allocation41_spill] sm:$0xff] }
 0x278   : > { %1345 = vrot.lane.b32.xlu1 %v4166_v49, %s2138_s28  ;;  %v1686_v18 = vsel %vm1660_vm11, %v1653_v60, %v3245_v17  ;;  %v3514_v59 = vpop.permute.xlu0 %991  ;;  %v1538_v60 = vsel %vm1528_vm6, %v1505_v26, %v968_v7  ;;  %v577_v48 = vrot.slane %v4217_v32, 2  ;;  %v4219_v31 = vld [vmem:[#allocation5_spill] sm:$0xff] }
 0x279   : > { %1079 = vrot.lane.b32.xlu0 %v4167_v23, %s2134_s24  ;;  %v4204_v23 = vld [vmem:[#allocation67_spill] sm:$0xff]  ;;  %v3506_v42 = vsel %vm568_vm2, %v579_v33, %v580_v3  ;;  %v4206_v3 = vld [vmem:[#allocation4_spill] sm:$0xff] }
 0x27a   : > { %v1354_v5 = vpop.permute.xlu1 %1353 }
 0x27b   : > { %v1671_v49 = vsel %vm1660_vm11, %v1638_v10, %v1354_v5  ;;  %v4213_v10 = vld [vmem:[#allocation43_spill] sm:$0xff] }
 0x27c   : > { %1055 = vrot.lane.b32.xlu1 %v3281_v28, %s2134_s24  ;;  %2056 = vmatpush3.xpose.msk.msra.mxu0 %vm1693_vm10, %v1671_v49  ;;  %v3522_v9 = vpop.permute.xlu0 %1377  ;;  %v1520_v5 = vsel %vm1495_vm5, %v1487_v37, %v4213_v10  ;;  %v4214_v49 = vld [vmem:[#allocation32_spill] sm:$0xff] }
 0x27d   : > { %789 = vrot.lane.b32.xlu0 %v4204_v23, %s2135_s25  ;;  %2057 = vmatprep.subr.msk.mxu0 %vm1693_vm10, %v1686_v18  ;;  %v1553_v50 = vsel %vm1528_vm6, %v1520_v5, %v4214_v49  ;;  %v4215_v18 = vld [vmem:[#allocation30_spill] sm:$0xff] }
 0x27e   : > { %v1064_v11 = vpop.permute.xlu1 %1063  ;;  %v1586_v23 = vsel %vm1561_vm7, %v1553_v50, %v4215_v18 }
 0x27f   : > { %v1571_v56 = vsel %vm1561_vm7, %v1538_v60, %v1064_v11  ;;  %v1619_v63 = vsel %vm1594_vm8, %v1586_v23, %v4216_v29  ;;  %v4218_v11 = vld [vmem:[#allocation77_spill] sm:$0xff] }
 0x280   : > { %765 = vrot.lane.b32.xlu1 %v3506_v42, %s2135_s25  ;;  %v3537_v44 = vpop.permute.xlu0 %1087  ;;  %v1652_v25 = vsel %vm1627_vm9, %v1619_v63, %v4218_v11  ;;  %v4222_v29 = vld [vmem:[#allocation33_spill] sm:$0xff] }
 0x281   : > { %1175 = vrot.lane.b32.xlu0 %v4134_v12, %s2136_s26  ;;  %v1685_v37 = vsel %vm1660_vm11, %v1652_v25, %v3324_v13 }
 0x282   : > { %v774_v17 = vpop.permute.xlu1 %773 }
 0x284   : > { %1151 = vrot.lane.b32.xlu1 %v4139_v21, %s2136_s26 }
 0x285   : > { %1143 = vrot.lane.b32.xlu0 %v4197_v36, %s2136_s26 }
 0x286   : > { %v1160_v6 = vpop.permute.xlu1 %1159 }
 0x287   : > { %v1604_v33 = vsel %vm1594_vm8, %v1571_v56, %v1160_v6  ;;  %v575_v6 = vrot.slane %v4219_v31, 2  ;;  %v4220_v56 = vld [vmem:[#allocation59_spill] sm:$0xff] }
 0x288   : > { %861 = vrot.lane.b32.xlu1 %v4188_v20, %s2132_s22  ;;  %v1438_v18 = vsel %vm1429_vm3, %v4146_v4, %v4220_v56 }
 0x289   : > { %853 = vrot.lane.b32.xlu0 %v4206_v3, %s2132_s22  ;;  %v3576_v26 = vsel %vm568_vm2, %v575_v6, %v577_v48 }
 0x28a   : > { %v870_v15 = vpop.permute.xlu1 %869 }
 0x28c   : > { %1247 = vrot.lane.b32.xlu1 %v4178_v45, %s2133_s23  ;;  %v4211_v45 = vld [vmem:[#allocation7_spill] sm:$0xff] }
 0x28d   : > { %1239 = vrot.lane.b32.xlu0 %v4207_v47, %s2133_s23 }
 0x28e   : > { %v1256_v16 = vpop.permute.xlu1 %1255 }
 0x28f   : > { %v1637_v7 = vsel %vm1627_vm9, %v1604_v33, %v1256_v16  ;;  %v1471_v33 = vsel %vm1462_vm4, %v1438_v18, %v774_v17 }
 0x290   : > { %957 = vrot.lane.b32.xlu1 %v4209_v27, %s2137_s27 }
 0x291   : > { %949 = vrot.lane.b32.xlu0 %v4211_v45, %s2137_s27 }
 0x292   : > { %v966_v21 = vpop.permute.xlu1 %965 }
 0x294   : > { %1343 = vrot.lane.b32.xlu1 %v3112_v39, %s2138_s28  ;;  %v3563_v39 = vpop.permute.xlu0 %797 }
 0x295   : > { %1335 = vrot.lane.b32.xlu0 %v3434_v53, %s2138_s28 }
 0x296   : > { %v1352_v24 = vpop.permute.xlu1 %1351 }
 0x297   : > { %v1670_v45 = vsel %vm1660_vm11, %v1637_v7, %v1352_v24  ;;  %v4223_v24 = vld [vmem:[#allocation18_spill] sm:$0xff] }
 0x298   : > { %1053 = vrot.lane.b32.xlu1 %v3359_v8, %s2134_s24  ;;  %2058 = vmatpush3.xpose.msk.msra.mxu0 %vm1693_vm10, %v1670_v45  ;;  %v3580_v10 = vpop.permute.xlu0 %1183 }
 0x299   : > { %1173 = vrot.lane.b32.xlu0 %v4142_v38, %s2136_s26  ;;  %2059 = vmatprep.subr.msk.mxu0 %vm1693_vm10, %v1685_v37 }
 0x29a   : > { %v1062_v16 = vpop.permute.xlu1 %1061 }
 0x29c   : > { %763 = vrot.lane.b32.xlu1 %v3576_v26, %s2135_s25  ;;  %v3588_v60 = vpop.permute.xlu0 %893 }
 0x29d   : > { %1269 = vrot.lane.b32.xlu0 %v4190_v40, %s2133_s23 }
 0x29e   : > { %v772_v13 = vpop.permute.xlu1 %771 }
 0x2a0   : > { %1149 = vrot.lane.b32.xlu1 %v4146_v4, %s2136_s26  ;;  %v3594_v50 = vpop.permute.xlu0 %1279 }
 0x2a1   : > { %1365 = vrot.lane.b32.xlu0 %v3189_v22, %s2138_s28  ;;  %v4221_v22 = vld [vmem:[#allocation57_spill] sm:$0xff] }
 0x2a2   : > { %v1158_v5 = vpop.permute.xlu1 %1157  ;;  %v1453_v23 = vsel %vm1429_vm3, %v2348_v52, %v4221_v22 }
 0x2a3   : > { %v1486_v63 = vsel %vm1462_vm4, %v1453_v23, %v4222_v29  ;;  %v4225_v23 = vld [vmem:[#allocation55_spill] sm:$0xff]  ;;  %v4226_v29 = vld [vmem:[#allocation17_spill] sm:$0xff] }
 0x2a4   : > { %859 = vrot.lane.b32.xlu1 %v4197_v36, %s2132_s22  ;;  %v1519_v32 = vsel %vm1495_vm5, %v1486_v63, %v4223_v24  ;;  %v3610_v48 = vpop.permute.xlu0 %989  ;;  %v4227_v63 = vld [vmem:[#allocation56_spill] sm:$0xff] }
 0x2a6   : > { %v868_v49 = vpop.permute.xlu1 %867 }
 0x2a8   : > { %1245 = vrot.lane.b32.xlu1 %v4192_v30, %s2133_s23  ;;  %v1504_v30 = vsel %vm1495_vm5, %v1471_v33, %v870_v15  ;;  %v1437_v33 = vsel %vm1429_vm3, %v4164_v62, %v4225_v23 }
 0x2a9   : > { %v1537_v4 = vsel %vm1528_vm6, %v1504_v30, %v966_v21  ;;  %v1452_v30 = vsel %vm1429_vm3, %v2345_v51, %v4227_v63  ;;  %v1470_v24 = vsel %vm1462_vm4, %v1437_v33, %v772_v13 }
 0x2aa   : > { %v1254_v40 = vpop.permute.xlu1 %1253  ;;  %v1570_v52 = vsel %vm1561_vm7, %v1537_v4, %v1062_v16 }
 0x2ab   : > { %v1603_v15 = vsel %vm1594_vm8, %v1570_v52, %v1158_v5 }
 0x2ac   : > { %955 = vrot.lane.b32.xlu1 %v4207_v47, %s2137_s27  ;;  %v4224_v47 = vld [vmem:[#allocation79_spill] sm:$0xff]  ;;  %v1636_v45 = vsel %vm1627_vm9, %v1603_v15, %v1254_v40 }
 0x2ad   : > { %v1552_v11 = vsel %vm1528_vm6, %v1519_v32, %v4224_v47  ;;  %v1485_v32 = vsel %vm1462_vm4, %v1452_v30, %v3356_v35  ;;  %v4228_v47 = vld [vmem:[#allocation31_spill] sm:$0xff] }
 0x2ae   : > { %v964_v7 = vpop.permute.xlu1 %963  ;;  %v1585_v17 = vsel %vm1561_vm7, %v1552_v11, %v3342_v43  ;;  %v3633_v43 = vpop.permute.xlu0 %1375  ;;  %v1518_v11 = vsel %vm1495_vm5, %v1485_v32, %v4228_v47 }
 0x2af   : > { %v1618_v25 = vsel %vm1594_vm8, %v1585_v17, %v3367_v54  ;;  %v1551_v52 = vsel %vm1528_vm6, %v1518_v11, %v3403_v57 }
 0x2b0   : > { %1341 = vrot.lane.b32.xlu1 %v3202_v0, %s2138_s28  ;;  %v1651_v21 = vsel %vm1627_vm9, %v1618_v25, %v3381_v46  ;;  %v574_v0 = vrot.slane %v4206_v3, 2  ;;  %v1584_v51 = vsel %vm1561_vm7, %v1551_v52, %v3440_v1  ;;  %v4234_v52 = vld [vmem:[#allocation25_spill] sm:$0xff] }
 0x2b1   : > { %v1684_v16 = vsel %vm1660_vm11, %v1651_v21, %v3428_v41 }
 0x2b2   : > { %v1350_v37 = vpop.permute.xlu1 %1349  ;;  %v3637_v5 = vsel %vm568_vm2, %v574_v0, %v575_v6  ;;  %v3641_v41 = vpop.permute.xlu0 %1085  ;;  %v4230_v0 = vld [vmem:[#allocation54_spill] sm:$0xff] }
 0x2b3   : > { %v1669_v56 = vsel %vm1660_vm11, %v1636_v45, %v1350_v37  ;;  %v4229_v45 = vld [vmem:[#allocation34_spill] sm:$0xff] }
 0x2b4   : > { %1051 = vrot.lane.b32.xlu1 %v3434_v53, %s2134_s24  ;;  %2060 = vmatpush3.xpose.msk.msra.mxu0 %vm1693_vm10, %v1669_v56 }
 0x2b5   : > { %2061 = vmatprep.subr.msk.mxu0 %vm1693_vm10, %v1684_v16 }
 0x2b6   : > { %v1060_v54 = vpop.permute.xlu1 %1059  ;;  %v3647_v40 = vpop.permute.xlu0 %795 }
 0x2b8   : > { %761 = vrot.lane.b32.xlu1 %v3637_v5, %s2135_s25 }
 0x2ba   : > { %v770_v46 = vpop.permute.xlu1 %769  ;;  %v3651_v22 = vpop.permute.xlu0 %1181 }
 0x2bc   : > { %1147 = vrot.lane.b32.xlu1 %v4164_v62, %s2136_s26 }
 0x2be   : > { %v1156_v53 = vpop.permute.xlu1 %1155  ;;  %v3675_v35 = vpop.permute.xlu0 %891 }
 0x2c0   : > { %857 = vrot.lane.b32.xlu1 %v4205_v61, %s2132_s22 }
 0x2c2   : > { %v866_v18 = vpop.permute.xlu1 %865 }
 0x2c4   : > { %1243 = vrot.lane.b32.xlu1 %v4202_v2, %s2133_s23  ;;  %v1503_v2 = vsel %vm1495_vm5, %v1470_v24, %v868_v49  ;;  %v1617_v49 = vsel %vm1594_vm8, %v1584_v51, %v3456_v34  ;;  %v3690_v34 = vpop.permute.xlu0 %1277 }
 0x2c5   : > { %v1536_v62 = vsel %vm1528_vm6, %v1503_v2, %v964_v7  ;;  %v1650_v57 = vsel %vm1627_vm9, %v1617_v49, %v3503_v14 }
 0x2c6   : > { %v1252_v6 = vpop.permute.xlu1 %1251  ;;  %v1569_v17 = vsel %vm1561_vm7, %v1536_v62, %v1060_v54  ;;  %v1436_v54 = vsel %vm1429_vm3, %v4188_v20, %v4230_v0 }
 0x2c7   : > { %v1602_v13 = vsel %vm1594_vm8, %v1569_v17, %v1156_v53  ;;  %v4231_v53 = vld [vmem:[#allocation8_spill] sm:$0xff]  ;;  %v1469_v63 = vsel %vm1462_vm4, %v1436_v54, %v770_v46 }
 0x2c8   : > { %953 = vrot.lane.b32.xlu1 %v4226_v29, %s2137_s27  ;;  %v1635_v7 = vsel %vm1627_vm9, %v1602_v13, %v1252_v6  ;;  %v3696_v14 = vpop.permute.xlu0 %987  ;;  %v4232_v6 = vld [vmem:[#allocation52_spill] sm:$0xff]  ;;  %v4236_v13 = vld [vmem:[#allocation21_spill] sm:$0xff] }
 0x2c9   : > { %v1451_v23 = vsel %vm1429_vm3, %v4134_v12, %v4232_v6 }
 0x2ca   : > { %v962_v4 = vpop.permute.xlu1 %961  ;;  %v1484_v30 = vsel %vm1462_vm4, %v1451_v23, %v3448_v19 }
 0x2cc   : > { %1339 = vrot.lane.b32.xlu1 %v3281_v28, %s2138_s28  ;;  %v1683_v28 = vsel %vm1660_vm11, %v1650_v57, %v3522_v9  ;;  %v3700_v56 = vpop.permute.xlu0 %1373 }
 0x2ce   : > { %v1348_v15 = vpop.permute.xlu1 %1347 }
 0x2cf   : > { %v1668_v25 = vsel %vm1660_vm11, %v1635_v7, %v1348_v15  ;;  %v4237_v15 = vld [vmem:[#allocation50_spill] sm:$0xff] }
 0x2d0   : > { %1049 = vrot.lane.b32.xlu1 %v3506_v42, %s2134_s24  ;;  %2062 = vmatpush3.xpose.msk.msra.mxu0 %vm1693_vm10, %v1668_v25  ;;  %v3712_v33 = vpop.permute.xlu0 %1083  ;;  %v1435_v57 = vsel %vm1429_vm3, %v4197_v36, %v4237_v15  ;;  %v4238_v25 = vld [vmem:[#allocation74_spill] sm:$0xff] }
 0x2d1   : > { %2063 = vmatprep.subr.msk.mxu0 %vm1693_vm10, %v1683_v28  ;;  %v4239_v28 = vld [vmem:[#allocation51_spill] sm:$0xff] }
 0x2d2   : > { %v1058_v1 = vpop.permute.xlu1 %1057 }
 0x2d4   : > { %2117 = vrot.lane.b32.xlu1 %v4229_v45, %s2135_s25 }
 0x2d6   : > { %v768_v37 = vpop.permute.xlu1 %767 }
 0x2d7   : > { %v1468_v45 = vsel %vm1462_vm4, %v1435_v57, %v768_v37 }
 0x2d8   : > { %1145 = vrot.lane.b32.xlu1 %v4188_v20, %s2136_s26  ;;  %v1517_v20 = vsel %vm1495_vm5, %v1484_v30, %v3484_v58 }
 0x2d9   : > { %v1550_v2 = vsel %vm1528_vm6, %v1517_v20, %v3514_v59  ;;  %v3734_v59 = vpop.permute.xlu0 %793 }
 0x2da   : > { %v1154_v9 = vpop.permute.xlu1 %1153  ;;  %v1583_v46 = vsel %vm1561_vm7, %v1550_v2, %v3537_v44 }
 0x2dc   : > { %855 = vrot.lane.b32.xlu1 %v4219_v31, %s2132_s22 }
 0x2dd   : > { %v1180_v62 = vpop.permute.xlu0 %1179 }
 0x2de   : > { %v864_v21 = vpop.permute.xlu1 %863 }
 0x2e0   : > { %1241 = vrot.lane.b32.xlu1 %v4209_v27, %s2133_s23  ;;  %v1502_v27 = vsel %vm1495_vm5, %v1469_v63, %v866_v18  ;;  %v1616_v18 = vsel %vm1594_vm8, %v1583_v46, %v3580_v10  ;;  %v4233_v10 = vld [vmem:[#allocation9_spill] sm:$0xff] }
 0x2e1   : > { %v1535_v32 = vsel %vm1528_vm6, %v1502_v27, %v962_v4  ;;  %v1649_v4 = vsel %vm1627_vm9, %v1616_v18, %v3594_v50  ;;  %v3747_v51 = vpop.permute.xlu0 %889 }
 0x2e2   : > { %v1250_v16 = vpop.permute.xlu1 %1249  ;;  %v1568_v12 = vsel %vm1561_vm7, %v1535_v32, %v1058_v1  ;;  %v1450_v1 = vsel %vm1429_vm3, %v4142_v38, %v4239_v28  ;;  %v4242_v28 = vld [vmem:[#allocation47_spill] sm:$0xff] }
 0x2e3   : > { %v1601_v19 = vsel %vm1594_vm8, %v1568_v12, %v1154_v9  ;;  %v1483_v9 = vsel %vm1462_vm4, %v1450_v1, %v3563_v39  ;;  %v3778_v39 = vld [vmem:[%s3938_s1] sm:$0xff]  ;;  %v4240_v12 = vld [vmem:[#allocation49_spill] sm:$0xff] }
 0x2e4   : > { %951 = vrot.lane.b32.xlu1 %v4231_v53, %s2137_s27  ;;  %v1634_v58 = vsel %vm1627_vm9, %v1601_v19, %v1250_v16  ;;  %v1501_v16 = vsel %vm1495_vm5, %v1468_v45, %v864_v21  ;;  %v1516_v54 = vsel %vm1495_vm5, %v1483_v9, %v3588_v60  ;;  %2077 = vmatprep.mubr.msk.f32.mxu0 %vm1693_vm10, %v3778_v39  ;;  %v4241_v19 = vld [vmem:[#allocation48_spill] sm:$0xff]  ;;  %v4243_v1 = vld [vmem:[#allocation58_spill] sm:$0xff] }
 0x2e5   : > { %v1276_v49 = vpop.permute.xlu0 %1275  ;;  %v1549_v6 = vsel %vm1528_vm6, %v1516_v54, %v3610_v48  ;;  %v1434_v46 = vsel %vm1429_vm3, %v4205_v61, %v4240_v12  ;;  %v1449_v18 = vsel %vm1429_vm3, %v4199_v55, %v4241_v19  ;;  %v1448_v45 = vsel %vm1429_vm3, %v4233_v10, %v4243_v1 }
 0x2e6   : > { %v960_v24 = vpop.permute.xlu1 %959  ;;  %v1582_v60 = vsel %vm1561_vm7, %v1549_v6, %v3641_v41 }
 0x2e7   : > { %v1534_v36 = vsel %vm1528_vm6, %v1501_v16, %v960_v24  ;;  %v1615_v48 = vsel %vm1594_vm8, %v1582_v60, %v3651_v22 }
 0x2e8   : > { %1337 = vrot.lane.b32.xlu1 %v3359_v8, %s2138_s28  ;;  %v1682_v8 = vsel %vm1660_vm11, %v1649_v4, %v3633_v43  ;;  %v4235_v43 = vld [vmem:[#allocation14_spill] sm:$0xff] }
 0x2e9   : > { %v3767_v53 = vpop.permute.xlu0 %985 }
 0x2ea   : > { %v1346_v47 = vpop.permute.xlu1 %1345 }
 0x2eb   : > { %v1667_v11 = vsel %vm1660_vm11, %v1634_v58, %v1346_v47  ;;  %v1482_v58 = vsel %vm1462_vm4, %v1449_v18, %v3647_v40 }
 0x2ec   : > { %1047 = vrot.lane.b32.xlu1 %v3576_v26, %s2134_s24  ;;  %2064 = vmatpush3.xpose.msk.msra.mxu0 %vm1693_vm10, %v1667_v11  ;;  %v1515_v4 = vsel %vm1495_vm5, %v1482_v58, %v3675_v35 }
 0x2ed   : > { %2065 = vmatprep.subr.msk.mxu0 %vm1693_vm10, %v1682_v8  ;;  %v1372_v41 = vpop.permute.xlu0 %1371 }
 0x2ee   : > { %v1056_v44 = vpop.permute.xlu1 %1055 }
 0x2ef   : > { %v1567_v38 = vsel %vm1561_vm7, %v1534_v36, %v1056_v44 }
 0x2f0   : > { %885 = vrot.lane.b32.xlu1 %v4233_v10, %s2132_s22 }
 0x2f1   : > { %v1082_v24 = vpop.permute.xlu0 %1081 }
 0x2f2   : > { %v766_v50 = vpop.permute.xlu1 %765 }
 0x2f4   : > { %1271 = vrot.lane.b32.xlu1 %v4234_v52, %s2133_s23 }
 0x2f5   : > { %v3801_v20 = vpop.permute.xlu0 %791 }
 0x2f6   : > { %v1152_v17 = vpop.permute.xlu1 %1151 }
 0x2f7   : > { %v1600_v37 = vsel %vm1594_vm8, %v1567_v38, %v1152_v17 }
 0x2f8   : > { %981 = vrot.lane.b32.xlu1 %v4235_v43, %s2137_s27 }
 0x2f9   : > { %v1178_v2 = vpop.permute.xlu0 %1177 }
 0x2fa   : > { %v862_v26 = vpop.permute.xlu1 %861 }
 0x2fc   : > { %1367 = vrot.lane.b32.xlu1 %v4236_v13, %s2138_s28 }
 0x2fd   : > { %v3821_v44 = vpop.permute.xlu0 %887 }
 0x2fe   : > { %v1248_v7 = vpop.permute.xlu1 %1247 }
 0x2ff   : > { %v1633_v21 = vsel %vm1627_vm9, %v1600_v37, %v1248_v7 }
 0x300   : > { %1077 = vrot.lane.b32.xlu1 %v4238_v25, %s2134_s24 }
 0x302   : > { %v958_v0 = vpop.permute.xlu1 %957 }
 0x304   : > { %1045 = vrot.lane.b32.xlu1 %v3637_v5, %s2134_s24  ;;  %v1648_v5 = vsel %vm1627_vm9, %v1615_v48, %v3690_v34 }
 0x305   : > { %v1681_v30 = vsel %vm1660_vm11, %v1648_v5, %v3700_v56 }
 0x306   : > { %v1344_v23 = vpop.permute.xlu1 %1343 }
 0x307   : > { %v1666_v63 = vsel %vm1660_vm11, %v1633_v21, %v1344_v23 }
 0x308   : > { %1141 = vrot.lane.b32.xlu1 %v4205_v61, %s2136_s26  ;;  %2066 = vmatpush3.xpose.msk.msra.mxu0 %vm1693_vm10, %v1666_v63  ;;  %v1548_v61 = vsel %vm1528_vm6, %v1515_v4, %v3696_v14 }
 0x309   : > { %2067 = vmatprep.subr.msk.mxu0 %vm1693_vm10, %v1681_v30  ;;  %v1581_v55 = vsel %vm1561_vm7, %v1548_v61, %v3712_v33 }
 0x30a   : > { %v1054_v22 = vpop.permute.xlu1 %1053 }
 0x30c   : > { %1237 = vrot.lane.b32.xlu1 %v4226_v29, %s2133_s23  ;;  %v1467_v29 = vsel %vm1462_vm4, %v1434_v46, %v766_v50  ;;  %v1614_v50 = vsel %vm1594_vm8, %v1581_v55, %v1180_v62 }
 0x30d   : > { %v1647_v35 = vsel %vm1627_vm9, %v1614_v50, %v1276_v49  ;;  %v1433_v49 = vsel %vm1429_vm3, %v4219_v31, %v4242_v28 }
 0x30e   : > { %v764_v27 = vpop.permute.xlu1 %763  ;;  %v1680_v14 = vsel %vm1660_vm11, %v1647_v35, %v1372_v41 }
 0x30f   : > { %v1466_v16 = vsel %vm1462_vm4, %v1433_v49, %v764_v27 }
 0x310   : > { %1333 = vrot.lane.b32.xlu1 %v3506_v42, %s2138_s28  ;;  %v1500_v42 = vsel %vm1495_vm5, %v1467_v29, %v862_v26  ;;  %v1274_v26 = vpop.permute.xlu0 %1273 }
 0x311   : > { %v1533_v11 = vsel %vm1528_vm6, %v1500_v42, %v958_v0  ;;  %v1481_v0 = vsel %vm1462_vm4, %v1448_v45, %v3734_v59 }
 0x312   : > { %v1150_v34 = vpop.permute.xlu1 %1149  ;;  %v1566_v8 = vsel %vm1561_vm7, %v1533_v11, %v1054_v22  ;;  %v1514_v6 = vsel %vm1495_vm5, %v1481_v0, %v3747_v51 }
 0x313   : > { %v1599_v40 = vsel %vm1594_vm8, %v1566_v8, %v1150_v34  ;;  %v1547_v31 = vsel %vm1528_vm6, %v1514_v6, %v3767_v53  ;;  %v4245_v8 = vld [vmem:[#allocation44_spill] sm:$0xff] }
 0x314   : > { %v3831_v7 = vpop.permute.xlu0 %983  ;;  %v1580_v10 = vsel %vm1561_vm7, %v1547_v31, %v1082_v24  ;;  %v2100_v55 = vunpack.i.h.bf16 %v4245_v8  ;;  %v4250_v31 = vld [vmem:[#allocation16_spill] sm:$0xff] }
 0x315   : > { %v1613_v48 = vsel %vm1594_vm8, %v1580_v10, %v1178_v2 }
 0x316   : > { %v860_v56 = vpop.permute.xlu1 %859  ;;  %v1646_v23 = vsel %vm1627_vm9, %v1613_v48, %v1274_v26 }
 0x317   : > { %v1499_v54 = vsel %vm1495_vm5, %v1466_v16, %v860_v56 }
 0x318   : > { %v1370_v57 = vpop.permute.xlu0 %1369 }
 0x319   : > { %v1679_v63 = vsel %vm1660_vm11, %v1646_v23, %v1370_v57  ;;  %v2099_v23 = vunpack.i.l.bf16 %v4245_v8 }
 0x31a   : > { %v1246_v32 = vpop.permute.xlu1 %1245 }
 0x31b   : > { %v1632_v52 = vsel %vm1627_vm9, %v1599_v40, %v1246_v32  ;;  %v4244_v32 = vld [vmem:[#allocation46_spill] sm:$0xff] }
 0x31c   : > { %v1080_v9 = vpop.permute.xlu0 %1079  ;;  %v1432_v2 = vsel %vm1429_vm3, %v4206_v3, %v4244_v32 }
 0x31e   : > { %v956_v47 = vpop.permute.xlu1 %955 }
 0x31f   : > { %v1532_v38 = vsel %vm1528_vm6, %v1499_v54, %v956_v47 }
 0x320   : > { %v790_v5 = vpop.permute.xlu0 %789 }
 0x322   : > { %v1342_v17 = vpop.permute.xlu1 %1341 }
 0x323   : > { %v1665_v43 = vsel %vm1660_vm11, %v1632_v52, %v1342_v17  ;;  %v4246_v17 = vld [vmem:[#allocation2_spill] sm:$0xff] }
 0x324   : > { %2068 = vmatpush3.xpose.msk.msra.mxu0 %vm1693_vm10, %v1665_v43  ;;  %v1176_v30 = vpop.permute.xlu0 %1175  ;;  %v1431_v35 = vsel %vm1429_vm3, %v4246_v17, %v2100_v55 }
 0x325   : > { %2069 = vmatprep.subr.msk.mxu0 %vm1693_vm10, %v1680_v14 }
 0x326   : > { %v1052_v33 = vpop.permute.xlu1 %1051 }
 0x327   : > { %v1565_v60 = vsel %vm1561_vm7, %v1532_v38, %v1052_v33 }
 0x328   : > { %v1144_v27 = vpop.permute.xlu0 %1143 }
 0x32a   : > { %v762_v13 = vpop.permute.xlu1 %761 }
 0x32b   : > { %v1465_v12 = vsel %vm1462_vm4, %v1432_v2, %v762_v13 }
 0x32c   : > { %v854_v34 = vpop.permute.xlu0 %853 }
 0x32e   : > { %v1148_v15 = vpop.permute.xlu1 %1147 }
 0x32f   : > { %v1598_v37 = vsel %vm1594_vm8, %v1565_v60, %v1148_v15  ;;  %v4247_v15 = vld [vmem:[#allocation83_spill] sm:$0xff] }
 0x330   : > { %v1240_v18 = vpop.permute.xlu0 %1239 }
 0x332   : > { %v858_v62 = vpop.permute.xlu1 %857 }
 0x333   : > { %v1498_v46 = vsel %vm1495_vm5, %v1465_v12, %v858_v62  ;;  %v4248_v62 = vld [vmem:[#allocation45_spill] sm:$0xff] }
 0x334   : > { %v950_v3 = vpop.permute.xlu0 %949  ;;  %v1447_v57 = vsel %vm1429_vm3, %v4248_v62, %v4247_v15 }
 0x336   : > { %v1244_v25 = vpop.permute.xlu1 %1243 }
 0x337   : > { %v1631_v59 = vsel %vm1627_vm9, %v1598_v37, %v1244_v25  ;;  %v1480_v25 = vsel %vm1462_vm4, %v1447_v57, %v3801_v20  ;;  %v4249_v20 = vld [vmem:[#allocation81_spill] sm:$0xff] }
 0x338   : > { %v1336_v52 = vpop.permute.xlu0 %1335  ;;  %v1513_v49 = vsel %vm1495_vm5, %v1480_v25, %v3821_v44  ;;  %v1446_v60 = vsel %vm1429_vm3, %v4250_v31, %v4249_v20 }
 0x339   : > { %v1546_v16 = vsel %vm1528_vm6, %v1513_v49, %v3831_v7  ;;  %v1479_v37 = vsel %vm1462_vm4, %v1446_v60, %v790_v5 }
 0x33a   : > { %v954_v36 = vpop.permute.xlu1 %953  ;;  %v1579_v0 = vsel %vm1561_vm7, %v1546_v16, %v1080_v9 }
 0x33b   : > { %v1531_v29 = vsel %vm1528_vm6, %v1498_v46, %v954_v36  ;;  %v1612_v54 = vsel %vm1594_vm8, %v1579_v0, %v1176_v30 }
 0x33c   : > { %v1174_v28 = vpop.permute.xlu0 %1173 }
 0x33e   : > { %v1340_v21 = vpop.permute.xlu1 %1339 }
 0x33f   : > { %v1664_v51 = vsel %vm1660_vm11, %v1631_v59, %v1340_v21 }
 0x340   : > { %2070 = vmatpush3.xpose.msk.msra.mxu0 %vm1693_vm10, %v1664_v51  ;;  %v1270_v44 = vpop.permute.xlu0 %1269 }
 0x341   : > { %2071 = vmatprep.subr.msk.mxu0 %vm1693_vm10, %v1679_v63 }
 0x342   : > { %v1050_v53 = vpop.permute.xlu1 %1049 }
 0x343   : > { %v1564_v58 = vsel %vm1561_vm7, %v1531_v29, %v1050_v53 }
 0x344   : > { %v1366_v63 = vpop.permute.xlu0 %1365 }
 0x346   : > { %v3858_v41 = vpop.permute.xlu1 %2117 }
 0x347   : > { %v2119_v40 = vunpack.i.l.bf16 %v3858_v41  ;;  %v2120_v5 = vunpack.i.h.bf16 %v3858_v41 }
 0x349   : > { %v1464_v43 = vsel %vm1462_vm4, %v1431_v35, %v2119_v40 }
 0x34a   : > { %v1146_v22 = vpop.permute.xlu1 %1145 }
 0x34b   : > { %v1597_v42 = vsel %vm1594_vm8, %v1564_v58, %v1146_v22 }
 0x34e   : > { %v856_v24 = vpop.permute.xlu1 %855 }
 0x34f   : > { %v1497_v14 = vsel %vm1495_vm5, %v1464_v43, %v856_v24 }
 0x352   : > { %v1242_v56 = vpop.permute.xlu1 %1241 }
 0x353   : > { %v1630_v47 = vsel %vm1627_vm9, %v1597_v42, %v1242_v56 }
 0x356   : > { %v952_v19 = vpop.permute.xlu1 %951 }
 0x357   : > { %v1530_v33 = vsel %vm1528_vm6, %v1497_v14, %v952_v19 }
 0x35a   : > { %v1338_v4 = vpop.permute.xlu1 %1337 }
 0x35b   : > { %v1663_v11 = vsel %vm1660_vm11, %v1630_v47, %v1338_v4 }
 0x35c   : > { %2072 = vmatpush3.xpose.msk.msra.mxu0 %vm1693_vm10, %v1663_v11 }
 0x35e   : > { %v1048_v61 = vpop.permute.xlu1 %1047 }
 0x35f   : > { %v1563_v13 = vsel %vm1561_vm7, %v1530_v33, %v1048_v61 }
 0x360   : > { %v1596_v1 = vsel %vm1594_vm8, %v1563_v13, %v1144_v27  ;;  %v4251_v27 = vld [vmem:[#allocation3_spill] sm:$0xff] }
 0x361   : > { %v1629_v36 = vsel %vm1627_vm9, %v1596_v1, %v1240_v18  ;;  %v1430_v24 = vsel %vm1429_vm3, %v4251_v27, %v2099_v23 }
 0x362   : > { %v886_v50 = vpop.permute.xlu1 %885  ;;  %v1662_v7 = vsel %vm1660_vm11, %v1629_v36, %v1336_v52  ;;  %v1463_v56 = vsel %vm1462_vm4, %v1430_v24, %v2120_v5 }
 0x363   : > { %v1512_v9 = vsel %vm1495_vm5, %v1479_v37, %v886_v50  ;;  %v1496_v2 = vsel %vm1495_vm5, %v1463_v56, %v854_v34 }
 0x364   : > { %v1529_v46 = vsel %vm1528_vm6, %v1496_v2, %v950_v3 }
 0x366   : > { %v1272_v26 = vpop.permute.xlu1 %1271 }
 0x367   : > { %v1645_v6 = vsel %vm1627_vm9, %v1612_v54, %v1272_v26 }
 0x36a   : > { %v982_v45 = vpop.permute.xlu1 %981 }
 0x36b   : > { %v1545_v48 = vsel %vm1528_vm6, %v1512_v9, %v982_v45 }
 0x36e   : > { %v1368_v38 = vpop.permute.xlu1 %1367 }
 0x36f   : > { %v1678_v10 = vsel %vm1660_vm11, %v1645_v6, %v1368_v38 }
 0x370   : > { %2073 = vmatprep.subr.msk.mxu0 %vm1693_vm10, %v1678_v10 }
 0x371   : > { %2074 = vmatpush3.xpose.msk.msra.mxu0 %vm1693_vm10, %v1662_v7 }
 0x372   : > { %v1078_v59 = vpop.permute.xlu1 %1077 }
 0x373   : > { %v1578_v21 = vsel %vm1561_vm7, %v1545_v48, %v1078_v59 }
 0x374   : > { %v1611_v51 = vsel %vm1594_vm8, %v1578_v21, %v1174_v28 }
 0x375   : > { %v1644_v53 = vsel %vm1627_vm9, %v1611_v51, %v1270_v44 }
 0x376   : > { %v1046_v30 = vpop.permute.xlu1 %1045  ;;  %v1677_v22 = vsel %vm1660_vm11, %v1644_v53, %v1366_v63 }
 0x377   : > { %2075 = vmatprep.subr.msk.mxu0 %vm1693_vm10, %v1677_v22  ;;  %v1562_v41 = vsel %vm1561_vm7, %v1529_v46, %v1046_v30 }
 0x37a   : > { %v1142_v32 = vpop.permute.xlu1 %1141 }
 0x37b   : > { %v1595_v19 = vsel %vm1594_vm8, %v1562_v41, %v1142_v32 }
 0x37e   : > { %v1238_v12 = vpop.permute.xlu1 %1237 }
 0x37f   : > { %v1628_v18 = vsel %vm1627_vm9, %v1595_v19, %v1238_v12 }
 0x382   : > { %v1334_v29 = vpop.permute.xlu1 %1333 }
 0x383   : > { %v1661_v58 = vsel %vm1660_vm11, %v1628_v18, %v1334_v29 }
 0x384   : > { %2076 = vmatpush3.xpose.msk.msra.mxu0 %vm1693_vm10, %v1661_v58 }
 0x387   : > { %2078 = vmatmul.mubr.msk.f32.vlgmr.msra.gmra.mxu0 %vm1693_vm10, %v3778_v39 }
 0x447   : > { %v1859_v34 = vpop.f32.mrf.mxu0 }
 0x448   : > { %1864 = vst [vmem:[%s210_s8] sm:$0xff] %v1859_v34 }
 0x449   : > { %v1861_v42 = vpop.f32.mrf.mxu0 }
 0x44a   : > { %1865 = vst [vmem:[%s210_s8 + $0x8] sm:$0xff] %v1861_v42  ;;  %v1866_v47 = vadd.f32 %v1861_v42, %v1859_v34 }
 0x44c   : > { %1867 = vadd.xlane.f32.xlu0 %v1866_v47 }
 0x4d5   : > { %v1868_v4 = vpop.xlane.xlu0 %1867 }
 0x4d6   : > { %v1869_v11 = vmul.f32 0.00390625, %v1868_v4  ;;  %1878 = vst.msk [vmem:[%s214_s11] sm:$0xff] %vm1877_vm12, %v1868_v4 }
 0x4d8   : > { %v1870_v39 = vsub.f32 %v1859_v34, %v1869_v11  ;;  %v1871_v3 = vsub.f32 %v1861_v42, %v1869_v11 }
 0x4da   : > { %v1872_v61 = vmul.f32 %v1870_v39, %v1870_v39  ;;  %v1873_v8 = vmul.f32 %v1871_v3, %v1871_v3 }
 0x4dc   : > { %v1874_v55 = vadd.f32 %v1873_v8, %v1872_v61 }
 0x4de   : > { %1875 = vadd.xlane.f32.xlu1 %v1874_v55 }
 0x567   : > { %v1876_v40 = vpop.xlane.xlu1 %1875 }
 0x568   : > { %1879 = vst.msk [vmem:[%s218_s14] sm:$0xff] %vm1877_vm12, %v1876_v40 }
 0x569 PF: > { %s15_s15 = sadd.s32 1, %s2128_s15  }
 0x56a   : > { %p12_p4 = scmp.ge.s32.totalorder %s15_s15, 4  }
 0x56c   :  { %14 = sbr.rel (!%p12_p4) target bundleno = 1 (0x1), region = 82 }

// kernel: double_conv_forward.4
= control target key start
LH: loop header
LB: loop body
LE: loop exit
PB: predicated region body
PF: predicated region fallthrough
CT: control target
= control target key end

     0   :  { %s2246_s21 = smov 0   ;;  %s4057_s0 = inlined_call_operand.vmem [shape: f32[2,8,256], index: 0, kind: input, shape index: {}]   ;;  %s4058_s1 = inlined_call_operand.vmem [shape: f32[8,1], index: 1, kind: input, shape index: {}]   ;;  %s4059_s2 = inlined_call_operand.vmem [shape: f32[8,1], index: 2, kind: input, shape index: {}]   ;;  %s4060_s3 = inlined_call_operand.vmem [shape: f32[8,72], index: 3, kind: input, shape index: {}]   ;;  %s4061_s4 = inlined_call_operand.vmem [shape: f32[2,8,256], index: 4, kind: output, shape index: {0}]   ;;  %s4062_s5 = inlined_call_operand.vmem [shape: f32[2,8,1], index: 5, kind: output, shape index: {1}]   ;;  %s4063_s6 = inlined_call_operand.vmem [shape: f32[2,8,1], index: 6, kind: output, shape index: {2}]  }
   0x1 LB: > { %s2067_s22 = sadd.s32 4294967295, %s2199_s21   ;;  %p2071_p0 = scmp.ge.s32.totalorder %s2199_s21, 1  ;;  %s2199_s21 = sphi %s2246_s21, %s17_s21  }
   0x2   : > { %p217_p1 = scmp.lt.s32.totalorder %s2199_s21, 3 }
   0x4   : > { %p218_p2 = pnand %p2071_p0, %p217_p1 }
   0x6   : > { %221 = sbr.rel (%p218_p2) target bundleno = 1503 (0x5df), region = 36 }
   0xb   : > { %v275_v0 = vld [vmem:[%s4058_s1] sm:$0xff]  ;;  %vm391_vm0 = vcmask 1040384   ;;  %v2201_v1 = vmov 0   ;;  %v2202_v2 = vmov 0.0   ;;  %vm557_vm1 = vcmask 1046528   ;;  %s2203_s27 = smov 48  }
   0xc   : > { %2167 = vset.pattern.permute.xlu0 %v2201_v1  ;;  %v2257_v3 = vrot.slane %v2202_v2, 7  ;;  %vm638_vm2 = vcmask 1045504   ;;  %v283_v4 = vld [vmem:[%s4059_s2] sm:$0xff]  ;;  %s2204_s28 = smov 56   ;;  %s2205_s29 = smov 64   ;;  %vm1499_vm3 = vcmask 64512  }
   0xd   : > { %278 = vperm.xlu0 %2167, %v275_v0   ;;  %p255_p3 = scmp.lt.s32.totalorder %s2067_s22, 1  ;;  %s2206_s10 = smov 8   ;;  %vm1532_vm4 = vcmask 130048   ;;  %vm1565_vm5 = vcmask 195584   ;;  %vm1598_vm6 = vcmask 261120   ;;  %vm1631_vm7 = vcmask 326656  }
   0xe   : > { %4155 = vst [vmem:[#allocation2_spill] sm:$0xff] %v2257_v3  ;;  %v2264_v5 = vsel %vm391_vm0, 0.0, %v2257_v3  ;;  %v508_v6 = vsel %vm391_vm0, %v2257_v3, 0.0  ;;  %v559_v7 = vrot.slane %v2257_v3, 1  ;;  %v640_v8 = vrot.slane %v2257_v3, 2  ;;  %s2207_s11 = smov 16  }
   0xf   : > { %4156 = vst [vmem:[#allocation3_spill] sm:$0xff] %v2264_v5  ;;  %v2173_v9 = vpack.i.bf16 %v2264_v5, %v2257_v3  ;;  %v558_v10 = vrot.slane %v2264_v5, 1  ;;  %v561_v11 = vrot.slane %v508_v6, 1  ;;  %v639_v12 = vrot.slane %v2264_v5, 2  ;;  %s4420_s22 = smov (!%p255_p3, %s2067_s22), 1  ;;  %s2208_s12 = smov 24  }
  0x10   : > { %v642_v13 = vrot.slane %v508_v6, 2  ;;  %s2113_s30 = sshll.u32 %s4420_s22, 4  ;;  %s2209_s13 = smov 32   ;;  %vm1664_vm8 = vcmask 392192   ;;  %vm1697_vm9 = vcmask 457728   ;;  %vm1763_vm10 = vcmask 588800  }
  0x11   : > { %286 = vperm.xlu0 %2167, %v283_v4   ;;  %2174 = vrot.lane.b32.xlu1 %v2173_v9, %s2203_s27  ;;  %v560_v14 = vsel %vm557_vm1, %v558_v10, %v559_v7  ;;  %v562_v15 = vsel %vm557_vm1, %v559_v7, %v561_v11  ;;  %v641_v17 = vsel %vm638_vm2, %v639_v12, %v640_v8  ;;  %s259_s9 = scalar_lea.vmem %s4057_s0, %s2113_s30  ;;  %s2210_s14 = smov 40   ;;  %vm1730_vm11 = vcmask 523264  }
  0x12   : > { %v2178_v16 = vpack.i.bf16 %v560_v14, %v562_v15  ;;  %v643_v18 = vsel %vm638_vm2, %v640_v8, %v642_v13  ;;  %v273_v21 = vld [vmem:[%s259_s9] sm:$0xff]  ;;  %v274_v26 = vld [vmem:[%s259_s9 + $0x8] sm:$0xff]  ;;  %v2168_v29 = vpack.i.bf16 %v562_v15, %v560_v14  ;;  %s264_s19 = scalar_lea.vmem %s4061_s4, %s2113_s30  ;;  %s2076_s20 = sshll.u32 %s4420_s22, 3  ;;  %vm1947_vm12 = vcmask 7168  }
  0x13   : > { %v2279_v19 = vpack.i.bf16 %v641_v17, %v643_v18  ;;  %s268_s25 = scalar_lea.vmem %s4062_s5, %s2076_s20 }
  0x15   : > { %4157 = vst [vmem:[#allocation4_spill] sm:$0xff] %v2279_v19  ;;  %2179 = vrot.lane.b32.xlu1 %v2178_v16, %s2204_s28  ;;  %2169 = vrot.lane.b32.xlu0 %v2168_v29, %s2206_s10 }
  0x19   : > { %2184 = vrot.lane.b32.xlu1 %v2279_v19, %s2205_s29 }
  0x83   : > { %v2297_v31 = vpop.permute.xlu1 %2174 }
  0x84   : > { %4158 = vst [vmem:[#allocation5_spill] sm:$0xff] %v2297_v31 }
  0x87   : > { %v2299_v32 = vpop.permute.xlu1 %2179 }
  0x88   : > { %v279_v20 = vpop.permute.xlu0 %278  ;;  %4159 = vst [vmem:[#allocation6_spill] sm:$0xff] %v2299_v32 }
  0x89   : > { %v281_v22 = vmul.f32 %v279_v20, %v273_v21  ;;  %v282_v27 = vmul.f32 %v279_v20, %v274_v26 }
  0x8b   : > { %v2301_v33 = vpop.permute.xlu1 %2184 }
  0x8c   : > { %v287_v23 = vpop.permute.xlu0 %286  ;;  %4160 = vst [vmem:[#allocation7_spill] sm:$0xff] %v2301_v33 }
  0x8d   : > { %v289_v24 = vadd.f32 %v287_v23, %v281_v22  ;;  %v290_v28 = vadd.f32 %v287_v23, %v282_v27 }
  0x8f   : > { %v291_v25 = vmax.f32 %v289_v24, 0.0  ;;  %v292_v30 = vmax.f32 %v290_v28, 0.0 }
  0x91   : > { %294 = vxpose.xlu1.b32.start.end [1/1] (short) %v291_v25, 128 }
  0xce   : > { %326 = vxpose.xlu1.b32.start.end [1/1] (short) %v292_v30, 128 }
 0x10d   : > { %v310_v34 = vpop.trf.xlu1 }
 0x10e   : > { %v394_v53 = vrot.slane %v310_v34, 7 }
 0x110   : > { %v2338_v58 = vsel %vm391_vm0, 0.0, %v394_v53 }
 0x111   : > { %v311_v35 = vpop.trf.xlu1  ;;  %4163 = vst [vmem:[#allocation10_spill] sm:$0xff] %v2338_v58  ;;  %v563_v2 = vrot.slane %v2338_v58, 1 }
 0x112   : > { %v395_v50 = vrot.slane %v311_v35, 7 }
 0x114   : > { %v2333_v55 = vsel %vm391_vm0, %v394_v53, %v395_v50  ;;  %v2346_v62 = vsel %vm391_vm0, %v395_v50, 0.0 }
 0x115   : > { %v2303_v36 = vpop.trf.xlu1  ;;  %4162 = vst [vmem:[#allocation9_spill] sm:$0xff] %v2333_v55  ;;  %v564_v61 = vrot.slane %v2333_v55, 1  ;;  %v566_v7 = vrot.slane %v2346_v62, 1 }
 0x116   : > { %v397_v28 = vrot.slane %v2303_v36, 7 }
 0x117   : > { %v2362_v9 = vsel %vm557_vm1, %v563_v2, %v564_v61  ;;  %v2384_v16 = vsel %vm557_vm1, %v564_v61, %v566_v7 }
 0x118   : > { %4166 = vst [vmem:[#allocation13_spill] sm:$0xff] %v2362_v9  ;;  %4169 = vst [vmem:[#allocation16_spill] sm:$0xff] %v2384_v16 }
 0x119   : > { %v2305_v37 = vpop.trf.xlu1 }
 0x11a   : > { %v398_v25 = vrot.slane %v2305_v37, 7 }
 0x11c   : > { %v2420_v35 = vsel %vm391_vm0, %v397_v28, %v398_v25 }
 0x11d   : > { %v2307_v38 = vpop.trf.xlu1  ;;  %4172 = vst [vmem:[#allocation19_spill] sm:$0xff] %v2420_v35  ;;  %v569_v50 = vrot.slane %v2420_v35, 1 }
 0x121   : > { %v2309_v39 = vpop.trf.xlu1 }
 0x125   : > { %v2311_v40 = vpop.trf.xlu1 }
 0x129   : > { %v2313_v41 = vpop.trf.xlu1 }
 0x12a   : > { %v404_v5 = vrot.slane %v2313_v41, 7 }
 0x12d   : > { %v2315_v42 = vpop.trf.xlu1 }
 0x12e   : > { %v4066_v12 = vrot.slane %v2315_v42, 7  ;;  %v4194_v19 = vrot.slane %v2315_v42, 7 }
 0x131   : > { %v319_v43 = vpop.trf.xlu1 }
 0x132   : > { %v407_v8 = vrot.slane %v319_v43, 7  ;;  %v2430_v43 = vsel %vm391_vm0, 0.0, %v397_v28  ;;  %v400_v28 = vrot.slane %v2307_v38, 7 }
 0x134   : > { %v2376_v14 = vsel %vm391_vm0, %v4066_v12, %v407_v8  ;;  %v2379_v15 = vsel %vm391_vm0, %v407_v8, 0.0 }
 0x135   : > { %v2317_v44 = vpop.trf.xlu1  ;;  %4168 = vst [vmem:[#allocation15_spill] sm:$0xff] %v2376_v14  ;;  %v667_v20 = vrot.slane %v2379_v15, 2  ;;  %v4064_v22 = vrot.slane %v2376_v14, 2 }
 0x136   : > { %v409_v27 = vrot.slane %v2317_v44, 7 }
 0x137   : > { %v2409_v29 = vsel %vm638_vm2, %v4064_v22, %v667_v20 }
 0x138   : > { %v2427_v37 = vsel %vm391_vm0, 0.0, %v409_v27 }
 0x139   : > { %v2319_v45 = vpop.trf.xlu1  ;;  %4173 = vst [vmem:[#allocation20_spill] sm:$0xff] %v2427_v37 }
 0x13a   : > { %v410_v23 = vrot.slane %v2319_v45, 7 }
 0x13c   : > { %v2417_v34 = vsel %vm391_vm0, %v409_v27, %v410_v23  ;;  %v514_v45 = vsel %vm391_vm0, %v410_v23, 0.0 }
 0x13d   : > { %v2321_v46 = vpop.trf.xlu1  ;;  %v670_v44 = vrot.slane %v2417_v34, 2  ;;  %v591_v61 = vrot.slane %v514_v45, 1 }
 0x141   : > { %v2323_v47 = vpop.trf.xlu1 }
 0x142   : > { %v413_v3 = vrot.slane %v2323_v47, 7 }
 0x145   : > { %v2325_v48 = vpop.trf.xlu1 }
 0x149   : > { %v2327_v49 = vpop.trf.xlu1 }
 0x14d   : > { %v342_v51 = vpop.trf.xlu1 }
 0x14e   : > { %v418_v52 = vrot.slane %v342_v51, 7  ;;  %v2438_v51 = vsel %vm391_vm0, %v398_v25, 0.0 }
 0x14f   : > { %v571_v2 = vrot.slane %v2438_v51, 1 }
 0x150   : > { %v2330_v54 = vsel %vm391_vm0, 0.0, %v418_v52 }
 0x151   : > { %4161 = vst [vmem:[#allocation8_spill] sm:$0xff] %v2330_v54  ;;  %1239 = vrot.lane.b32.xlu0 %v2330_v54, %s2203_s27  ;;  %v343_v56 = vpop.trf.xlu1  ;;  %v603_v11 = vrot.slane %v2330_v54, 1  ;;  %v684_v18 = vrot.slane %v2330_v54, 2 }
 0x152   : > { %v419_v57 = vrot.slane %v343_v56, 7 }
 0x154   : > { %v517_v59 = vsel %vm391_vm0, %v419_v57, 0.0  ;;  %v2342_v60 = vsel %vm391_vm0, %v418_v52, %v419_v57  ;;  %v669_v57 = vrot.slane %v2427_v37, 2 }
 0x155   : > { %4164 = vst [vmem:[#allocation11_spill] sm:$0xff] %v2342_v60  ;;  %v687_v63 = vrot.slane %v517_v59, 2  ;;  %1241 = vrot.lane.b32.xlu0 %v2342_v60, %s2203_s27  ;;  %v2350_v0 = vpop.trf.xlu1  ;;  %v685_v1 = vrot.slane %v2342_v60, 2  ;;  %v604_v6 = vrot.slane %v2342_v60, 1  ;;  %v606_v24 = vrot.slane %v517_v59, 1 }
 0x156   : > { %v421_v52 = vrot.slane %v2350_v0, 7  ;;  %v568_v59 = vrot.slane %v2430_v43, 1  ;;  %v515_v60 = vsel %vm391_vm0, %v413_v3, 0.0 }
 0x157   : > { %v2355_v4 = vsel %vm638_vm2, %v685_v1, %v687_v63  ;;  %v2371_v13 = vsel %vm557_vm1, %v603_v11, %v604_v6  ;;  %v2393_v21 = vsel %vm638_vm2, %v684_v18, %v685_v1  ;;  %v2414_v30 = vsel %vm557_vm1, %v604_v6, %v606_v24 }
 0x158   : > { %4165 = vst [vmem:[#allocation12_spill] sm:$0xff] %v2355_v4  ;;  %1433 = vrot.lane.b32.xlu1 %v2355_v4, %s2205_s29  ;;  %4167 = vst [vmem:[#allocation14_spill] sm:$0xff] %v2371_v13  ;;  %v2449_v63 = vsel %vm638_vm2, %v669_v57, %v670_v44  ;;  %v4065_v1 = vrot.slane %v2417_v34, 1  ;;  %v2456_v0 = vsel %vm557_vm1, %v568_v59, %v569_v50  ;;  %v2459_v6 = vsel %vm391_vm0, 0.0, %v421_v52 }
 0x159   : > { %735 = vrot.lane.b32.xlu0 %v2362_v9, %s2206_s10  ;;  %v2366_v10 = vpop.trf.xlu1  ;;  %4170 = vst [vmem:[#allocation17_spill] sm:$0xff] %v2393_v21  ;;  %4171 = vst [vmem:[#allocation18_spill] sm:$0xff] %v2414_v30  ;;  %v2476_v18 = vsel %vm557_vm1, %v569_v50, %v571_v2  ;;  %v608_v20 = vrot.slane %v2459_v6, 1  ;;  %v401_v24 = vrot.slane %v2309_v39, 7 }
 0x15a   : > { %v422_v53 = vrot.slane %v2366_v10, 7  ;;  %4174 = vst [vmem:[#allocation21_spill] sm:$0xff] %v2456_v0  ;;  %4175 = vst [vmem:[#allocation22_spill] sm:$0xff] %v2459_v6  ;;  %v672_v10 = vrot.slane %v514_v45, 2  ;;  %v2471_v11 = vsel %vm557_vm1, %v4065_v1, %v591_v61  ;;  %v412_v45 = vrot.slane %v2321_v46, 7 }
 0x15b   : > { %4177 = vst [vmem:[#allocation24_spill] sm:$0xff] %v2476_v18  ;;  %v2507_v46 = vsel %vm391_vm0, 0.0, %v400_v28  ;;  %v2519_v61 = vsel %vm391_vm0, %v401_v24, 0.0 }
 0x15c   : > { %1335 = vrot.lane.b32.xlu1 %v2371_v13, %s2204_s28  ;;  %v2462_v7 = vsel %vm391_vm0, %v421_v52, %v422_v53  ;;  %v2482_v25 = vsel %vm391_vm0, %v422_v53, 0.0  ;;  %v2491_v50 = vsel %vm638_vm2, %v670_v44, %v672_v10  ;;  %v2500_v53 = vsel %vm391_vm0, %v400_v28, %v401_v24  ;;  %4180 = vst [vmem:[#allocation27_spill] sm:$0xff] %v2507_v46 }
 0x15d   : > { %737 = vrot.lane.b32.xlu0 %v2384_v16, %s2206_s10  ;;  %v2388_v17 = vpop.trf.xlu1  ;;  %4176 = vst [vmem:[#allocation23_spill] sm:$0xff] %v2462_v7  ;;  %v609_v23 = vrot.slane %v2462_v7, 1  ;;  %4178 = vst [vmem:[#allocation25_spill] sm:$0xff] %v2482_v25  ;;  %v611_v52 = vrot.slane %v2482_v25, 1  ;;  %v2510_v44 = vsel %vm391_vm0, 0.0, %v412_v45  ;;  %v574_v59 = vrot.slane %v2500_v53, 1 }
 0x15e   : > { %v424_v2 = vrot.slane %v2388_v17, 7  ;;  %v573_v28 = vrot.slane %v2507_v46, 1  ;;  %v576_v22 = vrot.slane %v2519_v61, 1 }
 0x15f   : > { %v2497_v39 = vsel %vm557_vm1, %v608_v20, %v609_v23  ;;  %v2515_v57 = vsel %vm557_vm1, %v609_v23, %v611_v52 }
 0x160   : > { %1431 = vrot.lane.b32.xlu1 %v2393_v21, %s2205_s29  ;;  %4179 = vst [vmem:[#allocation26_spill] sm:$0xff] %v2497_v39  ;;  %4181 = vst [vmem:[#allocation28_spill] sm:$0xff] %v2515_v57  ;;  %v2530_v23 = vsel %vm557_vm1, %v573_v28, %v574_v59  ;;  %v2533_v52 = vsel %vm391_vm0, 0.0, %v424_v2  ;;  %v2544_v1 = vsel %vm557_vm1, %v574_v59, %v576_v22  ;;  %v403_v22 = vrot.slane %v2311_v40, 7 }
 0x161   : > { %767 = vrot.lane.b32.xlu0 %v2371_v13, %s2206_s10  ;;  %v2402_v26 = vpop.trf.xlu1  ;;  %4182 = vst [vmem:[#allocation29_spill] sm:$0xff] %v2530_v23  ;;  %4183 = vst [vmem:[#allocation30_spill] sm:$0xff] %v2533_v52  ;;  %v613_v12 = vrot.slane %v2533_v52, 1  ;;  %v2579_v40 = vsel %vm391_vm0, %v412_v45, %v413_v3 }
 0x162   : > { %v425_v10 = vrot.slane %v2402_v26, 7  ;;  %4189 = vst [vmem:[#allocation35_spill] sm:$0xff] %v2579_v40 }
 0x164   : > { %849 = vrot.lane.b32.xlu1 %v2409_v29, %s2207_s11  ;;  %v2536_v24 = vsel %vm391_vm0, %v424_v2, %v425_v10  ;;  %v2551_v2 = vsel %vm391_vm0, %v425_v10, 0.0  ;;  %v2571_v10 = vsel %vm391_vm0, %v403_v22, %v404_v5 }
 0x165   : > { %769 = vrot.lane.b32.xlu0 %v2414_v30, %s2206_s10  ;;  %v2424_v36 = vpop.trf.xlu1  ;;  %4184 = vst [vmem:[#allocation31_spill] sm:$0xff] %v2536_v24  ;;  %v614_v28 = vrot.slane %v2536_v24, 1  ;;  %4185 = vst [vmem:[#allocation32_spill] sm:$0xff] %v2551_v2  ;;  %v616_v59 = vrot.slane %v2551_v2, 1  ;;  %v579_v21 = vrot.slane %v2571_v10, 1 }
 0x166   : > { %4188 = vst [vmem:[#allocation34_spill] sm:$0xff] %v2571_v10  ;;  %v427_v6 = vrot.slane %v2424_v36, 7 }
 0x167   : > { %v2588_v4 = vsel %vm557_vm1, %v614_v28, %v616_v59 }
 0x168   : > { %945 = vrot.lane.b32.xlu1 %v2417_v34, %s2208_s12  ;;  %4191 = vst [vmem:[#allocation37_spill] sm:$0xff] %v2588_v4 }
 0x169   : > { %1337 = vrot.lane.b32.xlu0 %v2414_v30, %s2204_s28  ;;  %v2444_v56 = vpop.trf.xlu1  ;;  %v2561_v30 = vsel %vm557_vm1, %v613_v12, %v614_v28  ;;  %v2582_v12 = vsel %vm391_vm0, 0.0, %v403_v22  ;;  %v677_v28 = vrot.slane %v515_v60, 2  ;;  %v675_v22 = vrot.slane %v2579_v40, 2 }
 0x16a   : > { %4186 = vst [vmem:[#allocation33_spill] sm:$0xff] %v2561_v30  ;;  %4190 = vst [vmem:[#allocation36_spill] sm:$0xff] %v2582_v12  ;;  %v428_v3 = vrot.slane %v2444_v56, 7  ;;  %v2608_v56 = vsel %vm391_vm0, 0.0, %v427_v6 }
 0x16b   : > { %4192 = vst [vmem:[#allocation38_spill] sm:$0xff] %v2608_v56 }
 0x16c   : > { %851 = vrot.lane.b32.xlu1 %v2449_v63, %s2207_s11  ;;  %v2629_v7 = vsel %vm391_vm0, %v428_v3, 0.0 }
 0x16d   : > { %739 = vrot.lane.b32.xlu0 %v2456_v0, %s2206_s10  ;;  %v2466_v8 = vpop.trf.xlu1  ;;  %v2656_v0 = vsel %vm391_vm0, 0.0, %v4194_v19 }
 0x16e   : > { %4195 = vst [vmem:[#allocation40_spill] sm:$0xff] %v2656_v0  ;;  %v430_v52 = vrot.slane %v2466_v8, 7  ;;  %v583_v19 = vrot.slane %v2656_v0, 1  ;;  %v416_v8 = vrot.slane %v2327_v49, 7 }
 0x170   : > { %1041 = vrot.lane.b32.xlu1 %v2471_v11, %s2209_s13 }
 0x171   : > { %741 = vrot.lane.b32.xlu0 %v2476_v18, %s2206_s10  ;;  %v2486_v27 = vpop.trf.xlu1 }
 0x172   : > { %v431_v58 = vrot.slane %v2486_v27, 7  ;;  %v2685_v27 = vsel %vm391_vm0, 0.0, %v430_v52 }
 0x173   : > { %4197 = vst [vmem:[#allocation42_spill] sm:$0xff] %v2685_v27  ;;  %v623_v49 = vrot.slane %v2685_v27, 1 }
 0x174   : > { %1137 = vrot.lane.b32.xlu1 %v2491_v50, %s2210_s14 }
 0x175   : > { %771 = vrot.lane.b32.xlu0 %v2497_v39, %s2206_s10  ;;  %v2504_v38 = vpop.trf.xlu1  ;;  %v596_v39 = vrot.slane %v515_v60, 1 }
 0x178   : > { %947 = vrot.lane.b32.xlu1 %v2510_v44, %s2208_s12 }
 0x179   : > { %773 = vrot.lane.b32.xlu0 %v2515_v57, %s2206_s10  ;;  %v2525_v20 = vpop.trf.xlu1  ;;  %v2611_v57 = vsel %vm391_vm0, %v427_v6, %v428_v3 }
 0x17a   : > { %v619_v54 = vrot.slane %v2611_v57, 1 }
 0x17d   : > { %743 = vrot.lane.b32.xlu0 %v2530_v23, %s2206_s10  ;;  %v2540_v17 = vpop.trf.xlu1 }
 0x17e   : > { %v4187_v41 = vrot.slane %v2540_v17, 7 }
 0x181   : > { %745 = vrot.lane.b32.xlu0 %v2544_v1, %s2206_s10  ;;  %v2555_v9 = vpop.trf.xlu1 }
 0x182   : > { %v4073_v26 = vrot.slane %v2555_v9, 7 }
 0x184   : > { %v2568_v47 = vsel %vm391_vm0, %v4187_v41, %v4073_v26  ;;  %v2585_v41 = vsel %vm391_vm0, %v404_v5, 0.0  ;;  %v578_v5 = vrot.slane %v2582_v12, 1 }
 0x185   : > { %775 = vrot.lane.b32.xlu0 %v2561_v30, %s2206_s10  ;;  %981 = vrot.lane.b32.xlu1 %v2568_v47, %s2208_s12  ;;  %v356_v26 = vpop.trf.xlu1  ;;  %v594_v30 = vrot.slane %v2579_v40, 1  ;;  %v581_v45 = vrot.slane %v2585_v41, 1 }
 0x186   : > { %v2602_v13 = vsel %vm557_vm1, %v578_v5, %v579_v21  ;;  %v2621_v5 = vsel %vm638_vm2, %v675_v22, %v677_v28  ;;  %v439_v16 = vrot.slane %v356_v26, 7  ;;  %v621_v26 = vrot.slane %v2629_v7, 1 }
 0x187   : > { %v2605_v36 = vsel %vm557_vm1, %v594_v30, %v596_v39  ;;  %v618_v39 = vrot.slane %v2608_v56, 1 }
 0x188   : > { %v2676_v42 = vsel %vm391_vm0, 0.0, %v439_v16 }
 0x189   : > { %777 = vrot.lane.b32.xlu0 %v2588_v4, %s2206_s10  ;;  %949 = vrot.lane.b32.xlu1 %v2579_v40, %s2208_s12  ;;  %v357_v59 = vpop.trf.xlu1  ;;  %v2618_v4 = vsel %vm557_vm1, %v579_v21, %v581_v45  ;;  %v593_v21 = vrot.slane %v2510_v44, 1 }
 0x18a   : > { %v440_v60 = vrot.slane %v357_v59, 7  ;;  %v2642_v59 = vsel %vm557_vm1, %v618_v39, %v619_v54 }
 0x18b   : > { %4193 = vst [vmem:[#allocation39_spill] sm:$0xff] %v2642_v59  ;;  %v2645_v3 = vsel %vm557_vm1, %v593_v21, %v594_v30  ;;  %v2662_v30 = vsel %vm557_vm1, %v619_v54, %v621_v26  ;;  %v586_v54 = vrot.slane %v2379_v15, 1  ;;  %v2688_v26 = vsel %vm391_vm0, %v430_v52, %v431_v58 }
 0x18c   : > { %v2626_v6 = vsel %vm391_vm0, %v440_v60, 0.0  ;;  %v2637_v45 = vsel %vm391_vm0, %v439_v16, %v440_v60  ;;  %v674_v60 = vrot.slane %v2510_v44, 2  ;;  %4196 = vst [vmem:[#allocation41_spill] sm:$0xff] %v2662_v30  ;;  %4198 = vst [vmem:[#allocation43_spill] sm:$0xff] %v2688_v26  ;;  %v624_v16 = vrot.slane %v2688_v26, 1 }
 0x18d   : > { %747 = vrot.lane.b32.xlu0 %v2602_v13, %s2206_s10  ;;  %1045 = vrot.lane.b32.xlu1 %v2605_v36, %s2209_s13  ;;  %v724_v28 = vrot.slane %v2626_v6, 1  ;;  %v722_v25 = vrot.slane %v2637_v45, 1 }
 0x18e   : > { %v2665_v21 = vsel %vm638_vm2, %v674_v60, %v675_v22  ;;  %v415_v22 = vrot.slane %v2325_v48, 7  ;;  %v521_v60 = vsel %vm391_vm0, %v431_v58, 0.0  ;;  %v721_v58 = vrot.slane %v2676_v42, 1 }
 0x18f   : > { %v2659_v39 = vsel %vm557_vm1, %v722_v25, %v724_v28  ;;  %v707_v33 = vrot.slane %v521_v60, 2 }
 0x190   : > { %v2695_v15 = vsel %vm391_vm0, 0.0, %v415_v22  ;;  %v2708_v52 = vsel %vm391_vm0, %v415_v22, %v416_v8  ;;  %v2729_v31 = vsel %vm557_vm1, %v721_v58, %v722_v25 }
 0x191   : > { %749 = vrot.lane.b32.xlu0 %v2618_v4, %s2206_s10  ;;  %1141 = vrot.lane.b32.xlu1 %v2621_v5, %s2210_s14  ;;  %4199 = vst [vmem:[#allocation44_spill] sm:$0xff] %v2695_v15  ;;  %4200 = vst [vmem:[#allocation45_spill] sm:$0xff] %v2708_v52  ;;  %v680_v25 = vrot.slane %v2708_v52, 2  ;;  %v679_v58 = vrot.slane %v2695_v15, 2 }
 0x195   : > { %779 = vrot.lane.b32.xlu0 %v2642_v59, %s2206_s10  ;;  %1043 = vrot.lane.b32.xlu1 %v2645_v3, %s2209_s13  ;;  %v584_v59 = vrot.slane %v2376_v14, 1 }
 0x197   : > { %v2681_v28 = vsel %vm557_vm1, %v583_v19, %v584_v59  ;;  %v2698_v48 = vsel %vm557_vm1, %v584_v59, %v586_v54  ;;  %v626_v19 = vrot.slane %v521_v60, 1  ;;  %v599_v59 = vrot.slane %v2708_v52, 1 }
 0x198   : > { %v598_v54 = vrot.slane %v2695_v15, 1  ;;  %v704_v60 = vrot.slane %v2685_v27, 2 }
 0x199   : > { %781 = vrot.lane.b32.xlu0 %v2662_v30, %s2206_s10  ;;  %1139 = vrot.lane.b32.xlu1 %v2665_v21, %s2210_s14  ;;  %v2711_v30 = vsel %vm557_vm1, %v623_v49, %v624_v16  ;;  %v2721_v22 = vsel %vm557_vm1, %v624_v16, %v626_v19  ;;  %v705_v49 = vrot.slane %v2688_v26, 2  ;;  %v433_v16 = vrot.slane %v2504_v38, 7 }
 0x19a   : > { %4201 = vst [vmem:[#allocation46_spill] sm:$0xff] %v2711_v30  ;;  %4202 = vst [vmem:[#allocation47_spill] sm:$0xff] %v2721_v22  ;;  %v600_v32 = vsel %vm557_vm1, %v598_v54, %v599_v59  ;;  %v434_v19 = vrot.slane %v2525_v20, 7  ;;  %v2754_v38 = vsel %vm638_vm2, %v679_v58, %v680_v25  ;;  %v588_v20 = vrot.slane %v2427_v37, 1 }
 0x19b   : > { %v2732_v18 = vsel %vm638_vm2, %v705_v49, %v707_v33  ;;  %v2742_v54 = vsel %vm638_vm2, %v704_v60, %v705_v49  ;;  %v516_v33 = vsel %vm391_vm0, %v416_v8, 0.0  ;;  %4205 = vst [vmem:[#allocation50_spill] sm:$0xff] %v2754_v38  ;;  %v4206_v49 = vrot.slane %v2417_v34, 1 }
 0x19c   : > { %4203 = vst [vmem:[#allocation48_spill] sm:$0xff] %v2732_v18  ;;  %4204 = vst [vmem:[#allocation49_spill] sm:$0xff] %v2742_v54  ;;  %v601_v24 = vrot.slane %v516_v33, 1  ;;  %v2751_v2 = vsel %vm391_vm0, %v433_v16, %v434_v19  ;;  %v682_v8 = vrot.slane %v516_v33, 2  ;;  %v522_v58 = vsel %vm391_vm0, %v434_v19, 0.0 }
 0x19d   : > { %751 = vrot.lane.b32.xlu0 %v2681_v28, %s2206_s10  ;;  %983 = vrot.lane.b32.xlu1 %v2676_v42, %s2208_s12  ;;  %v2764_v60 = vsel %vm557_vm1, %v588_v20, %v4206_v49  ;;  %v629_v33 = vrot.slane %v2751_v2, 1  ;;  %v710_v20 = vrot.slane %v2751_v2, 2  ;;  %v2797_v49 = vsel %vm391_vm0, 0.0, %v433_v16 }
 0x19e   : > { %v2775_v27 = vsel %vm638_vm2, %v680_v25, %v682_v8 }
 0x19f   : > { %4207 = vst [vmem:[#allocation51_spill] sm:$0xff] %v2775_v27 }
 0x1a1   : > { %753 = vrot.lane.b32.xlu0 %v2698_v48, %s2206_s10  ;;  %1235 = vrot.lane.b32.xlu1 %v2695_v15, %s2203_s27 }
 0x1a5   : > { %783 = vrot.lane.b32.xlu0 %v2711_v30, %s2206_s10  ;;  %1237 = vrot.lane.b32.xlu1 %v2708_v52, %s2203_s27  ;;  %v631_v30 = vrot.slane %v522_v58, 1 }
 0x1a7   : > { %v2785_v19 = vsel %vm557_vm1, %v629_v33, %v631_v30  ;;  %v664_v30 = vrot.slane %v2656_v0, 2 }
 0x1a9   : > { %785 = vrot.lane.b32.xlu0 %v2721_v22, %s2206_s10  ;;  %763 = vrot.lane.b32.xlu1 %v600_v32, %s2206_s10 }
 0x1ad   : > { %881 = vrot.lane.b32.xlu0 %v2732_v18, %s2207_s11  ;;  %1079 = vrot.lane.b32.xlu1 %v2729_v31, %s2209_s13 }
 0x1b1   : > { %879 = vrot.lane.b32.xlu0 %v2742_v54, %s2207_s11  ;;  %1047 = vrot.lane.b32.xlu1 %v600_v32, %s2209_s13  ;;  %v2767_v54 = vsel %vm557_vm1, %v599_v59, %v601_v24  ;;  %v2782_v24 = vpop.permute.xlu0 %2169  ;;  %v712_v59 = vrot.slane %v522_v58, 2 }
 0x1b2   : > { %4208 = vst [vmem:[#allocation52_spill] sm:$0xff] %v2782_v24 }
 0x1b3   : > { %v2794_v8 = vsel %vm638_vm2, %v710_v20, %v712_v59  ;;  %v628_v59 = vrot.slane %v2797_v49, 1 }
 0x1b5   : > { %977 = vrot.lane.b32.xlu0 %v2751_v2, %s2208_s12  ;;  %1143 = vrot.lane.b32.xlu1 %v2754_v38, %s2210_s14 }
 0x1b9   : > { %755 = vrot.lane.b32.xlu0 %v2764_v60, %s2206_s10  ;;  %1333 = vrot.lane.b32.xlu1 %v2767_v54, %s2204_s28 }
 0x1bd   : > { %757 = vrot.lane.b32.xlu0 %v2471_v11, %s2206_s10  ;;  %1429 = vrot.lane.b32.xlu1 %v2775_v27, %s2205_s29 }
 0x1c1   : > { %789 = vrot.lane.b32.xlu0 %v2785_v19, %s2206_s10  ;;  %1331 = vrot.lane.b32.xlu1 %v600_v32, %s2204_s28  ;;  %v4211_v32 = vrot.slane %v2376_v14, 2 }
 0x1c3   : > { %v2791_v25 = vpop.permute.xlu0 %1239  ;;  %v2809_v24 = vsel %vm638_vm2, %v664_v30, %v4211_v32 }
 0x1c4   : > { %4209 = vst [vmem:[#allocation53_spill] sm:$0xff] %v2791_v25  ;;  %v2821_v25 = vsel %vm557_vm1, %v628_v59, %v629_v33 }
 0x1c5   : > { %885 = vrot.lane.b32.xlu0 %v2794_v8, %s2207_s11  ;;  %1427 = vrot.lane.b32.xlu1 %v2754_v38, %s2205_s29 }
 0x1c7   : > { %v2804_v58 = vpop.permute.xlu0 %1241 }
 0x1c8   : > { %4210 = vst [vmem:[#allocation54_spill] sm:$0xff] %v2804_v58  ;;  %v709_v58 = vrot.slane %v2797_v49, 2 }
 0x1c9   : > { %853 = vrot.lane.b32.xlu0 %v2491_v50, %s2207_s11  ;;  %847 = vrot.lane.b32.xlu1 %v2809_v24, %s2207_s11 }
 0x1ca   : > { %v2816_v16 = vpop.permute.xlu1 %1433  ;;  %v2833_v55 = vsel %vm638_vm2, %v709_v58, %v710_v20  ;;  %v4220_v58 = vrot.slane %v2540_v17, 7  ;;  %v4224_v17 = vrot.slane %v2555_v9, 7 }
 0x1cb   : > { %4212 = vst [vmem:[#allocation55_spill] sm:$0xff] %v2816_v16  ;;  %v2818_v38 = vpop.permute.xlu0 %735 }
 0x1cc   : > { %4213 = vst [vmem:[#allocation56_spill] sm:$0xff] %v2818_v38 }
 0x1cd   : > { %787 = vrot.lane.b32.xlu0 %v2821_v25, %s2206_s10  ;;  %1233 = vrot.lane.b32.xlu1 %v2579_v40, %s2203_s27 }
 0x1ce   : > { %v2828_v30 = vpop.permute.xlu1 %1335 }
 0x1cf   : > { %4214 = vst [vmem:[#allocation57_spill] sm:$0xff] %v2828_v30  ;;  %v2830_v32 = vpop.permute.xlu0 %737  ;;  %v660_v30 = vrot.slane %v2571_v10, 2 }
 0x1d0   : > { %4215 = vst [vmem:[#allocation58_spill] sm:$0xff] %v2830_v32 }
 0x1d1   : > { %883 = vrot.lane.b32.xlu0 %v2833_v55, %s2207_s11  ;;  %943 = vrot.lane.b32.xlu1 %v2427_v37, %s2208_s12 }
 0x1d2   : > { %v2839_v33 = vpop.permute.xlu1 %1431 }
 0x1d3   : > { %4216 = vst [vmem:[#allocation59_spill] sm:$0xff] %v2839_v33  ;;  %v2841_v59 = vpop.permute.xlu0 %767 }
 0x1d4   : > { %4217 = vst [vmem:[#allocation60_spill] sm:$0xff] %v2841_v59  ;;  %v2858_v59 = vsel %vm391_vm0, 0.0, %v4220_v58  ;;  %v523_v58 = vsel %vm391_vm0, %v4224_v17, 0.0 }
 0x1d5   : > { %1073 = vrot.lane.b32.xlu0 %v2785_v19, %s2209_s13  ;;  %1329 = vrot.lane.b32.xlu1 %v2605_v36, %s2204_s28 }
 0x1d6   : > { %v2847_v38 = vpop.permute.xlu1 %849 }
 0x1d7   : > { %4218 = vst [vmem:[#allocation61_spill] sm:$0xff] %v2847_v38  ;;  %v2849_v20 = vpop.permute.xlu0 %769  ;;  %v662_v38 = vrot.slane %v2585_v41, 2  ;;  %v634_v41 = vrot.slane %v2568_v47, 1 }
 0x1d8   : > { %4219 = vst [vmem:[#allocation62_spill] sm:$0xff] %v2849_v20 }
 0x1d9   : > { %1169 = vrot.lane.b32.xlu0 %v2794_v8, %s2210_s14  ;;  %1039 = vrot.lane.b32.xlu1 %v2764_v60, %s2209_s13 }
 0x1da   : > { %v2860_v32 = vpop.permute.xlu1 %945 }
 0x1db   : > { %4221 = vst [vmem:[#allocation63_spill] sm:$0xff] %v2860_v32  ;;  %v2862_v33 = vpop.permute.xlu0 %1337 }
 0x1dc   : > { %4222 = vst [vmem:[#allocation64_spill] sm:$0xff] %v2862_v33  ;;  %v636_v33 = vrot.slane %v523_v58, 1 }
 0x1dd   : > { %979 = vrot.lane.b32.xlu0 %v2858_v59, %s2208_s12  ;;  %1425 = vrot.lane.b32.xlu1 %v2621_v5, %s2205_s29 }
 0x1de   : > { %v2875_v16 = vpop.permute.xlu1 %851  ;;  %v2896_v40 = vsel %vm557_vm1, %v634_v41, %v636_v33 }
 0x1df   : > { %v2868_v20 = vpop.permute.xlu0 %739  ;;  %4225 = vst [vmem:[#allocation66_spill] sm:$0xff] %v2875_v16  ;;  %v717_v16 = vrot.slane %v523_v58, 2  ;;  %v633_v58 = vrot.slane %v2858_v59, 1 }
 0x1e0   : > { %4223 = vst [vmem:[#allocation65_spill] sm:$0xff] %v2868_v20  ;;  %v2884_v20 = vsel %vm638_vm2, %v660_v30, %v662_v38 }
 0x1e1   : > { %759 = vrot.lane.b32.xlu0 %v2645_v3, %s2206_s10  ;;  %1135 = vrot.lane.b32.xlu1 %v2449_v63, %s2210_s14 }
 0x1e2   : > { %v2891_v9 = vpop.permute.xlu1 %1041 }
 0x1e3   : > { %v2881_v32 = vpop.permute.xlu0 %741  ;;  %4227 = vst [vmem:[#allocation68_spill] sm:$0xff] %v2891_v9 }
 0x1e4   : > { %4226 = vst [vmem:[#allocation67_spill] sm:$0xff] %v2881_v32  ;;  %v715_v32 = vrot.slane %v2568_v47, 2 }
 0x1e5   : > { %761 = vrot.lane.b32.xlu0 %v2605_v36, %s2206_s10  ;;  %845 = vrot.lane.b32.xlu1 %v2884_v20, %s2207_s11 }
 0x1e6   : > { %v2906_v38 = vsel %vm638_vm2, %v715_v32, %v717_v16  ;;  %v2908_v9 = vpop.permute.xlu1 %1137 }
 0x1e7   : > { %v2893_v17 = vpop.permute.xlu0 %771  ;;  %4230 = vst [vmem:[#allocation71_spill] sm:$0xff] %v2908_v9  ;;  %v714_v9 = vrot.slane %v2858_v59, 2 }
 0x1e8   : > { %4228 = vst [vmem:[#allocation69_spill] sm:$0xff] %v2893_v17 }
 0x1e9   : > { %793 = vrot.lane.b32.xlu0 %v2896_v40, %s2206_s10  ;;  %1231 = vrot.lane.b32.xlu1 %v2510_v44, %s2203_s27 }
 0x1ea   : > { %v2921_v16 = vpop.permute.xlu1 %947 }
 0x1eb   : > { %v2903_v36 = vpop.permute.xlu0 %773  ;;  %4232 = vst [vmem:[#allocation73_spill] sm:$0xff] %v2921_v16 }
 0x1ec   : > { %4229 = vst [vmem:[#allocation70_spill] sm:$0xff] %v2903_v36  ;;  %v2926_v36 = vsel %vm557_vm1, %v633_v58, %v634_v41 }
 0x1ed   : > { %889 = vrot.lane.b32.xlu0 %v2906_v38, %s2207_s11  ;;  %941 = vrot.lane.b32.xlu1 %v2376_v14, %s2208_s12 }
 0x1ef   : > { %v2914_v33 = vpop.permute.xlu0 %743 }
 0x1f0   : > { %4231 = vst [vmem:[#allocation72_spill] sm:$0xff] %v2914_v33 }
 0x1f1   : > { %857 = vrot.lane.b32.xlu0 %v2621_v5, %s2207_s11  ;;  %1327 = vrot.lane.b32.xlu1 %v2645_v3, %s2204_s28  ;;  %v2938_v3 = vsel %vm638_vm2, %v714_v9, %v715_v32 }
 0x1f3   : > { %v2923_v17 = vpop.permute.xlu0 %745 }
 0x1f4   : > { %4233 = vst [vmem:[#allocation74_spill] sm:$0xff] %v2923_v17 }
 0x1f5   : > { %791 = vrot.lane.b32.xlu0 %v2926_v36, %s2206_s10  ;;  %1037 = vrot.lane.b32.xlu1 %v2698_v48, %s2209_s13 }
 0x1f7   : > { %v2933_v33 = vpop.permute.xlu0 %775  ;;  %v2935_v5 = vpop.permute.xlu1 %981 }
 0x1f8   : > { %4234 = vst [vmem:[#allocation75_spill] sm:$0xff] %v2933_v33  ;;  %4235 = vst [vmem:[#allocation76_spill] sm:$0xff] %v2935_v5  ;;  %v659_v33 = vrot.slane %v2582_v12, 2  ;;  %v727_v5 = vrot.slane %v2637_v45, 2 }
 0x1f9   : > { %887 = vrot.lane.b32.xlu0 %v2938_v3, %s2207_s11  ;;  %1423 = vrot.lane.b32.xlu1 %v2665_v21, %s2205_s29 }
 0x1fa   : > { %v2958_v17 = vsel %vm638_vm2, %v659_v33, %v660_v30 }
 0x1fb   : > { %v2944_v41 = vpop.permute.xlu0 %777  ;;  %v2946_v58 = vpop.permute.xlu1 %949 }
 0x1fc   : > { %4236 = vst [vmem:[#allocation77_spill] sm:$0xff] %v2944_v41 }
 0x1fd   : > { %855 = vrot.lane.b32.xlu0 %v2665_v21, %s2207_s11  ;;  %1133 = vrot.lane.b32.xlu1 %v2409_v29, %s2210_s14 }
 0x1ff   : > { %v2953_v32 = vpop.permute.xlu0 %747  ;;  %v2955_v9 = vpop.permute.xlu1 %1045 }
 0x200   : > { %4237 = vst [vmem:[#allocation78_spill] sm:$0xff] %v2953_v32 }
 0x201   : > { %1077 = vrot.lane.b32.xlu0 %v2896_v40, %s2209_s13  ;;  %843 = vrot.lane.b32.xlu1 %v2958_v17, %s2207_s11 }
 0x203   : > { %v2964_v41 = vpop.permute.xlu0 %749  ;;  %v2966_v21 = vpop.permute.xlu1 %1141 }
 0x204   : > { %4238 = vst [vmem:[#allocation79_spill] sm:$0xff] %v2964_v41  ;;  %4239 = vst [vmem:[#allocation80_spill] sm:$0xff] %v2966_v21 }
 0x205   : > { %1173 = vrot.lane.b32.xlu0 %v2906_v38, %s2210_s14  ;;  %1229 = vrot.lane.b32.xlu1 %v2417_v34, %s2203_s27 }
 0x207   : > { %v2972_v32 = vpop.permute.xlu0 %779  ;;  %v2974_v30 = vpop.permute.xlu1 %1043 }
 0x208   : > { %4240 = vst [vmem:[#allocation81_spill] sm:$0xff] %v2972_v32  ;;  %4241 = vst [vmem:[#allocation82_spill] sm:$0xff] %v2974_v30 }
 0x209   : > { %1075 = vrot.lane.b32.xlu0 %v2926_v36, %s2209_s13  ;;  %939 = vrot.lane.b32.xlu1 %v2656_v0, %s2208_s12 }
 0x20b   : > { %v2980_v33 = vpop.permute.xlu0 %781  ;;  %v2982_v41 = vpop.permute.xlu1 %1139 }
 0x20c   : > { %4242 = vst [vmem:[#allocation83_spill] sm:$0xff] %v2980_v33  ;;  %4243 = vst [vmem:[#allocation84_spill] sm:$0xff] %v2982_v41  ;;  %v657_v41 = vrot.slane %v2519_v61, 2 }
 0x20d   : > { %1171 = vrot.lane.b32.xlu0 %v2938_v3, %s2210_s14  ;;  %1325 = vrot.lane.b32.xlu1 %v2471_v11, %s2204_s28 }
 0x20f   : > { %v2988_v16 = vpop.permute.xlu0 %751  ;;  %v2990_v32 = vpop.permute.xlu1 %983 }
 0x210   : > { %4244 = vst [vmem:[#allocation85_spill] sm:$0xff] %v2988_v16 }
 0x211   : > { %951 = vrot.lane.b32.xlu0 %v2695_v15, %s2208_s12  ;;  %1035 = vrot.lane.b32.xlu1 %v2681_v28, %s2209_s13  ;;  %v655_v15 = vrot.slane %v2500_v53, 2 }
 0x213   : > { %v2996_v30 = vpop.permute.xlu0 %753  ;;  %v2998_v33 = vpop.permute.xlu1 %1235 }
 0x214   : > { %4245 = vst [vmem:[#allocation86_spill] sm:$0xff] %v2996_v30  ;;  %4246 = vst [vmem:[#allocation87_spill] sm:$0xff] %v2998_v33 }
 0x215   : > { %1267 = vrot.lane.b32.xlu0 %v2676_v42, %s2203_s27  ;;  %1421 = vrot.lane.b32.xlu1 %v2491_v50, %s2205_s29  ;;  %v3019_v50 = vsel %vm638_vm2, %v655_v15, %v657_v41 }
 0x216   : > { %4251 = vst [vmem:[#allocation92_spill] sm:$0xff] %v3019_v50 }
 0x217   : > { %v3004_v11 = vpop.permute.xlu0 %783  ;;  %v3006_v16 = vpop.permute.xlu1 %1237 }
 0x218   : > { %4247 = vst [vmem:[#allocation88_spill] sm:$0xff] %v3004_v11  ;;  %4248 = vst [vmem:[#allocation89_spill] sm:$0xff] %v3006_v16  ;;  %v729_v16 = vrot.slane %v2626_v6, 2 }
 0x219   : > { %985 = vrot.lane.b32.xlu0 %v2637_v45, %s2208_s12  ;;  %1131 = vrot.lane.b32.xlu1 %v2809_v24, %s2210_s14 }
 0x21b   : > { %v3014_v30 = vpop.permute.xlu0 %785  ;;  %v3016_v33 = vpop.permute.xlu1 %763 }
 0x21c   : > { %4249 = vst [vmem:[#allocation90_spill] sm:$0xff] %v3014_v30  ;;  %4250 = vst [vmem:[#allocation91_spill] sm:$0xff] %v3016_v33 }
 0x21d   : > { %953 = vrot.lane.b32.xlu0 %v2708_v52, %s2208_s12  ;;  %841 = vrot.lane.b32.xlu1 %v3019_v50, %s2207_s11 }
 0x21f   : > { %v3025_v61 = vpop.permute.xlu0 %881  ;;  %v3027_v11 = vpop.permute.xlu1 %1079 }
 0x220   : > { %4252 = vst [vmem:[#allocation93_spill] sm:$0xff] %v3025_v61 }
 0x221   : > { %1269 = vrot.lane.b32.xlu0 %v2637_v45, %s2203_s27  ;;  %1227 = vrot.lane.b32.xlu1 %v2427_v37, %s2203_s27 }
 0x223   : > { %v3033_v33 = vpop.permute.xlu0 %879  ;;  %v3035_v41 = vpop.permute.xlu1 %1047 }
 0x224   : > { %4253 = vst [vmem:[#allocation94_spill] sm:$0xff] %v3033_v33 }
 0x225   : > { %765 = vrot.lane.b32.xlu0 %v2767_v54, %s2206_s10  ;;  %937 = vrot.lane.b32.xlu1 %v2571_v10, %s2208_s12 }
 0x227   : > { %v3041_v52 = vpop.permute.xlu0 %977  ;;  %v3043_v61 = vpop.permute.xlu1 %1143 }
 0x228   : > { %4254 = vst [vmem:[#allocation95_spill] sm:$0xff] %v3041_v52 }
 0x229   : > { %1081 = vrot.lane.b32.xlu0 %v2659_v39, %s2209_s13  ;;  %1323 = vrot.lane.b32.xlu1 %v2764_v60, %s2204_s28  ;;  %v730_v60 = vsel %vm638_vm2, %v727_v5, %v729_v16 }
 0x22b   : > { %v3049_v30 = vpop.permute.xlu0 %755  ;;  %v3051_v33 = vpop.permute.xlu1 %1333 }
 0x22c   : > { %4255 = vst [vmem:[#allocation96_spill] sm:$0xff] %v3051_v33 }
 0x22d   : > { %1049 = vrot.lane.b32.xlu0 %v2767_v54, %s2209_s13  ;;  %1033 = vrot.lane.b32.xlu1 %v2618_v4, %s2209_s13  ;;  %v726_v54 = vrot.slane %v2676_v42, 2 }
 0x22f   : > { %v3059_v52 = vpop.permute.xlu0 %757  ;;  %v3061_v21 = vpop.permute.xlu1 %1429 }
 0x230   : > { %4256 = vst [vmem:[#allocation97_spill] sm:$0xff] %v3061_v21  ;;  %v654_v21 = vrot.slane %v2507_v46, 2 }
 0x231   : > { %1177 = vrot.lane.b32.xlu0 %v730_v60, %s2210_s14  ;;  %1419 = vrot.lane.b32.xlu1 %v2449_v63, %s2205_s29  ;;  %v728_v63 = vsel %vm638_vm2, %v726_v54, %v727_v5 }
 0x232   : > { %v3083_v37 = vsel %vm638_vm2, %v654_v21, %v655_v15 }
 0x233   : > { %v3067_v6 = vpop.permute.xlu0 %789  ;;  %v3069_v45 = vpop.permute.xlu1 %1331  ;;  %4258 = vst [vmem:[#allocation99_spill] sm:$0xff] %v3083_v37 }
 0x235   : > { %1145 = vrot.lane.b32.xlu0 %v2775_v27, %s2210_s14  ;;  %1129 = vrot.lane.b32.xlu1 %v2884_v20, %s2210_s14 }
 0x237   : > { %v3077_v16 = vpop.permute.xlu0 %885  ;;  %v3079_v33 = vpop.permute.xlu1 %1427 }
 0x238   : > { %4257 = vst [vmem:[#allocation98_spill] sm:$0xff] %v3079_v33 }
 0x239   : > { %1175 = vrot.lane.b32.xlu0 %v728_v63, %s2210_s14  ;;  %839 = vrot.lane.b32.xlu1 %v3083_v37, %s2207_s11 }
 0x23b   : > { %v3088_v42 = vpop.permute.xlu0 %853  ;;  %v3090_v27 = vpop.permute.xlu1 %847 }
 0x23c   : > { %4259 = vst [vmem:[#allocation100_spill] sm:$0xff] %v3090_v27 }
 0x23d   : > { %1365 = vrot.lane.b32.xlu0 %v2659_v39, %s2204_s28  ;;  %1225 = vrot.lane.b32.xlu1 %v2376_v14, %s2203_s27 }
 0x23f   : > { %v3096_v33 = vpop.permute.xlu0 %787  ;;  %v3098_v5 = vpop.permute.xlu1 %1233 }
 0x240   : > { %4260 = vst [vmem:[#allocation101_spill] sm:$0xff] %v3098_v5 }
 0x241   : > { %1461 = vrot.lane.b32.xlu0 %v730_v60, %s2205_s29  ;;  %935 = vrot.lane.b32.xlu1 %v2582_v12, %s2208_s12 }
 0x243   : > { %v3103_v15 = vpop.permute.xlu0 %883  ;;  %v3105_v21 = vpop.permute.xlu1 %943 }
 0x244   : > { %4261 = vst [vmem:[#allocation102_spill] sm:$0xff] %v3105_v21  ;;  %v652_v21 = vrot.slane %v2438_v51, 2 }
 0x245   : > { %1363 = vrot.lane.b32.xlu0 %v2729_v31, %s2204_s28  ;;  %1321 = vrot.lane.b32.xlu1 %v2698_v48, %s2204_s28 }
 0x247   : > { %v3111_v39 = vpop.permute.xlu0 %1073  ;;  %v3113_v54 = vpop.permute.xlu1 %1329 }
 0x248   : > { %4262 = vst [vmem:[#allocation103_spill] sm:$0xff] %v3111_v39  ;;  %4263 = vst [vmem:[#allocation104_spill] sm:$0xff] %v3113_v54 }
 0x249   : > { %1459 = vrot.lane.b32.xlu0 %v728_v63, %s2205_s29  ;;  %1031 = vrot.lane.b32.xlu1 %v2602_v13, %s2209_s13  ;;  %v650_v63 = vrot.slane %v2420_v35, 2 }
 0x24b   : > { %v3118_v60 = vpop.permute.xlu0 %1169  ;;  %v3120_v27 = vpop.permute.xlu1 %1039 }
 0x24c   : > { %4264 = vst [vmem:[#allocation105_spill] sm:$0xff] %v3118_v60  ;;  %4265 = vst [vmem:[#allocation106_spill] sm:$0xff] %v3120_v27  ;;  %v700_v60 = vrot.slane %v2611_v57, 2 }
 0x24d   : > { %1265 = vrot.lane.b32.xlu0 %v2568_v47, %s2203_s27  ;;  %1417 = vrot.lane.b32.xlu1 %v2409_v29, %s2205_s29  ;;  %v3141_v29 = vsel %vm638_vm2, %v650_v63, %v652_v21 }
 0x24f   : > { %v3126_v31 = vpop.permute.xlu0 %979  ;;  %v3128_v48 = vpop.permute.xlu1 %1425 }
 0x250   : > { %4266 = vst [vmem:[#allocation107_spill] sm:$0xff] %v3128_v48 }
 0x251   : > { %975 = vrot.lane.b32.xlu0 %v2797_v49, %s2208_s12  ;;  %1127 = vrot.lane.b32.xlu1 %v2958_v17, %s2210_s14 }
 0x253   : > { %v3136_v27 = vpop.permute.xlu0 %759  ;;  %v3138_v54 = vpop.permute.xlu1 %1135 }
 0x254   : > { %4267 = vst [vmem:[#allocation108_spill] sm:$0xff] %v3138_v54 }
 0x255   : > { %1361 = vrot.lane.b32.xlu0 %v2896_v40, %s2204_s28  ;;  %837 = vrot.lane.b32.xlu1 %v3141_v29, %s2207_s11 }
 0x257   : > { %v3147_v51 = vpop.permute.xlu0 %761  ;;  %v3149_v48 = vpop.permute.xlu1 %845 }
 0x258   : > { %4268 = vst [vmem:[#allocation109_spill] sm:$0xff] %v3149_v48  ;;  %v702_v48 = vrot.slane %v2629_v7, 2 }
 0x259   : > { %1071 = vrot.lane.b32.xlu0 %v2821_v25, %s2209_s13  ;;  %1223 = vrot.lane.b32.xlu1 %v2656_v0, %s2203_s27 }
 0x25a   : > { %v3178_v0 = vsel %vm638_vm2, %v700_v60, %v702_v48 }
 0x25b   : > { %v3155_v54 = vpop.permute.xlu0 %793  ;;  %v3157_v21 = vpop.permute.xlu1 %1231 }
 0x25c   : > { %4269 = vst [vmem:[#allocation110_spill] sm:$0xff] %v3157_v21 }
 0x25d   : > { %1457 = vrot.lane.b32.xlu0 %v2906_v38, %s2205_s29  ;;  %933 = vrot.lane.b32.xlu1 %v2500_v53, %s2208_s12 }
 0x25f   : > { %v3163_v40 = vpop.permute.xlu0 %889  ;;  %v3165_v5 = vpop.permute.xlu1 %941 }
 0x260   : > { %4270 = vst [vmem:[#allocation111_spill] sm:$0xff] %v3165_v5 }
 0x261   : > { %1167 = vrot.lane.b32.xlu0 %v2833_v55, %s2210_s14  ;;  %1319 = vrot.lane.b32.xlu1 %v2681_v28, %s2204_s28 }
 0x263   : > { %v3173_v21 = vpop.permute.xlu0 %857  ;;  %v3175_v38 = vpop.permute.xlu1 %1327 }
 0x264   : > { %4271 = vst [vmem:[#allocation112_spill] sm:$0xff] %v3175_v38  ;;  %v649_v38 = vrot.slane %v2430_v43, 2 }
 0x265   : > { %877 = vrot.lane.b32.xlu0 %v3178_v0, %s2207_s11  ;;  %1029 = vrot.lane.b32.xlu1 %v2544_v1, %s2209_s13 }
 0x267   : > { %v3184_v7 = vpop.permute.xlu0 %791  ;;  %v3186_v5 = vpop.permute.xlu1 %1037 }
 0x268   : > { %4272 = vst [vmem:[#allocation113_spill] sm:$0xff] %v3186_v5  ;;  %v3202_v5 = vsel %vm638_vm2, %v649_v38, %v650_v63  ;;  %v699_v38 = vrot.slane %v2608_v56, 2 }
 0x269   : > { %1263 = vrot.lane.b32.xlu0 %v2858_v59, %s2203_s27  ;;  %1415 = vrot.lane.b32.xlu1 %v2809_v24, %s2205_s29  ;;  %4274 = vst [vmem:[#allocation115_spill] sm:$0xff] %v3202_v5 }
 0x26b   : > { %v3192_v28 = vpop.permute.xlu0 %887  ;;  %v3194_v48 = vpop.permute.xlu1 %1423 }
 0x26c   : > { %4273 = vst [vmem:[#allocation114_spill] sm:$0xff] %v3194_v48 }
 0x26d   : > { %973 = vrot.lane.b32.xlu0 %v2688_v26, %s2208_s12  ;;  %1125 = vrot.lane.b32.xlu1 %v3019_v50, %s2210_s14 }
 0x26f   : > { %v856_v39 = vpop.permute.xlu0 %855  ;;  %v3204_v14 = vpop.permute.xlu1 %1133 }
 0x270   : > { %4275 = vst [vmem:[#allocation116_spill] sm:$0xff] %v3204_v14 }
 0x271   : > { %1359 = vrot.lane.b32.xlu0 %v2926_v36, %s2204_s28  ;;  %835 = vrot.lane.b32.xlu1 %v3202_v5, %s2207_s11  ;;  %v4297_v5 = vld [vmem:[#allocation10_spill] sm:$0xff] }
 0x272   : > { %v644_v56 = vrot.slane %v4297_v5, 2 }
 0x273   : > { %v3210_v24 = vpop.permute.xlu0 %1077  ;;  %v3216_v48 = vpop.permute.xlu1 %843 }
 0x274   : > { %4276 = vst [vmem:[#allocation117_spill] sm:$0xff] %v3216_v48 }
 0x275   : > { %1069 = vrot.lane.b32.xlu0 %v2721_v22, %s2209_s13  ;;  %1221 = vrot.lane.b32.xlu1 %v2571_v10, %s2203_s27  ;;  %v3236_v10 = vsel %vm638_vm2, %v699_v38, %v700_v60  ;;  %v647_v60 = vrot.slane %v2346_v62, 2  ;;  %v4280_v38 = vld [vmem:[#allocation9_spill] sm:$0xff] }
 0x276   : > { %4278 = vst [vmem:[#allocation119_spill] sm:$0xff] %v3236_v10 }
 0x277   : > { %v3218_v63 = vpop.permute.xlu0 %1173  ;;  %v3227_v14 = vpop.permute.xlu1 %1229 }
 0x278   : > { %4277 = vst [vmem:[#allocation118_spill] sm:$0xff] %v3227_v14 }
 0x279   : > { %1455 = vrot.lane.b32.xlu0 %v2938_v3, %s2205_s29  ;;  %931 = vrot.lane.b32.xlu1 %v2507_v46, %s2208_s12 }
 0x27b   : > { %v3224_v36 = vpop.permute.xlu0 %1075  ;;  %v3242_v3 = vpop.permute.xlu1 %939 }
 0x27c   : > { %4279 = vst [vmem:[#allocation120_spill] sm:$0xff] %v3242_v3 }
 0x27d   : > { %1165 = vrot.lane.b32.xlu0 %v2732_v18, %s2210_s14  ;;  %1317 = vrot.lane.b32.xlu1 %v2618_v4, %s2204_s28  ;;  %v4139_v18 = vrot.slane %v4280_v38, 2 }
 0x27f   : > { %v3233_v48 = vpop.permute.xlu0 %1171  ;;  %v3252_v46 = vpop.permute.xlu1 %1325 }
 0x280   : > { %4281 = vst [vmem:[#allocation9_spill] sm:$0xff] %v3252_v46  ;;  %v4285_v46 = vld [vmem:[#allocation46_spill] sm:$0xff] }
 0x281   : > { %875 = vrot.lane.b32.xlu0 %v3236_v10, %s2207_s11  ;;  %1027 = vrot.lane.b32.xlu1 %v2530_v23, %s2209_s13  ;;  %v4282_v10 = vld [vmem:[#allocation42_spill] sm:$0xff]  ;;  %v3261_v23 = vsel %vm638_vm2, %v4139_v18, %v647_v60  ;;  %v4288_v60 = vld [vmem:[#allocation32_spill] sm:$0xff] }
 0x282   : > { %4283 = vst [vmem:[#allocation121_spill] sm:$0xff] %v3261_v23  ;;  %v697_v18 = vrot.slane %v4288_v60, 2  ;;  %v4293_v60 = vld [vmem:[#allocation24_spill] sm:$0xff] }
 0x283   : > { %v952_v14 = vpop.permute.xlu0 %951  ;;  %v3267_v62 = vpop.permute.xlu1 %1035 }
 0x284   : > { %4284 = vst [vmem:[#allocation122_spill] sm:$0xff] %v3267_v62  ;;  %v4289_v62 = vld [vmem:[#allocation31_spill] sm:$0xff] }
 0x285   : > { %1261 = vrot.lane.b32.xlu0 %v2751_v2, %s2203_s27  ;;  %1413 = vrot.lane.b32.xlu1 %v2884_v20, %s2205_s29 }
 0x287   : > { %v3248_v4 = vpop.permute.xlu0 %1267 }
 0x289   : > { %971 = vrot.lane.b32.xlu0 %v4282_v10, %s2208_s12  ;;  %1123 = vrot.lane.b32.xlu1 %v3083_v37, %s2210_s14  ;;  %v3275_v10 = vpop.permute.xlu1 %1421 }
 0x28a   : > { %4286 = vst [vmem:[#allocation123_spill] sm:$0xff] %v3275_v10 }
 0x28b   : > { %v986_v3 = vpop.permute.xlu0 %985 }
 0x28d   : > { %1357 = vrot.lane.b32.xlu0 %v2785_v19, %s2204_s28  ;;  %833 = vrot.lane.b32.xlu1 %v3261_v23, %s2207_s11  ;;  %v4145_v23 = vrot.slane %v4289_v62, 2 }
 0x28f   : > { %v954_v20 = vpop.permute.xlu0 %953 }
 0x291   : > { %1067 = vrot.lane.b32.xlu0 %v4285_v46, %s2209_s13  ;;  %1219 = vrot.lane.b32.xlu1 %v2582_v12, %s2203_s27  ;;  %v4290_v46 = vld [vmem:[#allocation49_spill] sm:$0xff]  ;;  %v3289_v12 = vpop.permute.xlu1 %1131 }
 0x292   : > { %4291 = vst [vmem:[#allocation32_spill] sm:$0xff] %v3289_v12 }
 0x293   : > { %v3273_v37 = vpop.permute.xlu0 %1269 }
 0x295   : > { %1453 = vrot.lane.b32.xlu0 %v2794_v8, %s2205_s29  ;;  %929 = vrot.lane.b32.xlu1 %v2420_v35, %s2208_s12  ;;  %v3294_v8 = vsel %vm638_vm2, %v4145_v23, %v697_v18  ;;  %v1531_v18 = vsel %vm1499_vm3, %v2568_v47, %v3155_v54  ;;  %v1513_v47 = vsel %vm1499_vm3, %v2417_v34, %v3059_v52  ;;  %v4298_v54 = vld [vmem:[#allocation35_spill] sm:$0xff] }
 0x296   : > { %4292 = vst [vmem:[#allocation31_spill] sm:$0xff] %v3294_v8  ;;  %v1564_v50 = vsel %vm1532_vm4, %v1531_v18, %v3163_v40  ;;  %v1530_v34 = vsel %vm1499_vm3, %v2858_v59, %v3184_v7 }
 0x297   : > { %v3281_v19 = vpop.permute.xlu0 %765 }
 0x298   : > { %4287 = vst [vmem:[#allocation124_spill] sm:$0xff] %v3281_v19  ;;  %v4294_v19 = vld [vmem:[#allocation5_spill] sm:$0xff] }
 0x299   : > { %1163 = vrot.lane.b32.xlu0 %v4290_v46, %s2210_s14  ;;  %1315 = vrot.lane.b32.xlu1 %v2602_v13, %s2204_s28  ;;  %v2176_v35 = vunpack.i.l.bf16 %v4294_v19  ;;  %v1514_v13 = vsel %vm1499_vm3, %v2510_v44, %v3136_v27  ;;  %v4295_v46 = vld [vmem:[#allocation6_spill] sm:$0xff]  ;;  %v3314_v44 = vpop.permute.xlu1 %841  ;;  %v1597_v27 = vsel %vm1565_vm5, %v1564_v50, %v986_v3 }
 0x29a   : > { %v2181_v22 = vunpack.i.l.bf16 %v4295_v46  ;;  %v1547_v23 = vsel %vm1532_vm4, %v1514_v13, %v856_v39 }
 0x29b   : > { %v1082_v10 = vpop.permute.xlu0 %1081  ;;  %v1580_v26 = vsel %vm1565_vm5, %v1547_v23, %v952_v14  ;;  %v1546_v14 = vsel %vm1532_vm4, %v1513_v47, %v3088_v42  ;;  %v4302_v47 = vld [vmem:[#allocation53_spill] sm:$0xff] }
 0x29c   : > { %v1630_v23 = vsel %vm1598_vm6, %v1597_v27, %v1082_v10  ;;  %v1613_v52 = vsel %vm1598_vm6, %v1580_v26, %v3035_v41  ;;  %v1563_v10 = vsel %vm1532_vm4, %v1530_v34, %v3192_v28  ;;  %v1579_v26 = vsel %vm1565_vm5, %v1546_v14, %v2946_v58  ;;  %v4305_v34 = vld [vmem:[#allocation80_spill] sm:$0xff] }
 0x29d   : > { %873 = vrot.lane.b32.xlu0 %v3294_v8, %s2207_s11  ;;  %1025 = vrot.lane.b32.xlu1 %v4293_v60, %s2209_s13  ;;  %v4296_v8 = vld [vmem:[#allocation7_spill] sm:$0xff]  ;;  %v1596_v3 = vsel %vm1565_vm5, %v1563_v10, %v2990_v32  ;;  %v4299_v58 = vrot.slane %v4280_v38, 2  ;;  %v2177_v32 = vunpack.i.h.bf16 %v4294_v19  ;;  %v2182_v27 = vunpack.i.h.bf16 %v4295_v46  ;;  %v4304_v19 = vld [vmem:[#allocation20_spill] sm:$0xff]  ;;  %v4308_v10 = vld [vmem:[#allocation66_spill] sm:$0xff] }
 0x29e   : > { %v2186_v60 = vunpack.i.l.bf16 %v4296_v8 }
 0x29f   : > { %v1050_v12 = vpop.permute.xlu0 %1049 }
 0x2a1   : > { %1259 = vrot.lane.b32.xlu0 %v2797_v49, %s2203_s27  ;;  %1411 = vrot.lane.b32.xlu1 %v2958_v17, %s2205_s29  ;;  %v1515_v17 = vsel %vm1499_vm3, %v4298_v54, %v3147_v51  ;;  %v1646_v51 = vsel %vm1631_vm7, %v1613_v52, %v3043_v61  ;;  %v1612_v61 = vsel %vm1598_vm6, %v1579_v26, %v2955_v9  ;;  %v4309_v26 = vld [vmem:[#allocation76_spill] sm:$0xff] }
 0x2a2   : > { %v1548_v40 = vsel %vm1532_vm4, %v1515_v17, %v3173_v21  ;;  %v3351_v21 = vpop.permute.xlu1 %1227  ;;  %v1529_v9 = vsel %vm1499_vm3, %v2751_v2, %v3067_v6  ;;  %v1512_v54 = vsel %vm1499_vm3, %v4304_v19, %v3049_v30  ;;  %v1645_v46 = vsel %vm1631_vm7, %v1612_v61, %v4305_v34  ;;  %v4307_v30 = vld [vmem:[#allocation57_spill] sm:$0xff] }
 0x2a3   : > { %v1178_v39 = vpop.permute.xlu0 %1177  ;;  %v1581_v59 = vsel %vm1565_vm5, %v1548_v40, %v954_v20  ;;  %v4300_v20 = vld [vmem:[#allocation54_spill] sm:$0xff]  ;;  %v1562_v17 = vsel %vm1532_vm4, %v1529_v9, %v3077_v16  ;;  %v2187_v2 = vunpack.i.h.bf16 %v4296_v8  ;;  %v4316_v9 = vld [vmem:[#allocation97_spill] sm:$0xff] }
 0x2a4   : > { %v1663_v50 = vsel %vm1631_vm7, %v1630_v23, %v1178_v39  ;;  %v4303_v23 = vld [vmem:[#allocation55_spill] sm:$0xff]  ;;  %v1595_v8 = vsel %vm1565_vm5, %v1562_v17, %v4309_v26  ;;  %v4319_v34 = vld [vmem:[#allocation21_spill] sm:$0xff]  ;;  %v4325_v26 = vld [vmem:[#allocation86_spill] sm:$0xff] }
 0x2a5   : > { %v1696_v42 = vsel %vm1664_vm8, %v1663_v50, %v2176_v35  ;;  %969 = vrot.lane.b32.xlu0 %v2611_v57, %s2208_s12  ;;  %1121 = vrot.lane.b32.xlu1 %v3141_v29, %s2210_s14  ;;  %v1614_v35 = vsel %vm1598_vm6, %v1581_v59, %v1050_v12  ;;  %v4306_v50 = vld [vmem:[#allocation41_spill] sm:$0xff] }
 0x2a6   : > { %v1729_v41 = vsel %vm1697_vm9, %v1696_v42, %v2181_v22  ;;  %v3362_v22 = vsel %vm638_vm2, %v644_v56, %v4299_v58  ;;  %v1679_v56 = vsel %vm1664_vm8, %v1646_v51, %v4302_v47  ;;  %v1545_v42 = vsel %vm1532_vm4, %v1512_v54, %v4308_v10  ;;  %v4310_v51 = vld [vmem:[#allocation89_spill] sm:$0xff] }
 0x2a7   : > { %v1146_v7 = vpop.permute.xlu0 %1145  ;;  %v1762_v28 = vsel %vm1730_vm11, %v1729_v41, %v2186_v60  ;;  %v4301_v60 = vld [vmem:[#allocation64_spill] sm:$0xff]  ;;  %v1712_v16 = vsel %vm1697_vm9, %v1679_v56, %v4307_v30  ;;  %v4312_v58 = vld [vmem:[#allocation73_spill] sm:$0xff]  ;;  %v4315_v56 = vld [vmem:[#allocation82_spill] sm:$0xff]  ;;  %v4318_v54 = vrot.slane %v4289_v62, 2 }
 0x2a8   : > { %v1647_v13 = vsel %vm1631_vm7, %v1614_v35, %v1146_v7  ;;  %2115 = vmatprep.subr.msk.mxu0 %vm1763_vm10, %v1762_v28  ;;  %v1678_v35 = vsel %vm1664_vm8, %v1645_v46, %v4310_v51  ;;  %v1628_v7 = vsel %vm1598_vm6, %v1595_v8, %v3210_v24  ;;  %v4311_v28 = vld [vmem:[#allocation59_spill] sm:$0xff]  ;;  %v1578_v61 = vsel %vm1565_vm5, %v1545_v42, %v4312_v58  ;;  %v4313_v24 = vld [vmem:[#allocation96_spill] sm:$0xff]  ;;  %v4321_v30 = vld [vmem:[#allocation98_spill] sm:$0xff] }
 0x2a9   : > { %v1680_v12 = vsel %vm1664_vm8, %v1647_v13, %v4300_v20  ;;  %1355 = vrot.lane.b32.xlu0 %v2821_v25, %s2204_s28  ;;  %831 = vrot.lane.b32.xlu1 %v3362_v22, %s2207_s11  ;;  %v1629_v25 = vsel %vm1598_vm6, %v1596_v3, %v3027_v11  ;;  %v3395_v11 = vpop.permute.xlu1 %937  ;;  %v1745_v3 = vsel %vm1730_vm11, %v1712_v16, %v4311_v28  ;;  %v4326_v8 = vld [vmem:[#allocation15_spill] sm:$0xff] }
 0x2aa   : > { %v1713_v18 = vsel %vm1697_vm9, %v1680_v12, %v4301_v60  ;;  %v1661_v13 = vsel %vm1631_vm7, %v1628_v7, %v3218_v63  ;;  %v1711_v12 = vsel %vm1697_vm9, %v1678_v35, %v4313_v24  ;;  %v4328_v35 = vld [vmem:[#allocation61_spill] sm:$0xff]  ;;  %v4332_v24 = vld [vmem:[#allocation90_spill] sm:$0xff] }
 0x2ab   : > { %v1176_v14 = vpop.permute.xlu0 %1175  ;;  %v1746_v39 = vsel %vm1730_vm11, %v1713_v18, %v4303_v23  ;;  %v1694_v20 = vsel %vm1664_vm8, %v1661_v13, %v3273_v37  ;;  %v4314_v18 = vld [vmem:[#allocation30_spill] sm:$0xff]  ;;  %v1528_v37 = vsel %vm1499_vm3, %v2797_v49, %v3096_v33  ;;  %v4317_v33 = vld [vmem:[#allocation84_spill] sm:$0xff] }
 0x2ac   : > { %v1662_v52 = vsel %vm1631_vm7, %v1629_v25, %v1176_v14  ;;  %2116 = vmatpush3.xpose.msk.msra.mxu0 %vm1763_vm10, %v1746_v39  ;;  %v694_v47 = vrot.slane %v4314_v18, 2  ;;  %v1744_v14 = vsel %vm1730_vm11, %v1711_v12, %v4316_v9  ;;  %v1561_v25 = vsel %vm1532_vm4, %v1528_v37, %v3103_v15  ;;  %v4330_v13 = vld [vmem:[#allocation4_spill] sm:$0xff] }
 0x2ad   : > { %v1695_v6 = vsel %vm1664_vm8, %v1662_v52, %v2177_v32  ;;  %1065 = vrot.lane.b32.xlu0 %v4306_v50, %s2209_s13  ;;  %1217 = vrot.lane.b32.xlu1 %v2500_v53, %s2203_s27  ;;  %v3430_v32 = vpop.permute.xlu1 %1323  ;;  %v1594_v23 = vsel %vm1565_vm5, %v1561_v25, %v3126_v31  ;;  %v4337_v37 = vld [vmem:[#allocation68_spill] sm:$0xff] }
 0x2ae   : > { %v1728_v40 = vsel %vm1697_vm9, %v1695_v6, %v2182_v27  ;;  %v1611_v27 = vsel %vm1598_vm6, %v1578_v61, %v4315_v56  ;;  %v1627_v19 = vsel %vm1598_vm6, %v1594_v23, %v3224_v36  ;;  %v3459_v17 = vsel %vm638_vm2, %v694_v47, %v4318_v54  ;;  %v4320_v36 = vld [vmem:[#allocation87_spill] sm:$0xff] }
 0x2af   : > { %v1366_v59 = vpop.permute.xlu0 %1365  ;;  %v1761_v41 = vsel %vm1730_vm11, %v1728_v40, %v2187_v2  ;;  %v1644_v39 = vsel %vm1631_vm7, %v1611_v27, %v4317_v33  ;;  %v4322_v40 = vld [vmem:[#allocation43_spill] sm:$0xff]  ;;  %v4339_v33 = vld [vmem:[#allocation105_spill] sm:$0xff] }
 0x2b0   : > { %2117 = vmatprep.subr.msk.mxu0 %vm1763_vm10, %v1761_v41  ;;  %v1727_v63 = vsel %vm1697_vm9, %v1694_v20, %v1366_v59  ;;  %v1677_v46 = vsel %vm1664_vm8, %v1644_v39, %v4320_v36  ;;  %v1511_v59 = vsel %vm1499_vm3, %v4326_v8, %v4325_v26  ;;  %v4327_v41 = vld [vmem:[#allocation115_spill] sm:$0xff]  ;;  %v1527_v12 = vsel %vm1499_vm3, %v4322_v40, %v4332_v24  ;;  %v4342_v36 = vld [vmem:[#allocation101_spill] sm:$0xff]  ;;  %v4350_v24 = vld [vmem:[#allocation42_spill] sm:$0xff] }
 0x2b1   : > { %1451 = vrot.lane.b32.xlu0 %v2833_v55, %s2205_s29  ;;  %2118 = vmatpush3.xpose.msk.msra.mxu0 %vm1763_vm10, %v1745_v3  ;;  %v3463_v15 = vpop.permute.xlu1 %1033  ;;  %v1544_v7 = vsel %vm1532_vm4, %v1511_v59, %v4328_v35  ;;  %v4329_v3 = vld [vmem:[#allocation47_spill] sm:$0xff] }
 0x2b2   : > { %927 = vrot.lane.b32.xlu1 %v2430_v43, %s2208_s12  ;;  %v4331_v61 = vld [vmem:[#allocation63_spill] sm:$0xff] }
 0x2b3   : > { %v1462_v60 = vpop.permute.xlu0 %1461  ;;  %v1577_v20 = vsel %vm1565_vm5, %v1544_v7, %v4331_v61  ;;  %v4335_v47 = vld [vmem:[#allocation27_spill] sm:$0xff]  ;;  %v4348_v7 = vld [vmem:[#allocation29_spill] sm:$0xff] }
 0x2b4   : > { %v1760_v55 = vsel %vm1730_vm11, %v1727_v63, %v1462_v60  ;;  %v4333_v63 = vld [vmem:[#allocation39_spill] sm:$0xff]  ;;  %v4334_v60 = vld [vmem:[#allocation93_spill] sm:$0xff]  ;;  %v1610_v9 = vsel %vm1598_vm6, %v1577_v20, %v4337_v37  ;;  %v4353_v37 = vld [vmem:[#allocation46_spill] sm:$0xff] }
 0x2b5   : > { %1161 = vrot.lane.b32.xlu0 %v3178_v0, %s2210_s14  ;;  %2119 = vmatprep.subr.msk.mxu0 %vm1763_vm10, %v1760_v55  ;;  %v3485_v10 = vpop.permute.xlu1 %1419  ;;  %v1560_v55 = vsel %vm1532_vm4, %v1527_v12, %v4334_v60  ;;  %v4336_v56 = vld [vmem:[#allocation95_spill] sm:$0xff] }
 0x2b6   : > { %1313 = vrot.lane.b32.xlu1 %v2544_v1, %s2204_s28  ;;  %2120 = vmatpush3.xpose.msk.msra.mxu0 %vm1763_vm10, %v1744_v14  ;;  %v1660_v1 = vsel %vm1631_vm7, %v1627_v19, %v3233_v48  ;;  %v1710_v48 = vsel %vm1697_vm9, %v1677_v46, %v3069_v45  ;;  %v4324_v45 = vld [vmem:[#allocation38_spill] sm:$0xff]  ;;  %v1593_v27 = vsel %vm1565_vm5, %v1560_v55, %v4336_v56  ;;  %v4338_v23 = vld [vmem:[#allocation103_spill] sm:$0xff]  ;;  %v4340_v19 = vld [vmem:[#allocation48_spill] sm:$0xff] }
 0x2b7   : > { %v1364_v49 = vpop.permute.xlu0 %1363  ;;  %v1693_v31 = vsel %vm1664_vm8, %v1660_v1, %v3248_v4  ;;  %v1743_v16 = vsel %vm1730_vm11, %v1710_v48, %v4321_v30  ;;  %v4323_v4 = vld [vmem:[#allocation92_spill] sm:$0xff]  ;;  %v4341_v54 = vld [vmem:[#allocation71_spill] sm:$0xff]  ;;  %v4343_v48 = vld [vmem:[#allocation25_spill] sm:$0xff] }
 0x2b8   : > { %v1726_v52 = vsel %vm1697_vm9, %v1693_v31, %v1364_v49  ;;  %v1626_v49 = vsel %vm1598_vm6, %v1593_v27, %v4338_v23  ;;  %v1643_v1 = vsel %vm1631_vm7, %v1610_v9, %v4341_v54  ;;  %v4344_v30 = vld [vmem:[#allocation104_spill] sm:$0xff]  ;;  %v4346_v8 = vld [vmem:[#allocation107_spill] sm:$0xff]  ;;  %v4352_v56 = vld [vmem:[#allocation121_spill] sm:$0xff] }
 0x2b9   : > { %871 = vrot.lane.b32.xlu0 %v3459_v17, %s2207_s11  ;;  %v3496_v28 = vpop.permute.xlu1 %1129  ;;  %v1659_v39 = vsel %vm1631_vm7, %v1626_v49, %v4339_v33  ;;  %v1676_v46 = vsel %vm1664_vm8, %v1643_v1, %v4342_v36  ;;  %v4347_v35 = vld [vmem:[#allocation119_spill] sm:$0xff]  ;;  %v4354_v9 = vld [vmem:[#allocation8_spill] sm:$0xff]  ;;  %v4357_v54 = vld [vmem:[#allocation85_spill] sm:$0xff] }
 0x2ba   : > { %1023 = vrot.lane.b32.xlu1 %v4319_v34, %s2209_s13  ;;  %v4351_v12 = vld [vmem:[#allocation99_spill] sm:$0xff]  ;;  %v4355_v33 = vld [vmem:[#allocation88_spill] sm:$0xff]  ;;  %v4359_v36 = vld [vmem:[#allocation94_spill] sm:$0xff] }
 0x2bb   : > { %v1460_v2 = vpop.permute.xlu0 %1459  ;;  %v4358_v1 = vld [vmem:[#allocation40_spill] sm:$0xff] }
 0x2bc   : > { %v1759_v6 = vsel %vm1730_vm11, %v1726_v52, %v1460_v2 }
 0x2bd   : > { %1257 = vrot.lane.b32.xlu0 %v4322_v40, %s2203_s27  ;;  %2121 = vmatprep.subr.msk.mxu0 %vm1763_vm10, %v1759_v6  ;;  %v3517_v14 = vpop.permute.xlu1 %839  ;;  %v692_v6 = vrot.slane %v4343_v48, 2 }
 0x2be   : > { %1409 = vrot.lane.b32.xlu1 %v4323_v4, %s2205_s29  ;;  %2122 = vmatpush3.xpose.msk.msra.mxu0 %vm1763_vm10, %v1743_v16  ;;  %v1709_v16 = vsel %vm1697_vm9, %v1676_v46, %v4344_v30  ;;  %v4345_v4 = vld [vmem:[#allocation23_spill] sm:$0xff] }
 0x2bf   : > { %v1266_v42 = vpop.permute.xlu0 %1265  ;;  %v690_v26 = vrot.slane %v4345_v4, 2 }
 0x2c0   : > { %v1692_v31 = vsel %vm1664_vm8, %v1659_v39, %v1266_v42  ;;  %v1742_v42 = vsel %vm1730_vm11, %v1709_v16, %v4346_v8  ;;  %v1526_v39 = vsel %vm1499_vm3, %v4350_v24, %v4355_v33  ;;  %v4362_v16 = vld [vmem:[#allocation102_spill] sm:$0xff] }
 0x2c1   : > { %967 = vrot.lane.b32.xlu0 %v4324_v45, %s2208_s12  ;;  %v3540_v59 = vpop.permute.xlu1 %1225  ;;  %v1559_v46 = vsel %vm1532_vm4, %v1526_v39, %v4359_v36  ;;  %v4366_v33 = vld [vmem:[#allocation14_spill] sm:$0xff] }
 0x2c2   : > { %1119 = vrot.lane.b32.xlu1 %v4327_v41, %s2210_s14  ;;  %v4367_v39 = vld [vmem:[#allocation110_spill] sm:$0xff] }
 0x2c3   : > { %v976_v51 = vpop.permute.xlu0 %975 }
 0x2c5   : > { %1353 = vrot.lane.b32.xlu0 %v4329_v3, %s2204_s28  ;;  %v3555_v61 = vpop.permute.xlu1 %935 }
 0x2c6   : > { %2189 = vrot.lane.b32.xlu1 %v4330_v13, %s2207_s11  ;;  %v3549_v13 = vsel %vm638_vm2, %v690_v26, %v692_v6  ;;  %v1592_v6 = vsel %vm1565_vm5, %v1559_v46, %v976_v51  ;;  %v4369_v46 = vld [vmem:[#allocation22_spill] sm:$0xff] }
 0x2c7   : > { %v1362_v58 = vpop.permute.xlu0 %1361 }
 0x2c8   : > { %v1725_v52 = vsel %vm1697_vm9, %v1692_v31, %v1362_v58  ;;  %v4349_v58 = vld [vmem:[#allocation16_spill] sm:$0xff]  ;;  %v1510_v31 = vsel %vm1499_vm3, %v4358_v1, %v4357_v54 }
 0x2c9   : > { %1063 = vrot.lane.b32.xlu0 %v4333_v63, %s2209_s13  ;;  %v3561_v55 = vpop.permute.xlu1 %1321 }
 0x2ca   : > { %1215 = vrot.lane.b32.xlu1 %v4335_v47, %s2203_s27 }
 0x2cb   : > { %v1072_v25 = vpop.permute.xlu0 %1071 }
 0x2cc   : > { %v1625_v8 = vsel %vm1598_vm6, %v1592_v6, %v1072_v25 }
 0x2cd   : > { %1449 = vrot.lane.b32.xlu0 %v4340_v19, %s2205_s29  ;;  %v3571_v23 = vpop.permute.xlu1 %1031  ;;  %v4356_v19 = vld [vmem:[#allocation37_spill] sm:$0xff] }
 0x2ce   : > { %925 = vrot.lane.b32.xlu1 %v4280_v38, %s2208_s12 }
 0x2cf   : > { %v1458_v2 = vpop.permute.xlu0 %1457 }
 0x2d0   : > { %v1758_v40 = vsel %vm1730_vm11, %v1725_v52, %v1458_v2  ;;  %v4360_v52 = vld [vmem:[#allocation28_spill] sm:$0xff] }
 0x2d1   : > { %1159 = vrot.lane.b32.xlu0 %v4347_v35, %s2210_s14  ;;  %2123 = vmatprep.subr.msk.mxu0 %vm1763_vm10, %v1758_v40  ;;  %v4361_v2 = vld [vmem:[#allocation100_spill] sm:$0xff] }
 0x2d2   : > { %1311 = vrot.lane.b32.xlu1 %v4348_v7, %s2204_s28  ;;  %2124 = vmatpush3.xpose.msk.msra.mxu0 %vm1763_vm10, %v1742_v42  ;;  %v1543_v48 = vsel %vm1532_vm4, %v1510_v31, %v4361_v2  ;;  %v4363_v42 = vld [vmem:[#allocation106_spill] sm:$0xff]  ;;  %v4368_v31 = vld [vmem:[#allocation112_spill] sm:$0xff]  ;;  %v689_v2 = vrot.slane %v4369_v46, 2 }
 0x2d3   : > { %v1168_v3 = vpop.permute.xlu0 %1167  ;;  %v1576_v40 = vsel %vm1565_vm5, %v1543_v48, %v4362_v16  ;;  %v4370_v48 = vld [vmem:[#allocation114_spill] sm:$0xff] }
 0x2d4   : > { %v1609_v7 = vsel %vm1598_vm6, %v1576_v40, %v4363_v42  ;;  %v3621_v40 = vsel %vm638_vm2, %v689_v2, %v690_v26 }
 0x2d5   : > { %869 = vrot.lane.b32.xlu0 %v3549_v13, %s2207_s11 }
 0x2d6   : > { %1021 = vrot.lane.b32.xlu1 %v4349_v58, %s2209_s13  ;;  %v3593_v58 = vpop.permute.xlu1 %1417 }
 0x2d7   : > { %v878_v20 = vpop.permute.xlu0 %877 }
 0x2d9   : > { %1255 = vrot.lane.b32.xlu0 %v4350_v24, %s2203_s27  ;;  %v1658_v24 = vsel %vm1631_vm7, %v1625_v8, %v1168_v3  ;;  %v4372_v8 = vld [vmem:[#allocation17_spill] sm:$0xff] }
 0x2da   : > { %1407 = vrot.lane.b32.xlu1 %v4351_v12, %s2205_s29  ;;  %v4364_v12 = vld [vmem:[#allocation49_spill] sm:$0xff] }
 0x2db   : > { %v1264_v60 = vpop.permute.xlu0 %1263 }
 0x2dc   : > { %v1691_v51 = vsel %vm1664_vm8, %v1658_v24, %v1264_v60  ;;  %v4371_v60 = vld [vmem:[#allocation31_spill] sm:$0xff] }
 0x2dd   : > { %965 = vrot.lane.b32.xlu0 %v4289_v62, %s2208_s12 }
 0x2de   : > { %1117 = vrot.lane.b32.xlu1 %v4352_v56, %s2210_s14  ;;  %v4365_v56 = vld [vmem:[#allocation108_spill] sm:$0xff] }
 0x2df   : > { %v974_v27 = vpop.permute.xlu0 %973 }
 0x2e1   : > { %1351 = vrot.lane.b32.xlu0 %v4353_v37, %s2204_s28  ;;  %v1642_v37 = vsel %vm1631_vm7, %v1609_v7, %v4365_v56 }
 0x2e2   : > { %955 = vrot.lane.b32.xlu1 %v4354_v9, %s2208_s12  ;;  %v1675_v25 = vsel %vm1664_vm8, %v1642_v37, %v4367_v39  ;;  %v4373_v37 = vld [vmem:[#allocation83_spill] sm:$0xff] }
 0x2e3   : > { %v1360_v49 = vpop.permute.xlu0 %1359  ;;  %v1708_v3 = vsel %vm1697_vm9, %v1675_v25, %v4368_v31  ;;  %v4375_v39 = vld [vmem:[#allocation79_spill] sm:$0xff]  ;;  %v4376_v25 = vld [vmem:[#allocation34_spill] sm:$0xff] }
 0x2e4   : > { %v1724_v54 = vsel %vm1697_vm9, %v1691_v51, %v1360_v49  ;;  %v1741_v6 = vsel %vm1730_vm11, %v1708_v3, %v4370_v48  ;;  %v3618_v49 = vpop.permute.xlu1 %1127  ;;  %v4378_v3 = vld [vmem:[#allocation111_spill] sm:$0xff]  ;;  %v4379_v48 = vld [vmem:[#allocation113_spill] sm:$0xff] }
 0x2e5   : > { %1061 = vrot.lane.b32.xlu0 %v4356_v19, %s2209_s13 }
 0x2e6   : > { %1341 = vrot.lane.b32.xlu1 %v4360_v52, %s2204_s28 }
 0x2e7   : > { %v1070_v30 = vpop.permute.xlu0 %1069 }
 0x2e8   : > { %v3627_v7 = vpop.permute.xlu1 %837 }
 0x2e9   : > { %1447 = vrot.lane.b32.xlu0 %v4364_v12, %s2205_s29 }
 0x2ea   : > { %1051 = vrot.lane.b32.xlu1 %v4366_v33, %s2209_s13  ;;  %v4374_v33 = vld [vmem:[#allocation33_spill] sm:$0xff] }
 0x2eb   : > { %v1456_v1 = vpop.permute.xlu0 %1455 }
 0x2ec   : > { %v1757_v36 = vsel %vm1730_vm11, %v1724_v54, %v1456_v1  ;;  %v3637_v26 = vpop.permute.xlu1 %1223  ;;  %v1509_v54 = vsel %vm1499_vm3, %v4376_v25, %v4375_v39 }
 0x2ed   : > { %1157 = vrot.lane.b32.xlu0 %v4371_v60, %s2210_s14  ;;  %2125 = vmatprep.subr.msk.mxu0 %vm1763_vm10, %v1757_v36 }
 0x2ee   : > { %1437 = vrot.lane.b32.xlu1 %v3549_v13, %s2205_s29  ;;  %2126 = vmatpush3.xpose.msk.msra.mxu0 %vm1763_vm10, %v1741_v6 }
 0x2ef   : > { %v1166_v16 = vpop.permute.xlu0 %1165 }
 0x2f0   : > { %v3646_v51 = vpop.permute.xlu1 %933 }
 0x2f1   : > { %867 = vrot.lane.b32.xlu0 %v3621_v40, %s2207_s11 }
 0x2f2   : > { %1147 = vrot.lane.b32.xlu1 %v4372_v8, %s2210_s14 }
 0x2f3   : > { %v876_v42 = vpop.permute.xlu0 %875 }
 0x2f4   : > { %v3672_v25 = vpop.permute.xlu1 %1319 }
 0x2f5   : > { %1253 = vrot.lane.b32.xlu0 %v2611_v57, %s2203_s27 }
 0x2f6   : > { %1115 = vrot.lane.b32.xlu1 %v3362_v22, %s2210_s14  ;;  %v1525_v22 = vsel %vm1499_vm3, %v2611_v57, %v4373_v37 }
 0x2f7   : > { %v1262_v24 = vpop.permute.xlu0 %1261  ;;  %v1558_v1 = vsel %vm1532_vm4, %v1525_v22, %v878_v20 }
 0x2f8   : > { %v1591_v31 = vsel %vm1565_vm5, %v1558_v1, %v974_v27  ;;  %v4381_v27 = vld [vmem:[#allocation118_spill] sm:$0xff]  ;;  %v4382_v1 = vld [vmem:[#allocation9_spill] sm:$0xff] }
 0x2f9   : > { %963 = vrot.lane.b32.xlu0 %v4314_v18, %s2208_s12  ;;  %v1624_v2 = vsel %vm1598_vm6, %v1591_v31, %v1070_v30  ;;  %v3684_v31 = vpop.permute.xlu1 %1029 }
 0x2fa   : > { %1211 = vrot.lane.b32.xlu1 %v2430_v43, %s2203_s27  ;;  %v1657_v37 = vsel %vm1631_vm7, %v1624_v2, %v1166_v16 }
 0x2fb   : > { %v972_v12 = vpop.permute.xlu0 %971  ;;  %v1690_v22 = vsel %vm1664_vm8, %v1657_v37, %v1262_v24 }
 0x2fd   : > { %1349 = vrot.lane.b32.xlu0 %v4306_v50, %s2204_s28  ;;  %v4377_v50 = vld [vmem:[#allocation109_spill] sm:$0xff] }
 0x2fe   : > { %1307 = vrot.lane.b32.xlu1 %v4319_v34, %s2204_s28  ;;  %v1542_v34 = vsel %vm1532_vm4, %v1509_v54, %v4377_v50 }
 0x2ff   : > { %v1358_v56 = vpop.permute.xlu0 %1357  ;;  %v1575_v36 = vsel %vm1565_vm5, %v1542_v34, %v4378_v3  ;;  %v4383_v34 = vld [vmem:[#allocation123_spill] sm:$0xff] }
 0x300   : > { %v1608_v6 = vsel %vm1598_vm6, %v1575_v36, %v4379_v48  ;;  %v1723_v30 = vsel %vm1697_vm9, %v1690_v22, %v1358_v56  ;;  %v4384_v56 = vld [vmem:[#allocation12_spill] sm:$0xff]  ;;  %v3690_v36 = vpop.permute.xlu1 %1415  ;;  %v4386_v22 = vld [vmem:[#allocation78_spill] sm:$0xff] }
 0x301   : > { %1059 = vrot.lane.b32.xlu0 %v4374_v33, %s2209_s13 }
 0x302   : > { %1403 = vrot.lane.b32.xlu1 %v4327_v41, %s2205_s29  ;;  %v4380_v41 = vld [vmem:[#allocation116_spill] sm:$0xff] }
 0x303   : > { %v1068_v57 = vpop.permute.xlu0 %1067  ;;  %v1641_v20 = vsel %vm1631_vm7, %v1608_v6, %v4380_v41  ;;  %v4385_v41 = vld [vmem:[#allocation81_spill] sm:$0xff] }
 0x304   : > { %v1674_v39 = vsel %vm1664_vm8, %v1641_v20, %v4381_v27  ;;  %v3694_v6 = vpop.permute.xlu1 %1125  ;;  %v1524_v20 = vsel %vm1499_vm3, %v4324_v45, %v4385_v41  ;;  %v4387_v27 = vld [vmem:[#allocation36_spill] sm:$0xff] }
 0x305   : > { %1445 = vrot.lane.b32.xlu0 %v3178_v0, %s2205_s29  ;;  %v1707_v50 = vsel %vm1697_vm9, %v1674_v39, %v4382_v1  ;;  %v1508_v39 = vsel %vm1499_vm3, %v4387_v27, %v4386_v22 }
 0x306   : > { %v1740_v0 = vsel %vm1730_vm11, %v1707_v50, %v4383_v34  ;;  %v4389_v34 = vld [vmem:[#allocation120_spill] sm:$0xff] }
 0x307   : > { %v1454_v54 = vpop.permute.xlu0 %1453 }
 0x308   : > { %v1756_v16 = vsel %vm1730_vm11, %v1723_v30, %v1454_v54  ;;  %v1557_v30 = vsel %vm1532_vm4, %v1524_v20, %v876_v42  ;;  %v4388_v54 = vld [vmem:[#allocation117_spill] sm:$0xff]  ;;  %v3709_v50 = vpop.permute.xlu1 %835  ;;  %v4391_v42 = vld [vmem:[#allocation32_spill] sm:$0xff] }
 0x309   : > { %1155 = vrot.lane.b32.xlu0 %v3459_v17, %s2210_s14  ;;  %2127 = vmatprep.subr.msk.mxu0 %vm1763_vm10, %v1756_v16  ;;  %v1541_v1 = vsel %vm1532_vm4, %v1508_v39, %v4388_v54 }
 0x30a   : > { %2128 = vmatpush3.xpose.msk.msra.mxu0 %vm1763_vm10, %v1740_v0 }
 0x30b   : > { %v1164_v24 = vpop.permute.xlu0 %1163 }
 0x30d   : > { %865 = vrot.lane.b32.xlu0 %v4384_v56, %s2207_s11 }
 0x30f   : > { %v874_v3 = vpop.permute.xlu0 %873 }
 0x311   : > { %1251 = vrot.lane.b32.xlu0 %v4324_v45, %s2203_s27  ;;  %v1574_v45 = vsel %vm1565_vm5, %v1541_v1, %v4389_v34 }
 0x313   : > { %v1260_v2 = vpop.permute.xlu0 %1259 }
 0x315   : > { %961 = vrot.lane.b32.xlu0 %v4345_v4, %s2208_s12 }
 0x317   : > { %v970_v48 = vpop.permute.xlu0 %969 }
 0x319   : > { %1347 = vrot.lane.b32.xlu0 %v4333_v63, %s2204_s28  ;;  %v1590_v63 = vsel %vm1565_vm5, %v1557_v30, %v972_v12 }
 0x31a   : > { %v1623_v0 = vsel %vm1598_vm6, %v1590_v63, %v1068_v57 }
 0x31b   : > { %v1356_v37 = vpop.permute.xlu0 %1355  ;;  %v1656_v22 = vsel %vm1631_vm7, %v1623_v0, %v1164_v24  ;;  %v4394_v0 = vld [vmem:[#allocation74_spill] sm:$0xff] }
 0x31c   : > { %v1689_v27 = vsel %vm1664_vm8, %v1656_v22, %v1260_v2 }
 0x31d   : > { %1057 = vrot.lane.b32.xlu0 %v4360_v52, %s2209_s13  ;;  %v4390_v52 = vld [vmem:[#allocation122_spill] sm:$0xff]  ;;  %v1722_v39 = vsel %vm1697_vm9, %v1689_v27, %v1356_v37 }
 0x31e   : > { %v1607_v41 = vsel %vm1598_vm6, %v1574_v45, %v4390_v52  ;;  %v4393_v45 = vld [vmem:[#allocation26_spill] sm:$0xff]  ;;  %v1507_v52 = vsel %vm1499_vm3, %v2500_v53, %v4394_v0 }
 0x31f   : > { %v1066_v16 = vpop.permute.xlu0 %1065  ;;  %v1640_v20 = vsel %vm1631_vm7, %v1607_v41, %v4391_v42  ;;  %v1540_v22 = vsel %vm1532_vm4, %v1507_v52, %v3314_v44  ;;  %v4398_v0 = vld [vmem:[#allocation18_spill] sm:$0xff]  ;;  %v4399_v52 = vld [vmem:[#allocation72_spill] sm:$0xff] }
 0x320   : > { %v1673_v12 = vsel %vm1664_vm8, %v1640_v20, %v3351_v21  ;;  %v1573_v20 = vsel %vm1565_vm5, %v1540_v22, %v3395_v11 }
 0x321   : > { %1443 = vrot.lane.b32.xlu0 %v4347_v35, %s2205_s29  ;;  %v1706_v57 = vsel %vm1697_vm9, %v1673_v12, %v3430_v32  ;;  %v3731_v35 = vpop.permute.xlu1 %1221  ;;  %v1606_v27 = vsel %vm1598_vm6, %v1573_v20, %v3463_v15 }
 0x322   : > { %v1739_v24 = vsel %vm1730_vm11, %v1706_v57, %v3485_v10  ;;  %v1639_v44 = vsel %vm1631_vm7, %v1606_v27, %v3496_v28 }
 0x323   : > { %v1452_v30 = vpop.permute.xlu0 %1451  ;;  %v1672_v11 = vsel %vm1664_vm8, %v1639_v44, %v3540_v59 }
 0x324   : > { %v1755_v54 = vsel %vm1730_vm11, %v1722_v39, %v1452_v30  ;;  %v1705_v15 = vsel %vm1697_vm9, %v1672_v11, %v3561_v55 }
 0x325   : > { %1153 = vrot.lane.b32.xlu0 %v3549_v13, %s2210_s14  ;;  %2129 = vmatprep.subr.msk.mxu0 %vm1763_vm10, %v1755_v54  ;;  %v3739_v2 = vpop.permute.xlu1 %931  ;;  %v1738_v30 = vsel %vm1730_vm11, %v1705_v15, %v3593_v58  ;;  %v4396_v54 = vld [vmem:[#allocation11_spill] sm:$0xff] }
 0x326   : > { %2130 = vmatpush3.xpose.msk.msra.mxu0 %vm1763_vm10, %v1739_v24 }
 0x327   : > { %v1162_v21 = vpop.permute.xlu0 %1161 }
 0x329   : > { %863 = vrot.lane.b32.xlu0 %v4372_v8, %s2207_s11  ;;  %v3743_v37 = vpop.permute.xlu1 %1317  ;;  %v4392_v8 = vld [vmem:[#allocation77_spill] sm:$0xff] }
 0x32a   : > { %v1523_v34 = vsel %vm1499_vm3, %v4289_v62, %v4392_v8 }
 0x32b   : > { %v872_v32 = vpop.permute.xlu0 %871  ;;  %v1556_v41 = vsel %vm1532_vm4, %v1523_v34, %v874_v3 }
 0x32d   : > { %1249 = vrot.lane.b32.xlu0 %v4289_v62, %s2203_s27  ;;  %v3749_v1 = vpop.permute.xlu1 %1027 }
 0x32f   : > { %v1258_v10 = vpop.permute.xlu0 %1257 }
 0x331   : > { %959 = vrot.lane.b32.xlu0 %v4369_v46, %s2208_s12  ;;  %v3768_v12 = vpop.permute.xlu1 %1413 }
 0x333   : > { %v968_v13 = vpop.permute.xlu0 %967 }
 0x335   : > { %1345 = vrot.lane.b32.xlu0 %v4356_v19, %s2204_s28  ;;  %v1589_v19 = vsel %vm1565_vm5, %v1556_v41, %v970_v48  ;;  %v3788_v28 = vpop.permute.xlu1 %1123  ;;  %v1506_v41 = vsel %vm1499_vm3, %v4335_v47, %v4399_v52 }
 0x336   : > { %v1622_v62 = vsel %vm1598_vm6, %v1589_v19, %v1066_v16  ;;  %v1539_v19 = vsel %vm1532_vm4, %v1506_v41, %v3517_v14 }
 0x337   : > { %v1354_v63 = vpop.permute.xlu0 %1353  ;;  %v1655_v53 = vsel %vm1631_vm7, %v1622_v62, %v1162_v21 }
 0x338   : > { %v1688_v3 = vsel %vm1664_vm8, %v1655_v53, %v1258_v10 }
 0x339   : > { %1055 = vrot.lane.b32.xlu0 %v4393_v45, %s2209_s13  ;;  %v1721_v48 = vsel %vm1697_vm9, %v1688_v3, %v1354_v63  ;;  %v3792_v55 = vpop.permute.xlu1 %833  ;;  %v4397_v63 = vld [vmem:[#allocation75_spill] sm:$0xff]  ;;  %v4400_v3 = vld [vmem:[#allocation50_spill] sm:$0xff] }
 0x33a   : > { %v1522_v8 = vsel %vm1499_vm3, %v4314_v18, %v4397_v63 }
 0x33b   : > { %v1064_v42 = vpop.permute.xlu0 %1063  ;;  %v1555_v22 = vsel %vm1532_vm4, %v1522_v8, %v872_v32 }
 0x33d   : > { %1441 = vrot.lane.b32.xlu0 %v4371_v60, %s2205_s29  ;;  %v4395_v60 = vld [vmem:[#allocation51_spill] sm:$0xff]  ;;  %v3798_v24 = vpop.permute.xlu1 %1219 }
 0x33f   : > { %v1450_v16 = vpop.permute.xlu0 %1449 }
 0x340   : > { %v1754_v39 = vsel %vm1730_vm11, %v1721_v48, %v1450_v16  ;;  %v4401_v48 = vld [vmem:[#allocation19_spill] sm:$0xff] }
 0x341   : > { %1151 = vrot.lane.b32.xlu0 %v3621_v40, %s2210_s14  ;;  %2131 = vmatprep.subr.msk.mxu0 %vm1763_vm10, %v1754_v39  ;;  %v3805_v34 = vpop.permute.xlu1 %929  ;;  %v4402_v39 = vld [vmem:[#allocation70_spill] sm:$0xff] }
 0x342   : > { %2132 = vmatpush3.xpose.msk.msra.mxu0 %vm1763_vm10, %v1738_v30  ;;  %v1521_v30 = vsel %vm1499_vm3, %v4345_v4, %v4402_v39 }
 0x343   : > { %v1160_v59 = vpop.permute.xlu0 %1159 }
 0x345   : > { %861 = vrot.lane.b32.xlu0 %v4395_v60, %s2207_s11  ;;  %v4404_v60 = vld [vmem:[#allocation67_spill] sm:$0xff] }
 0x347   : > { %v870_v57 = vpop.permute.xlu0 %869 }
 0x349   : > { %1247 = vrot.lane.b32.xlu0 %v4314_v18, %s2203_s27  ;;  %v1572_v18 = vsel %vm1565_vm5, %v1539_v19, %v3555_v61 }
 0x34a   : > { %v1605_v27 = vsel %vm1598_vm6, %v1572_v18, %v3571_v23 }
 0x34b   : > { %v1256_v58 = vpop.permute.xlu0 %1255  ;;  %v1638_v47 = vsel %vm1631_vm7, %v1605_v27, %v3618_v49 }
 0x34c   : > { %v1671_v32 = vsel %vm1664_vm8, %v1638_v47, %v3637_v26 }
 0x34d   : > { %957 = vrot.lane.b32.xlu0 %v4396_v54, %s2208_s12  ;;  %v1704_v23 = vsel %vm1697_vm9, %v1671_v32, %v3672_v25 }
 0x34f   : > { %v966_v21 = vpop.permute.xlu0 %965 }
 0x351   : > { %1343 = vrot.lane.b32.xlu0 %v4374_v33, %s2204_s28  ;;  %v1588_v33 = vsel %vm1565_vm5, %v1555_v22, %v968_v13  ;;  %v3829_v13 = vpop.permute.xlu1 %1315 }
 0x352   : > { %v1621_v62 = vsel %vm1598_vm6, %v1588_v33, %v1064_v42 }
 0x353   : > { %v1352_v10 = vpop.permute.xlu0 %1351  ;;  %v1654_v53 = vsel %vm1631_vm7, %v1621_v62, %v1160_v59  ;;  %v4403_v59 = vld [vmem:[#allocation24_spill] sm:$0xff] }
 0x354   : > { %v1687_v14 = vsel %vm1664_vm8, %v1654_v53, %v1256_v58  ;;  %v1505_v58 = vsel %vm1499_vm3, %v4401_v48, %v4404_v60 }
 0x355   : > { %1053 = vrot.lane.b32.xlu0 %v4398_v0, %s2209_s13  ;;  %v1720_v61 = vsel %vm1697_vm9, %v1687_v14, %v1352_v10  ;;  %v3841_v26 = vpop.permute.xlu1 %1025  ;;  %v1554_v10 = vsel %vm1532_vm4, %v1521_v30, %v870_v57  ;;  %v1538_v63 = vsel %vm1532_vm4, %v1505_v58, %v3627_v7  ;;  %v4405_v57 = vld [vmem:[#allocation13_spill] sm:$0xff] }
 0x356   : > { %v1587_v0 = vsel %vm1565_vm5, %v1554_v10, %v966_v21 }
 0x357   : > { %v1062_v20 = vpop.permute.xlu0 %1061 }
 0x358   : > { %v1620_v41 = vsel %vm1598_vm6, %v1587_v0, %v1062_v20 }
 0x359   : > { %1439 = vrot.lane.b32.xlu0 %v3459_v17, %s2205_s29  ;;  %v1737_v17 = vsel %vm1730_vm11, %v1704_v23, %v3690_v36  ;;  %v3847_v25 = vpop.permute.xlu1 %1411  ;;  %v4407_v23 = vld [vmem:[#allocation65_spill] sm:$0xff] }
 0x35b   : > { %v1448_v42 = vpop.permute.xlu0 %1447 }
 0x35c   : > { %v1753_v44 = vsel %vm1730_vm11, %v1720_v61, %v1448_v42  ;;  %v4406_v61 = vld [vmem:[#allocation69_spill] sm:$0xff] }
 0x35d   : > { %1149 = vrot.lane.b32.xlu0 %v4384_v56, %s2210_s14  ;;  %2133 = vmatprep.subr.msk.mxu0 %vm1763_vm10, %v1753_v44  ;;  %v3851_v16 = vpop.permute.xlu1 %1121  ;;  %v1520_v42 = vsel %vm1499_vm3, %v4369_v46, %v4406_v61  ;;  %v1504_v44 = vsel %vm1499_vm3, %v2430_v43, %v4407_v23  ;;  %v4410_v23 = vld [vmem:[#allocation60_spill] sm:$0xff] }
 0x35e   : > { %2134 = vmatpush3.xpose.msk.msra.mxu0 %vm1763_vm10, %v1737_v17 }
 0x35f   : > { %v1158_v49 = vpop.permute.xlu0 %1157 }
 0x360   : > { %v1653_v19 = vsel %vm1631_vm7, %v1620_v41, %v1158_v49 }
 0x361   : > { %859 = vrot.lane.b32.xlu0 %v4400_v3, %s2207_s11  ;;  %v3866_v8 = vpop.permute.xlu1 %831 }
 0x363   : > { %v868_v11 = vpop.permute.xlu0 %867 }
 0x364   : > { %v1553_v17 = vsel %vm1532_vm4, %v1520_v42, %v868_v11 }
 0x365   : > { %1245 = vrot.lane.b32.xlu0 %v4345_v4, %s2203_s27  ;;  %v1571_v4 = vsel %vm1565_vm5, %v1538_v63, %v3646_v51  ;;  %v1218_v27 = vpop.permute.xlu1 %1217 }
 0x366   : > { %v1604_v22 = vsel %vm1598_vm6, %v1571_v4, %v3684_v31 }
 0x367   : > { %v1254_v36 = vpop.permute.xlu0 %1253  ;;  %v1637_v7 = vsel %vm1631_vm7, %v1604_v22, %v3694_v6  ;;  %v3895_v6 = vld [vmem:[%s4060_s3] sm:$0xff] }
 0x368   : > { %v1686_v33 = vsel %vm1664_vm8, %v1653_v19, %v1254_v36  ;;  %v1670_v21 = vsel %vm1664_vm8, %v1637_v7, %v3731_v35  ;;  %2147 = vmatprep.mubr.msk.f32.mxu0 %vm1763_vm10, %v3895_v6 }
 0x369   : > { %1213 = vrot.lane.b32.xlu0 %v4401_v48, %s2203_s27  ;;  %v1703_v20 = vsel %vm1697_vm9, %v1670_v21, %v3743_v37  ;;  %v3901_v37 = vpop.permute.xlu1 %927 }
 0x36a   : > { %v1736_v62 = vsel %vm1730_vm11, %v1703_v20, %v3768_v12 }
 0x36b   : > { %v964_v56 = vpop.permute.xlu0 %963 }
 0x36c   : > { %v1586_v49 = vsel %vm1565_vm5, %v1553_v17, %v964_v56 }
 0x36d   : > { %923 = vrot.lane.b32.xlu0 %v4297_v5, %s2208_s12  ;;  %v1314_v53 = vpop.permute.xlu1 %1313 }
 0x36f   : > { %v1350_v15 = vpop.permute.xlu0 %1349 }
 0x370   : > { %v1719_v51 = vsel %vm1697_vm9, %v1686_v33, %v1350_v15 }
 0x371   : > { %1309 = vrot.lane.b32.xlu0 %v4403_v59, %s2204_s28  ;;  %v3907_v14 = vpop.permute.xlu1 %1023 }
 0x373   : > { %v1060_v52 = vpop.permute.xlu0 %1059 }
 0x374   : > { %v1619_v36 = vsel %vm1598_vm6, %v1586_v49, %v1060_v52  ;;  %v4408_v52 = vld [vmem:[#allocation62_spill] sm:$0xff] }
 0x375   : > { %1019 = vrot.lane.b32.xlu0 %v4405_v57, %s2209_s13  ;;  %v1410_v48 = vpop.permute.xlu1 %1409 }
 0x377   : > { %v1446_v18 = vpop.permute.xlu0 %1445 }
 0x378   : > { %v1752_v31 = vsel %vm1730_vm11, %v1719_v51, %v1446_v18 }
 0x379   : > { %1405 = vrot.lane.b32.xlu0 %v3141_v29, %s2205_s29  ;;  %2135 = vmatprep.subr.msk.mxu0 %vm1763_vm10, %v1752_v31 }
 0x37a   : > { %2136 = vmatpush3.xpose.msk.msra.mxu0 %vm1763_vm10, %v1736_v62 }
 0x37b   : > { %v1156_v35 = vpop.permute.xlu0 %1155 }
 0x37c   : > { %v1652_v15 = vsel %vm1631_vm7, %v1619_v36, %v1156_v35 }
 0x37d   : > { %1243 = vrot.lane.b32.xlu0 %v4369_v46, %s2203_s27 }
 0x37f   : > { %v866_v12 = vpop.permute.xlu0 %865 }
 0x381   : > { %1339 = vrot.lane.b32.xlu0 %v4393_v45, %s2204_s28  ;;  %v1537_v45 = vsel %vm1532_vm4, %v1504_v44, %v3709_v50  ;;  %v4411_v44 = vld [vmem:[#allocation56_spill] sm:$0xff]  ;;  %s272_s28 = scalar_lea.vmem %s4063_s6, %s2076_s20 }
 0x382   : > { %v1570_v3 = vsel %vm1565_vm5, %v1537_v45, %v3739_v2  ;;  %v1502_v17 = vsel %vm1499_vm3, %v4297_v5, %v4411_v44 }
 0x383   : > { %v1252_v29 = vpop.permute.xlu0 %1251  ;;  %v1603_v46 = vsel %vm1598_vm6, %v1570_v3, %v3749_v1  ;;  %v1535_v49 = vsel %vm1532_vm4, %v1502_v17, %v3866_v8 }
 0x384   : > { %v1636_v43 = vsel %vm1631_vm7, %v1603_v46, %v3788_v28  ;;  %v1685_v11 = vsel %vm1664_vm8, %v1652_v15, %v1252_v29  ;;  %v1120_v28 = vpop.permute.xlu1 %1119  ;;  %v1568_v46 = vsel %vm1565_vm5, %v1535_v49, %v3901_v37 }
 0x385   : > { %1435 = vrot.lane.b32.xlu0 %v3621_v40, %s2205_s29  ;;  %v1669_v50 = vsel %vm1664_vm8, %v1636_v43, %v3798_v24 }
 0x386   : > { %v1702_v2 = vsel %vm1697_vm9, %v1669_v50, %v3829_v13  ;;  %v1519_v13 = vsel %vm1499_vm3, %v4396_v54, %v4408_v52 }
 0x387   : > { %v962_v47 = vpop.permute.xlu0 %961  ;;  %v1735_v1 = vsel %vm1730_vm11, %v1702_v2, %v3847_v25  ;;  %v4409_v25 = vld [vmem:[#allocation58_spill] sm:$0xff]  ;;  %v1552_v22 = vsel %vm1532_vm4, %v1519_v13, %v866_v12 }
 0x388   : > { %v3938_v58 = vpop.permute.xlu1 %2189  ;;  %v1503_v41 = vsel %vm1499_vm3, %v4280_v38, %v4409_v25  ;;  %v1585_v57 = vsel %vm1565_vm5, %v1552_v22, %v962_v47 }
 0x389   : > { %v1536_v19 = vsel %vm1532_vm4, %v1503_v41, %v3792_v55 }
 0x38a   : > { %v1569_v33 = vsel %vm1565_vm5, %v1536_v19, %v3805_v34 }
 0x38b   : > { %v1348_v32 = vpop.permute.xlu0 %1347  ;;  %v1602_v54 = vsel %vm1598_vm6, %v1569_v33, %v3841_v26  ;;  %v4414_v33 = vld [vmem:[#allocation52_spill] sm:$0xff] }
 0x38c   : > { %v1718_v56 = vsel %vm1697_vm9, %v1685_v11, %v1348_v32  ;;  %v1216_v10 = vpop.permute.xlu1 %1215  ;;  %v1635_v38 = vsel %vm1631_vm7, %v1602_v54, %v3851_v16  ;;  %v2191_v54 = vunpack.i.l.bf16 %v3938_v58 }
 0x38d   : > { %v1668_v55 = vsel %vm1664_vm8, %v1635_v38, %v1218_v27  ;;  %v4415_v38 = vld [vmem:[#allocation2_spill] sm:$0xff] }
 0x38e   : > { %v1701_v34 = vsel %vm1697_vm9, %v1668_v55, %v1314_v53  ;;  %v1518_v53 = vsel %vm1499_vm3, %v4354_v9, %v4410_v23  ;;  %v1601_v9 = vsel %vm1598_vm6, %v1568_v46, %v3907_v14  ;;  %v2171_v55 = vunpack.i.l.bf16 %v4414_v33 }
 0x38f   : > { %v1058_v40 = vpop.permute.xlu0 %1057  ;;  %v1734_v12 = vsel %vm1730_vm11, %v1701_v34, %v1410_v48  ;;  %v1634_v5 = vsel %vm1631_vm7, %v1601_v9, %v1120_v28 }
 0x390   : > { %v3943_v4 = vpop.permute.xlu1 %925  ;;  %v1618_v21 = vsel %vm1598_vm6, %v1585_v57, %v1058_v40  ;;  %v1667_v8 = vsel %vm1664_vm8, %v1634_v5, %v1216_v10 }
 0x393   : > { %v1444_v39 = vpop.permute.xlu0 %1443 }
 0x394   : > { %v1751_v30 = vsel %vm1730_vm11, %v1718_v56, %v1444_v39  ;;  %v1312_v20 = vpop.permute.xlu1 %1311 }
 0x395   : > { %2137 = vmatprep.subr.msk.mxu0 %vm1763_vm10, %v1751_v30  ;;  %v1700_v56 = vsel %vm1697_vm9, %v1667_v8, %v1312_v20  ;;  %v4412_v30 = vld [vmem:[#allocation124_spill] sm:$0xff] }
 0x396   : > { %2138 = vmatpush3.xpose.msk.msra.mxu0 %vm1763_vm10, %v1735_v1  ;;  %v4413_v1 = vld [vmem:[#allocation45_spill] sm:$0xff] }
 0x397   : > { %v1154_v59 = vpop.permute.xlu0 %1153  ;;  %v1517_v28 = vsel %vm1499_vm3, %v4413_v1, %v4412_v30 }
 0x398   : > { %v1651_v51 = vsel %vm1631_vm7, %v1618_v21, %v1154_v59  ;;  %v1022_v16 = vpop.permute.xlu1 %1021  ;;  %v2172_v21 = vunpack.i.h.bf16 %v4414_v33 }
 0x39b   : > { %v864_v60 = vpop.permute.xlu0 %863 }
 0x39c   : > { %v1408_v47 = vpop.permute.xlu1 %1407  ;;  %v1551_v45 = vsel %vm1532_vm4, %v1518_v53, %v864_v60 }
 0x39d   : > { %v1733_v39 = vsel %vm1730_vm11, %v1700_v56, %v1408_v47  ;;  %v4416_v47 = vld [vmem:[#allocation3_spill] sm:$0xff] }
 0x39f   : > { %v1250_v24 = vpop.permute.xlu0 %1249 }
 0x3a0   : > { %v1684_v18 = vsel %vm1664_vm8, %v1651_v51, %v1250_v24  ;;  %v1118_v61 = vpop.permute.xlu1 %1117 }
 0x3a3   : > { %v960_v63 = vpop.permute.xlu0 %959 }
 0x3a4   : > { %v956_v40 = vpop.permute.xlu1 %955  ;;  %v1584_v3 = vsel %vm1565_vm5, %v1551_v45, %v960_v63 }
 0x3a7   : > { %v1346_v0 = vpop.permute.xlu0 %1345 }
 0x3a8   : > { %v1717_v31 = vsel %vm1697_vm9, %v1684_v18, %v1346_v0  ;;  %v1342_v2 = vpop.permute.xlu1 %1341  ;;  %v1501_v18 = vsel %vm1499_vm3, %v4415_v38, %v2172_v21 }
 0x3a9   : > { %v1534_v20 = vsel %vm1532_vm4, %v1501_v18, %v2191_v54 }
 0x3aa   : > { %v1567_v34 = vsel %vm1565_vm5, %v1534_v20, %v3943_v4 }
 0x3ab   : > { %v1056_v7 = vpop.permute.xlu0 %1055 }
 0x3ac   : > { %v1617_v48 = vsel %vm1598_vm6, %v1584_v3, %v1056_v7  ;;  %v1052_v59 = vpop.permute.xlu1 %1051 }
 0x3af   : > { %v1442_v62 = vpop.permute.xlu0 %1441 }
 0x3b0   : > { %v1750_v35 = vsel %vm1730_vm11, %v1717_v31, %v1442_v62  ;;  %v1438_v25 = vpop.permute.xlu1 %1437  ;;  %v2192_v62 = vunpack.i.h.bf16 %v3938_v58 }
 0x3b1   : > { %2139 = vmatprep.subr.msk.mxu0 %vm1763_vm10, %v1750_v35 }
 0x3b2   : > { %2140 = vmatpush3.xpose.msk.msra.mxu0 %vm1763_vm10, %v1734_v12  ;;  %v1600_v12 = vsel %vm1598_vm6, %v1567_v34, %v1022_v16 }
 0x3b3   : > { %v1152_v26 = vpop.permute.xlu0 %1151 }
 0x3b4   : > { %v1650_v15 = vsel %vm1631_vm7, %v1617_v48, %v1152_v26  ;;  %v1148_v7 = vpop.permute.xlu1 %1147  ;;  %v1633_v26 = vsel %vm1631_vm7, %v1600_v12, %v1118_v61 }
 0x3b7   : > { %v862_v29 = vpop.permute.xlu0 %861 }
 0x3b8   : > { %v1550_v24 = vsel %vm1532_vm4, %v1517_v28, %v862_v29  ;;  %v1116_v31 = vpop.permute.xlu1 %1115 }
 0x3bb   : > { %v1248_v32 = vpop.permute.xlu0 %1247 }
 0x3bc   : > { %v1683_v43 = vsel %vm1664_vm8, %v1650_v15, %v1248_v32  ;;  %v1500_v32 = vsel %vm1499_vm3, %v4416_v47, %v2171_v55  ;;  %v1212_v4 = vpop.permute.xlu1 %1211 }
 0x3bd   : > { %v1533_v53 = vsel %vm1532_vm4, %v1500_v32, %v2192_v62 }
 0x3bf   : > { %v958_v27 = vpop.permute.xlu0 %957 }
 0x3c0   : > { %v1583_v10 = vsel %vm1565_vm5, %v1550_v24, %v958_v27  ;;  %v4417_v27 = vld [vmem:[#allocation91_spill] sm:$0xff]  ;;  %v1308_v46 = vpop.permute.xlu1 %1307 }
 0x3c3   : > { %v1344_v42 = vpop.permute.xlu0 %1343 }
 0x3c4   : > { %v1716_v11 = vsel %vm1697_vm9, %v1683_v43, %v1344_v42  ;;  %v4418_v42 = vld [vmem:[#allocation44_spill] sm:$0xff] }
 0x3c5   : > { %v1516_v23 = vsel %vm1499_vm3, %v4418_v42, %v4417_v27 }
 0x3c7   : > { %v1054_v36 = vpop.permute.xlu0 %1053 }
 0x3c8   : > { %v1616_v63 = vsel %vm1598_vm6, %v1583_v10, %v1054_v36 }
 0x3cb   : > { %v1440_v50 = vpop.permute.xlu0 %1439 }
 0x3cc   : > { %v1749_v37 = vsel %vm1730_vm11, %v1716_v11, %v1440_v50  ;;  %v1404_v50 = vpop.permute.xlu1 %1403 }
 0x3cd   : > { %2141 = vmatprep.subr.msk.mxu0 %vm1763_vm10, %v1749_v37 }
 0x3ce   : > { %2142 = vmatpush3.xpose.msk.msra.mxu0 %vm1763_vm10, %v1733_v39 }
 0x3cf   : > { %v1150_v14 = vpop.permute.xlu0 %1149 }
 0x3d0   : > { %v1649_v0 = vsel %vm1631_vm7, %v1616_v63, %v1150_v14 }
 0x3d3   : > { %v860_v60 = vpop.permute.xlu0 %859 }
 0x3d4   : > { %v1549_v17 = vsel %vm1532_vm4, %v1516_v23, %v860_v60 }
 0x3d5   : > { %v1582_v49 = vsel %vm1565_vm5, %v1549_v17, %v956_v40 }
 0x3d6   : > { %v1615_v48 = vsel %vm1598_vm6, %v1582_v49, %v1052_v59 }
 0x3d7   : > { %v1246_v52 = vpop.permute.xlu0 %1245  ;;  %v1648_v5 = vsel %vm1631_vm7, %v1615_v48, %v1148_v7 }
 0x3d8   : > { %v1682_v13 = vsel %vm1664_vm8, %v1649_v0, %v1246_v52 }
 0x3d9   : > { %v1715_v41 = vsel %vm1697_vm9, %v1682_v13, %v1342_v2 }
 0x3da   : > { %v1748_v22 = vsel %vm1730_vm11, %v1715_v41, %v1438_v25 }
 0x3db   : > { %v1214_v19 = vpop.permute.xlu0 %1213  ;;  %2143 = vmatprep.subr.msk.mxu0 %vm1763_vm10, %v1748_v22 }
 0x3dc   : > { %v1666_v29 = vsel %vm1664_vm8, %v1633_v26, %v1214_v19 }
 0x3df   : > { %v924_v57 = vpop.permute.xlu0 %923 }
 0x3e0   : > { %v1566_v16 = vsel %vm1565_vm5, %v1533_v53, %v924_v57 }
 0x3e3   : > { %v1310_v51 = vpop.permute.xlu0 %1309 }
 0x3e4   : > { %v1699_v58 = vsel %vm1697_vm9, %v1666_v29, %v1310_v51 }
 0x3e7   : > { %v1020_v35 = vpop.permute.xlu0 %1019 }
 0x3e8   : > { %v1599_v45 = vsel %vm1598_vm6, %v1566_v16, %v1020_v35 }
 0x3e9   : > { %v1632_v36 = vsel %vm1631_vm7, %v1599_v45, %v1116_v31 }
 0x3ea   : > { %v1665_v9 = vsel %vm1664_vm8, %v1632_v36, %v1212_v4 }
 0x3eb   : > { %v1406_v44 = vpop.permute.xlu0 %1405  ;;  %v1698_v8 = vsel %vm1697_vm9, %v1665_v9, %v1308_v46 }
 0x3ec   : > { %v1732_v61 = vsel %vm1730_vm11, %v1699_v58, %v1406_v44  ;;  %v1731_v37 = vsel %vm1730_vm11, %v1698_v8, %v1404_v50 }
 0x3ed   : > { %2144 = vmatpush3.xpose.msk.msra.mxu0 %vm1763_vm10, %v1732_v61 }
 0x3ef   : > { %v1244_v3 = vpop.permute.xlu0 %1243 }
 0x3f0   : > { %v1681_v43 = vsel %vm1664_vm8, %v1648_v5, %v1244_v3 }
 0x3f3   : > { %v1340_v15 = vpop.permute.xlu0 %1339 }
 0x3f4   : > { %v1714_v11 = vsel %vm1697_vm9, %v1681_v43, %v1340_v15 }
 0x3f7   : > { %v1436_v40 = vpop.permute.xlu0 %1435 }
 0x3f8   : > { %v1747_v56 = vsel %vm1730_vm11, %v1714_v11, %v1436_v40 }
 0x3f9   : > { %2145 = vmatprep.subr.msk.mxu0 %vm1763_vm10, %v1747_v56 }
 0x3fa   : > { %2146 = vmatpush3.xpose.msk.msra.mxu0 %vm1763_vm10, %v1731_v37 }
 0x3fd   : > { %2148 = vmatmul.mubr.msk.f32.vlgmr.msra.gmra.mxu0 %vm1763_vm10, %v3895_v6 }
 0x4bd   : > { %v1929_v39 = vpop.f32.mrf.mxu0 }
 0x4be   : > { %1934 = vst [vmem:[%s264_s19] sm:$0xff] %v1929_v39 }
 0x4bf   : > { %v1931_v2 = vpop.f32.mrf.mxu0 }
 0x4c0   : > { %1935 = vst [vmem:[%s264_s19 + $0x8] sm:$0xff] %v1931_v2  ;;  %v1936_v14 = vadd.f32 %v1931_v2, %v1929_v39 }
 0x4c2   : > { %1937 = vadd.xlane.f32.xlu0 %v1936_v14 }
 0x54b   : > { %v1938_v30 = vpop.xlane.xlu0 %1937 }
 0x54c   : > { %v1939_v1 = vmul.f32 0.00390625, %v1938_v30  ;;  %1948 = vst.msk [vmem:[%s268_s25] sm:$0xff] %vm1947_vm12, %v1938_v30 }
 0x54e   : > { %v1940_v6 = vsub.f32 %v1929_v39, %v1939_v1  ;;  %v1941_v28 = vsub.f32 %v1931_v2, %v1939_v1 }
 0x550   : > { %v1942_v59 = vmul.f32 %v1940_v6, %v1940_v6  ;;  %v1943_v60 = vmul.f32 %v1941_v28, %v1941_v28 }
 0x552   : > { %v1944_v24 = vadd.f32 %v1943_v60, %v1942_v59 }
 0x554   : > { %1945 = vadd.xlane.f32.xlu1 %v1944_v24 }
 0x5dd   : > { %v1946_v10 = vpop.xlane.xlu1 %1945 }
 0x5de   : > { %1949 = vst.msk [vmem:[%s272_s28] sm:$0xff] %vm1947_vm12, %v1946_v10 }
 0x5df PF: > { %s17_s21 = sadd.s32 1, %s2199_s21  }
 0x5e0   : > { %p14_p4 = scmp.ge.s32.totalorder %s17_s21, 4  }
 0x5e2   :  { %16 = sbr.rel (!%p14_p4) target bundleno = 1 (0x1), region = 90 }

</bundles_post_ra>
